<compile_context>
chip_gen: v7x
topology: tpu7x:2x2x1
jax: 0.10.0
libtpu: 0.0.40
codegen_flags: <defaults>
</compile_context>

<pallas_src>
import functools

import jax
import jax.numpy as jnp
import numpy as np
from jax.experimental import pallas as pl
from jax.experimental.pallas import tpu as pltpu

HID = 512
MID = 256
PAD_OUT = 128      # lane-padded width of the merged output slab
TILE_B_MAX = 256   # max batch rows per grid step


def _round_up(n, m):
    return ((n + m - 1) // m) * m


def _pick_tile_b(B):
    """Batch tile: multiple of 16, <= TILE_B_MAX, and >= 2 grid steps once the
    padded batch reaches 32 so a v7x megacore can shard the batch axis."""
    b16 = _round_up(max(B, 1), 16)
    if b16 < 32:
        return b16
    half = _round_up((b16 + 1) // 2, 16)
    return min(TILE_B_MAX, half)


def _actor_critic_kernel(
    x_ref,
    # trunk (self.lin): 4 x (Linear 512 + ReLU)
    w1, b1, w2, b2, w3, b3, w4, b4,
    # fused first layer of both heads: 512 -> 1024  ([value 512 | policy 512])
    wvp1, bvp1,
    # value head tail: 512->256 ReLU, 256->1 (value lands in lane 0 of 128)
    vw2, vb2, vw3, vb3,
    # policy head tail: 512->256 ReLU, 256->n_actions (in lanes 1..n_actions), ReLU, Sigmoid
    pw2, pb2, pw3, pb3,
    out_ref,
):
    def linear_f32(h_bf16, w_ref, b_ref):
        # bf16 operands into the MXU, f32 accumulate, f32 bias add.
        return jnp.dot(h_bf16, w_ref[...],
                       preferred_element_type=jnp.float32) + b_ref[...]

    def linear_relu_bf16(h_bf16, w_ref, b_ref):
        # f32 epilogue (bias + ReLU), one cast back to bf16 per layer.
        return jnp.maximum(linear_f32(h_bf16, w_ref, b_ref), 0.0).astype(jnp.bfloat16)

    h = x_ref[...].astype(jnp.bfloat16)
    # self.lin
    h = linear_relu_bf16(h, w1, b1)
    h = linear_relu_bf16(h, w2, b2)
    h = linear_relu_bf16(h, w3, b3)
    h = linear_relu_bf16(h, w4, b4)

    # fused value|policy first layer: one (512,1024) matmul instead of two (512,512)
    vp = linear_relu_bf16(h, wvp1, bvp1)
    v = vp[:, :HID]
    p = vp[:, HID:]

    # value tail (no activation on the value output)
    v = linear_relu_bf16(v, vw2, vb2)
    v = linear_f32(v, vw3, vb3)                  # (tile_b, 128), value in lane 0, zeros elsewhere

    # policy tail (..., ReLU, Sigmoid); policy occupies lanes 1..n_actions
    p = linear_relu_bf16(p, pw2, pb2)
    p = jax.nn.sigmoid(jnp.maximum(linear_f32(p, pw3, pb3), 0.0))

    # Merge into one lane-dense slab: lane 0 = value, lanes 1.. = policy.
    lane = jax.lax.broadcasted_iota(jnp.int32, out_ref.shape, 1)
    out_ref[...] = jnp.where(lane == 0, v, p)


@functools.partial(jax.jit, static_argnames=("n_actions",))
def actor_critic_forward(x, params, n_actions):
    """x: (B, input_shape) float32. Returns (act_v (B, n_actions), value (B, 1))."""
    B, F = x.shape
    tile_b = _pick_tile_b(B)
    B_pad = _round_up(B, tile_b)
    num_tiles = B_pad // tile_b
    x_pad = jnp.pad(x.astype(jnp.float32), ((0, B_pad - B), (0, 0)))

    flat = []
    for w, b in (*params["trunk"], params["head1"],
                 params["v2"], params["v3"], params["p2"], params["p3"]):
        flat.append(w)
        flat.append(b)

    x_spec = pl.BlockSpec((tile_b, F), lambda i: (i, 0))
    # Constant index_map -> weight/bias blocks stay resident in VMEM across batch tiles.
    weight_specs = [pl.BlockSpec(a.shape, lambda i: (0, 0)) for a in flat]
    out_spec = pl.BlockSpec((tile_b, PAD_OUT), lambda i: (i, 0))

    out_pad = pl.pallas_call(
        _actor_critic_kernel,
        grid=(num_tiles,),
        out_shape=jax.ShapeDtypeStruct((B_pad, PAD_OUT), jnp.float32),
        in_specs=[x_spec] + weight_specs,
        out_specs=out_spec,
        compiler_params=pltpu.CompilerParams(
            dimension_semantics=("parallel",)),
    )(x_pad, *flat)

    value = out_pad[:B, 0:1]
    act_v = out_pad[:B, 1:1 + n_actions]
    return act_v, value


def _init_linear(key, fan_in, fan_out, pad_out=None, col_offset=0):
    """PyTorch-style default init: U(-1/sqrt(fan_in), 1/sqrt(fan_in)).
    Weight stored transposed as (fan_in, out) in bf16; bias as (1, out) f32.
    `col_offset` places the real output columns inside a lane-padded block."""
    k = 1.0 / np.sqrt(fan_in)
    kw, kb = jax.random.split(key)
    out = fan_out if pad_out is None else pad_out
    assert col_offset + fan_out <= out
    w = jnp.zeros((fan_in, out), jnp.float32)
    b = jnp.zeros((1, out), jnp.float32)
    w = w.at[:, col_offset:col_offset + fan_out].set(
        jax.random.uniform(kw, (fan_in, fan_out), jnp.float32, -k, k))
    b = b.at[:, col_offset:col_offset + fan_out].set(
        jax.random.uniform(kb, (1, fan_out), jnp.float32, -k, k))
    return w.astype(jnp.bfloat16), b


def init_params(key, input_shape, n_actions):
    assert n_actions + 1 <= PAD_OUT, "policy width must fit in lanes 1..127"
    keys = jax.random.split(key, 10)
    trunk = (
        _init_linear(keys[0], input_shape, HID),
        _init_linear(keys[1], HID, HID),
        _init_linear(keys[2], HID, HID),
        _init_linear(keys[3], HID, HID),
    )
    vw1, vb1 = _init_linear(keys[4], HID, HID)
    v2 = _init_linear(keys[5], HID, MID)
    v3 = _init_linear(keys[6], MID, 1, pad_out=PAD_OUT)                 # value -> lane 0
    pw1, pb1 = _init_linear(keys[7], HID, HID)
    p2 = _init_linear(keys[8], HID, MID)
    p3 = _init_linear(keys[9], MID, n_actions, pad_out=PAD_OUT,
                      col_offset=1)                                     # policy -> lanes 1..n_actions
    # pre-fuse the two head-first layers (done once, not per call)
    head1 = (jnp.concatenate([vw1, pw1], axis=1),
             jnp.concatenate([vb1, pb1], axis=1))
    return {"trunk": trunk, "head1": head1, "v2": v2, "v3": v3, "p2": p2, "p3": p3}


def reference_forward(x, params, n_actions):
    """Pure-JAX reference with identical math (bf16 dot operands, f32 accumulate)."""
    def lin(h, wb):
        w, b = wb
        return jnp.dot(h.astype(jnp.bfloat16), w,
                       preferred_element_type=jnp.float32) + b

    h = x.astype(jnp.float32)
    for wb in params["trunk"]:
        h = jnp.maximum(lin(h, wb), 0.0)
    vp = jnp.maximum(lin(h, params["head1"]), 0.0)
    v, p = vp[:, :HID], vp[:, HID:]
    v = jnp.maximum(lin(v, params["v2"]), 0.0)
    v = lin(v, params["v3"])[:, :1]
    p = jnp.maximum(lin(p, params["p2"]), 0.0)
    p = jax.nn.sigmoid(jnp.maximum(lin(p, params["p3"]), 0.0))[:, 1:1 + n_actions]
    return p, v


if __name__ == "__main__":
    input_shape = 32
    n_actions = 4
    batch = 2

    key = jax.random.PRNGKey(0)
    k_params, k_x = jax.random.split(key)

    params = init_params(k_params, input_shape, n_actions)
    x = jax.random.normal(k_x, (batch, input_shape), jnp.float32)

    act_v, value = actor_critic_forward(x, params, n_actions)
    jax.block_until_ready((act_v, value))

    # sanity check vs pure-JAX reference (same bf16-at-dot math)
    act_ref, val_ref = reference_forward(x, params, n_actions)
    np.testing.assert_allclose(np.asarray(act_v), np.asarray(act_ref),
                               rtol=1e-3, atol=1e-3)
    np.testing.assert_allclose(np.asarray(value), np.asarray(val_ref),
                               rtol=1e-3, atol=1e-3)

    assert act_v.shape == (batch, n_actions)
    assert value.shape == (batch, 1)
    print("KERNEL_OK")
</pallas_src>

<mosaic_0001>
module attributes {stable_mosaic.version = 11 : i64} {
  func.func @_actor_critic_kernel(%arg0: i32, %arg1: memref<16x32xf32, #tpu.memory_space<vmem>>, %arg2: memref<32x512xbf16, #tpu.memory_space<vmem>>, %arg3: memref<1x512xf32, #tpu.memory_space<vmem>>, %arg4: memref<512x512xbf16, #tpu.memory_space<vmem>>, %arg5: memref<1x512xf32, #tpu.memory_space<vmem>>, %arg6: memref<512x512xbf16, #tpu.memory_space<vmem>>, %arg7: memref<1x512xf32, #tpu.memory_space<vmem>>, %arg8: memref<512x512xbf16, #tpu.memory_space<vmem>>, %arg9: memref<1x512xf32, #tpu.memory_space<vmem>>, %arg10: memref<512x1024xbf16, #tpu.memory_space<vmem>>, %arg11: memref<1x1024xf32, #tpu.memory_space<vmem>>, %arg12: memref<512x256xbf16, #tpu.memory_space<vmem>>, %arg13: memref<1x256xf32, #tpu.memory_space<vmem>>, %arg14: memref<256x128xbf16, #tpu.memory_space<vmem>>, %arg15: memref<1x128xf32, #tpu.memory_space<vmem>>, %arg16: memref<512x256xbf16, #tpu.memory_space<vmem>>, %arg17: memref<1x256xf32, #tpu.memory_space<vmem>>, %arg18: memref<256x128xbf16, #tpu.memory_space<vmem>>, %arg19: memref<1x128xf32, #tpu.memory_space<vmem>>, %arg20: memref<16x128xf32, #tpu.memory_space<vmem>>) attributes {dimension_semantics = [#tpu.dimension_semantics<parallel>], iteration_bounds = array<i64: 1>, scalar_prefetch = 0 : i64, scratch_operands = 0 : i64, tpu.core_type = #tpu.core_type<tc>, window_params = [{transform_indices = @transform_0, window_bounds = array<i64: 16, 32>}, {pipeline_mode = #tpu.pipeline_mode<synchronous>, transform_indices = @transform_1, window_bounds = array<i64: 32, 512>}, {pipeline_mode = #tpu.pipeline_mode<synchronous>, transform_indices = @transform_2, window_bounds = array<i64: 1, 512>}, {pipeline_mode = #tpu.pipeline_mode<synchronous>, transform_indices = @transform_3, window_bounds = array<i64: 512, 512>}, {pipeline_mode = #tpu.pipeline_mode<synchronous>, transform_indices = @transform_4, window_bounds = array<i64: 1, 512>}, {pipeline_mode = #tpu.pipeline_mode<synchronous>, transform_indices = @transform_5, window_bounds = array<i64: 512, 512>}, {pipeline_mode = #tpu.pipeline_mode<synchronous>, transform_indices = @transform_6, window_bounds = array<i64: 1, 512>}, {pipeline_mode = #tpu.pipeline_mode<synchronous>, transform_indices = @transform_7, window_bounds = array<i64: 512, 512>}, {pipeline_mode = #tpu.pipeline_mode<synchronous>, transform_indices = @transform_8, window_bounds = array<i64: 1, 512>}, {pipeline_mode = #tpu.pipeline_mode<synchronous>, transform_indices = @transform_9, window_bounds = array<i64: 512, 1024>}, {pipeline_mode = #tpu.pipeline_mode<synchronous>, transform_indices = @transform_10, window_bounds = array<i64: 1, 1024>}, {pipeline_mode = #tpu.pipeline_mode<synchronous>, transform_indices = @transform_11, window_bounds = array<i64: 512, 256>}, {pipeline_mode = #tpu.pipeline_mode<synchronous>, transform_indices = @transform_12, window_bounds = array<i64: 1, 256>}, {pipeline_mode = #tpu.pipeline_mode<synchronous>, transform_indices = @transform_13, window_bounds = array<i64: 256, 128>}, {pipeline_mode = #tpu.pipeline_mode<synchronous>, transform_indices = @transform_14, window_bounds = array<i64: 1, 128>}, {pipeline_mode = #tpu.pipeline_mode<synchronous>, transform_indices = @transform_15, window_bounds = array<i64: 512, 256>}, {pipeline_mode = #tpu.pipeline_mode<synchronous>, transform_indices = @transform_16, window_bounds = array<i64: 1, 256>}, {pipeline_mode = #tpu.pipeline_mode<synchronous>, transform_indices = @transform_17, window_bounds = array<i64: 256, 128>}, {pipeline_mode = #tpu.pipeline_mode<synchronous>, transform_indices = @transform_18, window_bounds = array<i64: 1, 128>}, {transform_indices = @transform_19, window_bounds = array<i64: 16, 128>}]} {
    %c0 = arith.constant 0 : index
    %c0_0 = arith.constant 0 : index
    %0 = vector.load %arg1[%c0, %c0_0] : memref<16x32xf32, #tpu.memory_space<vmem>>, vector<16x32xf32>
    %1 = arith.truncf %0 : vector<16x32xf32> to vector<16x32xbf16>
    %c0_1 = arith.constant 0 : index
    %c0_2 = arith.constant 0 : index
    %2 = vector.load %arg2[%c0_1, %c0_2] : memref<32x512xbf16, #tpu.memory_space<vmem>>, vector<32x512xbf16>
    %cst = arith.constant dense<0.000000e+00> : vector<16x512xf32>
    %3 = tpu.matmul %1, %2, %cst {dimension_numbers = #tpu.dot_dimension_numbers<[1], [0], [0], [1], [0, 0, 1, 1], [], []>} : vector<16x32xbf16>, vector<32x512xbf16>, vector<16x512xf32> -> vector<16x512xf32>
    %c0_3 = arith.constant 0 : index
    %c0_4 = arith.constant 0 : index
    %4 = vector.load %arg3[%c0_3, %c0_4] : memref<1x512xf32, #tpu.memory_space<vmem>>, vector<1x512xf32>
    %5 = vector.broadcast %4 : vector<1x512xf32> to vector<16x512xf32>
    %6 = arith.addf %3, %5 : vector<16x512xf32>
    %cst_5 = arith.constant 0.000000e+00 : f32
    %7 = vector.broadcast %cst_5 : f32 to vector<16x512xf32>
    %8 = arith.maximumf %6, %7 : vector<16x512xf32>
    %9 = arith.truncf %8 : vector<16x512xf32> to vector<16x512xbf16>
    %c0_6 = arith.constant 0 : index
    %c0_7 = arith.constant 0 : index
    %10 = vector.load %arg4[%c0_6, %c0_7] : memref<512x512xbf16, #tpu.memory_space<vmem>>, vector<512x512xbf16>
    %cst_8 = arith.constant dense<0.000000e+00> : vector<16x512xf32>
    %11 = tpu.matmul %9, %10, %cst_8 {dimension_numbers = #tpu.dot_dimension_numbers<[1], [0], [0], [1], [0, 0, 1, 1], [], []>} : vector<16x512xbf16>, vector<512x512xbf16>, vector<16x512xf32> -> vector<16x512xf32>
    %c0_9 = arith.constant 0 : index
    %c0_10 = arith.constant 0 : index
    %12 = vector.load %arg5[%c0_9, %c0_10] : memref<1x512xf32, #tpu.memory_space<vmem>>, vector<1x512xf32>
    %13 = vector.broadcast %12 : vector<1x512xf32> to vector<16x512xf32>
    %14 = arith.addf %11, %13 : vector<16x512xf32>
    %cst_11 = arith.constant 0.000000e+00 : f32
    %15 = vector.broadcast %cst_11 : f32 to vector<16x512xf32>
    %16 = arith.maximumf %14, %15 : vector<16x512xf32>
    %17 = arith.truncf %16 : vector<16x512xf32> to vector<16x512xbf16>
    %c0_12 = arith.constant 0 : index
    %c0_13 = arith.constant 0 : index
    %18 = vector.load %arg6[%c0_12, %c0_13] : memref<512x512xbf16, #tpu.memory_space<vmem>>, vector<512x512xbf16>
    %cst_14 = arith.constant dense<0.000000e+00> : vector<16x512xf32>
    %19 = tpu.matmul %17, %18, %cst_14 {dimension_numbers = #tpu.dot_dimension_numbers<[1], [0], [0], [1], [0, 0, 1, 1], [], []>} : vector<16x512xbf16>, vector<512x512xbf16>, vector<16x512xf32> -> vector<16x512xf32>
    %c0_15 = arith.constant 0 : index
    %c0_16 = arith.constant 0 : index
    %20 = vector.load %arg7[%c0_15, %c0_16] : memref<1x512xf32, #tpu.memory_space<vmem>>, vector<1x512xf32>
    %21 = vector.broadcast %20 : vector<1x512xf32> to vector<16x512xf32>
    %22 = arith.addf %19, %21 : vector<16x512xf32>
    %cst_17 = arith.constant 0.000000e+00 : f32
    %23 = vector.broadcast %cst_17 : f32 to vector<16x512xf32>
    %24 = arith.maximumf %22, %23 : vector<16x512xf32>
    %25 = arith.truncf %24 : vector<16x512xf32> to vector<16x512xbf16>
    %c0_18 = arith.constant 0 : index
    %c0_19 = arith.constant 0 : index
    %26 = vector.load %arg8[%c0_18, %c0_19] : memref<512x512xbf16, #tpu.memory_space<vmem>>, vector<512x512xbf16>
    %cst_20 = arith.constant dense<0.000000e+00> : vector<16x512xf32>
    %27 = tpu.matmul %25, %26, %cst_20 {dimension_numbers = #tpu.dot_dimension_numbers<[1], [0], [0], [1], [0, 0, 1, 1], [], []>} : vector<16x512xbf16>, vector<512x512xbf16>, vector<16x512xf32> -> vector<16x512xf32>
    %c0_21 = arith.constant 0 : index
    %c0_22 = arith.constant 0 : index
    %28 = vector.load %arg9[%c0_21, %c0_22] : memref<1x512xf32, #tpu.memory_space<vmem>>, vector<1x512xf32>
    %29 = vector.broadcast %28 : vector<1x512xf32> to vector<16x512xf32>
    %30 = arith.addf %27, %29 : vector<16x512xf32>
    %cst_23 = arith.constant 0.000000e+00 : f32
    %31 = vector.broadcast %cst_23 : f32 to vector<16x512xf32>
    %32 = arith.maximumf %30, %31 : vector<16x512xf32>
    %33 = arith.truncf %32 : vector<16x512xf32> to vector<16x512xbf16>
    %c0_24 = arith.constant 0 : index
    %c0_25 = arith.constant 0 : index
    %34 = vector.load %arg10[%c0_24, %c0_25] : memref<512x1024xbf16, #tpu.memory_space<vmem>>, vector<512x1024xbf16>
    %cst_26 = arith.constant dense<0.000000e+00> : vector<16x1024xf32>
    %35 = tpu.matmul %33, %34, %cst_26 {dimension_numbers = #tpu.dot_dimension_numbers<[1], [0], [0], [1], [0, 0, 1, 1], [], []>} : vector<16x512xbf16>, vector<512x1024xbf16>, vector<16x1024xf32> -> vector<16x1024xf32>
    %c0_27 = arith.constant 0 : index
    %c0_28 = arith.constant 0 : index
    %36 = vector.load %arg11[%c0_27, %c0_28] : memref<1x1024xf32, #tpu.memory_space<vmem>>, vector<1x1024xf32>
    %37 = vector.broadcast %36 : vector<1x1024xf32> to vector<16x1024xf32>
    %38 = arith.addf %35, %37 : vector<16x1024xf32>
    %cst_29 = arith.constant 0.000000e+00 : f32
    %39 = vector.broadcast %cst_29 : f32 to vector<16x1024xf32>
    %40 = arith.maximumf %38, %39 : vector<16x1024xf32>
    %41 = arith.truncf %40 : vector<16x1024xf32> to vector<16x1024xbf16>
    %42 = vector.extract_strided_slice %41 {offsets = [0, 0], sizes = [16, 512], strides = [1, 1]} : vector<16x1024xbf16> to vector<16x512xbf16>
    %43 = vector.extract_strided_slice %41 {offsets = [0, 512], sizes = [16, 512], strides = [1, 1]} : vector<16x1024xbf16> to vector<16x512xbf16>
    %c0_30 = arith.constant 0 : index
    %c0_31 = arith.constant 0 : index
    %44 = vector.load %arg12[%c0_30, %c0_31] : memref<512x256xbf16, #tpu.memory_space<vmem>>, vector<512x256xbf16>
    %cst_32 = arith.constant dense<0.000000e+00> : vector<16x256xf32>
    %45 = tpu.matmul %42, %44, %cst_32 {dimension_numbers = #tpu.dot_dimension_numbers<[1], [0], [0], [1], [0, 0, 1, 1], [], []>} : vector<16x512xbf16>, vector<512x256xbf16>, vector<16x256xf32> -> vector<16x256xf32>
    %c0_33 = arith.constant 0 : index
    %c0_34 = arith.constant 0 : index
    %46 = vector.load %arg13[%c0_33, %c0_34] : memref<1x256xf32, #tpu.memory_space<vmem>>, vector<1x256xf32>
    %47 = vector.broadcast %46 : vector<1x256xf32> to vector<16x256xf32>
    %48 = arith.addf %45, %47 : vector<16x256xf32>
    %cst_35 = arith.constant 0.000000e+00 : f32
    %49 = vector.broadcast %cst_35 : f32 to vector<16x256xf32>
    %50 = arith.maximumf %48, %49 : vector<16x256xf32>
    %51 = arith.truncf %50 : vector<16x256xf32> to vector<16x256xbf16>
    %c0_36 = arith.constant 0 : index
    %c0_37 = arith.constant 0 : index
    %52 = vector.load %arg14[%c0_36, %c0_37] : memref<256x128xbf16, #tpu.memory_space<vmem>>, vector<256x128xbf16>
    %cst_38 = arith.constant dense<0.000000e+00> : vector<16x128xf32>
    %53 = tpu.matmul %51, %52, %cst_38 {dimension_numbers = #tpu.dot_dimension_numbers<[1], [0], [0], [1], [0, 0, 1, 1], [], []>} : vector<16x256xbf16>, vector<256x128xbf16>, vector<16x128xf32> -> vector<16x128xf32>
    %c0_39 = arith.constant 0 : index
    %c0_40 = arith.constant 0 : index
    %54 = vector.load %arg15[%c0_39, %c0_40] : memref<1x128xf32, #tpu.memory_space<vmem>>, vector<1x128xf32>
    %55 = vector.broadcast %54 : vector<1x128xf32> to vector<16x128xf32>
    %56 = arith.addf %53, %55 : vector<16x128xf32>
    %c0_41 = arith.constant 0 : index
    %c0_42 = arith.constant 0 : index
    %57 = vector.load %arg16[%c0_41, %c0_42] : memref<512x256xbf16, #tpu.memory_space<vmem>>, vector<512x256xbf16>
    %cst_43 = arith.constant dense<0.000000e+00> : vector<16x256xf32>
    %58 = tpu.matmul %43, %57, %cst_43 {dimension_numbers = #tpu.dot_dimension_numbers<[1], [0], [0], [1], [0, 0, 1, 1], [], []>} : vector<16x512xbf16>, vector<512x256xbf16>, vector<16x256xf32> -> vector<16x256xf32>
    %c0_44 = arith.constant 0 : index
    %c0_45 = arith.constant 0 : index
    %59 = vector.load %arg17[%c0_44, %c0_45] : memref<1x256xf32, #tpu.memory_space<vmem>>, vector<1x256xf32>
    %60 = vector.broadcast %59 : vector<1x256xf32> to vector<16x256xf32>
    %61 = arith.addf %58, %60 : vector<16x256xf32>
    %cst_46 = arith.constant 0.000000e+00 : f32
    %62 = vector.broadcast %cst_46 : f32 to vector<16x256xf32>
    %63 = arith.maximumf %61, %62 : vector<16x256xf32>
    %64 = arith.truncf %63 : vector<16x256xf32> to vector<16x256xbf16>
    %c0_47 = arith.constant 0 : index
    %c0_48 = arith.constant 0 : index
    %65 = vector.load %arg18[%c0_47, %c0_48] : memref<256x128xbf16, #tpu.memory_space<vmem>>, vector<256x128xbf16>
    %cst_49 = arith.constant dense<0.000000e+00> : vector<16x128xf32>
    %66 = tpu.matmul %64, %65, %cst_49 {dimension_numbers = #tpu.dot_dimension_numbers<[1], [0], [0], [1], [0, 0, 1, 1], [], []>} : vector<16x256xbf16>, vector<256x128xbf16>, vector<16x128xf32> -> vector<16x128xf32>
    %c0_50 = arith.constant 0 : index
    %c0_51 = arith.constant 0 : index
    %67 = vector.load %arg19[%c0_50, %c0_51] : memref<1x128xf32, #tpu.memory_space<vmem>>, vector<1x128xf32>
    %68 = vector.broadcast %67 : vector<1x128xf32> to vector<16x128xf32>
    %69 = arith.addf %66, %68 : vector<16x128xf32>
    %cst_52 = arith.constant 0.000000e+00 : f32
    %70 = vector.broadcast %cst_52 : f32 to vector<16x128xf32>
    %71 = arith.maximumf %69, %70 : vector<16x128xf32>
    %72 = arith.negf %71 : vector<16x128xf32>
    %73 = math.exp %72 : vector<16x128xf32>
    %cst_53 = arith.constant 1.000000e+00 : f32
    %74 = vector.broadcast %cst_53 : f32 to vector<16x128xf32>
    %75 = arith.addf %74, %73 : vector<16x128xf32>
    %76 = arith.divf %74, %75 : vector<16x128xf32>
    %77 = tpu.iota {dimensions = array<i32: 1>} : vector<16x128xi32>
    %c0_i32 = arith.constant 0 : i32
    %78 = vector.broadcast %c0_i32 : i32 to vector<16x128xi32>
    %79 = arith.cmpi eq, %77, %78 : vector<16x128xi32>
    %80 = arith.select %79, %56, %76 : vector<16x128xi1>, vector<16x128xf32>
    %c0_54 = arith.constant 0 : index
    %c0_55 = arith.constant 0 : index
    %81 = vector.load %arg20[%c0_54, %c0_55] : memref<16x128xf32, #tpu.memory_space<vmem>>, vector<16x128xf32>
    tpu.vector_store %arg20[%c0_54, %c0_55], %80 {strides = array<i32>} : memref<16x128xf32, #tpu.memory_space<vmem>>, vector<16x128xf32>,
    return
  }
  func.func @transform_0(%arg0: i32) -> (i32, i32) {
    %c0_i32 = arith.constant 0 : i32
    %c0_i32_0 = arith.constant 0 : i32
    return %arg0, %c0_i32 : i32, i32
  }
  func.func @transform_1(%arg0: i32) -> (i32, i32) {
    %c0_i32 = arith.constant 0 : i32
    %c0_i32_0 = arith.constant 0 : i32
    %c0_i32_1 = arith.constant 0 : i32
    return %c0_i32, %c0_i32_0 : i32, i32
  }
  func.func @transform_2(%arg0: i32) -> (i32, i32) {
    %c0_i32 = arith.constant 0 : i32
    %c0_i32_0 = arith.constant 0 : i32
    %c0_i32_1 = arith.constant 0 : i32
    return %c0_i32, %c0_i32_0 : i32, i32
  }
  func.func @transform_3(%arg0: i32) -> (i32, i32) {
    %c0_i32 = arith.constant 0 : i32
    %c0_i32_0 = arith.constant 0 : i32
    %c0_i32_1 = arith.constant 0 : i32
    return %c0_i32, %c0_i32_0 : i32, i32
  }
  func.func @transform_4(%arg0: i32) -> (i32, i32) {
    %c0_i32 = arith.constant 0 : i32
    %c0_i32_0 = arith.constant 0 : i32
    %c0_i32_1 = arith.constant 0 : i32
    return %c0_i32, %c0_i32_0 : i32, i32
  }
  func.func @transform_5(%arg0: i32) -> (i32, i32) {
    %c0_i32 = arith.constant 0 : i32
    %c0_i32_0 = arith.constant 0 : i32
    %c0_i32_1 = arith.constant 0 : i32
    return %c0_i32, %c0_i32_0 : i32, i32
  }
  func.func @transform_6(%arg0: i32) -> (i32, i32) {
    %c0_i32 = arith.constant 0 : i32
    %c0_i32_0 = arith.constant 0 : i32
    %c0_i32_1 = arith.constant 0 : i32
    return %c0_i32, %c0_i32_0 : i32, i32
  }
  func.func @transform_7(%arg0: i32) -> (i32, i32) {
    %c0_i32 = arith.constant 0 : i32
    %c0_i32_0 = arith.constant 0 : i32
    %c0_i32_1 = arith.constant 0 : i32
    return %c0_i32, %c0_i32_0 : i32, i32
  }
  func.func @transform_8(%arg0: i32) -> (i32, i32) {
    %c0_i32 = arith.constant 0 : i32
    %c0_i32_0 = arith.constant 0 : i32
    %c0_i32_1 = arith.constant 0 : i32
    return %c0_i32, %c0_i32_0 : i32, i32
  }
  func.func @transform_9(%arg0: i32) -> (i32, i32) {
    %c0_i32 = arith.constant 0 : i32
    %c0_i32_0 = arith.constant 0 : i32
    %c0_i32_1 = arith.constant 0 : i32
    return %c0_i32, %c0_i32_0 : i32, i32
  }
  func.func @transform_10(%arg0: i32) -> (i32, i32) {
    %c0_i32 = arith.constant 0 : i32
    %c0_i32_0 = arith.constant 0 : i32
    %c0_i32_1 = arith.constant 0 : i32
    return %c0_i32, %c0_i32_0 : i32, i32
  }
  func.func @transform_11(%arg0: i32) -> (i32, i32) {
    %c0_i32 = arith.constant 0 : i32
    %c0_i32_0 = arith.constant 0 : i32
    %c0_i32_1 = arith.constant 0 : i32
    return %c0_i32, %c0_i32_0 : i32, i32
  }
  func.func @transform_12(%arg0: i32) -> (i32, i32) {
    %c0_i32 = arith.constant 0 : i32
    %c0_i32_0 = arith.constant 0 : i32
    %c0_i32_1 = arith.constant 0 : i32
    return %c0_i32, %c0_i32_0 : i32, i32
  }
  func.func @transform_13(%arg0: i32) -> (i32, i32) {
    %c0_i32 = arith.constant 0 : i32
    %c0_i32_0 = arith.constant 0 : i32
    %c0_i32_1 = arith.constant 0 : i32
    return %c0_i32, %c0_i32_0 : i32, i32
  }
  func.func @transform_14(%arg0: i32) -> (i32, i32) {
    %c0_i32 = arith.constant 0 : i32
    %c0_i32_0 = arith.constant 0 : i32
    %c0_i32_1 = arith.constant 0 : i32
    return %c0_i32, %c0_i32_0 : i32, i32
  }
  func.func @transform_15(%arg0: i32) -> (i32, i32) {
    %c0_i32 = arith.constant 0 : i32
    %c0_i32_0 = arith.constant 0 : i32
    %c0_i32_1 = arith.constant 0 : i32
    return %c0_i32, %c0_i32_0 : i32, i32
  }
  func.func @transform_16(%arg0: i32) -> (i32, i32) {
    %c0_i32 = arith.constant 0 : i32
    %c0_i32_0 = arith.constant 0 : i32
    %c0_i32_1 = arith.constant 0 : i32
    return %c0_i32, %c0_i32_0 : i32, i32
  }
  func.func @transform_17(%arg0: i32) -> (i32, i32) {
    %c0_i32 = arith.constant 0 : i32
    %c0_i32_0 = arith.constant 0 : i32
    %c0_i32_1 = arith.constant 0 : i32
    return %c0_i32, %c0_i32_0 : i32, i32
  }
  func.func @transform_18(%arg0: i32) -> (i32, i32) {
    %c0_i32 = arith.constant 0 : i32
    %c0_i32_0 = arith.constant 0 : i32
    %c0_i32_1 = arith.constant 0 : i32
    return %c0_i32, %c0_i32_0 : i32, i32
  }
  func.func @transform_19(%arg0: i32) -> (i32, i32) {
    %c0_i32 = arith.constant 0 : i32
    %c0_i32_0 = arith.constant 0 : i32
    return %arg0, %c0_i32 : i32, i32
  }
}

</mosaic_0001>

<bundles_post_ra>
// kernel: actor_critic_forward.1
= control target key start
LH: loop header
LB: loop body
LE: loop exit
PB: predicated region body
PF: predicated region fallthrough
CT: control target
= control target key end

     0   :  { %s8974_s0 = inlined_call_operand.vmem [shape: f32[16,32], index: 0, kind: input, shape index: {}]   ;;  %s8975_s1 = inlined_call_operand.hbm [shape: bf16[32,512], index: 1, kind: input, shape index: {}]   ;;  %s8976_s2 = inlined_call_operand.vmem [shape: f32[1,512], index: 2, kind: input, shape index: {}]   ;;  %s8977_s3 = inlined_call_operand.hbm [shape: bf16[512,512], index: 3, kind: input, shape index: {}]   ;;  %s8978_s4 = inlined_call_operand.vmem [shape: f32[1,512], index: 4, kind: input, shape index: {}]   ;;  %s8979_s5 = inlined_call_operand.hbm [shape: bf16[512,512], index: 5, kind: input, shape index: {}]   ;;  %s8980_s6 = inlined_call_operand.vmem [shape: f32[1,512], index: 6, kind: input, shape index: {}]   ;;  %s8981_s7 = inlined_call_operand.hbm [shape: bf16[512,512], index: 7, kind: input, shape index: {}]   ;;  %s8982_s8 = inlined_call_operand.vmem [shape: f32[1,512], index: 8, kind: input, shape index: {}]   ;;  %s8983_s9 = inlined_call_operand.hbm [shape: bf16[512,1024], index: 9, kind: input, shape index: {}]   ;;  %s8984_s10 = inlined_call_operand.vmem [shape: f32[1,1024], index: 10, kind: input, shape index: {}]   ;;  %s8985_s11 = inlined_call_operand.hbm [shape: bf16[512,256], index: 11, kind: input, shape index: {}]   ;;  %s8986_s12 = inlined_call_operand.vmem [shape: f32[1,256], index: 12, kind: input, shape index: {}]   ;;  %s8987_s13 = inlined_call_operand.hbm [shape: bf16[256,128], index: 13, kind: input, shape index: {}]   ;;  %s8988_s14 = inlined_call_operand.vmem [shape: f32[1,128], index: 14, kind: input, shape index: {}]   ;;  %s8989_s15 = inlined_call_operand.hbm [shape: bf16[512,256], index: 15, kind: input, shape index: {}]   ;;  %s8990_s16 = inlined_call_operand.vmem [shape: f32[1,256], index: 16, kind: input, shape index: {}]   ;;  %s8991_s17 = inlined_call_operand.hbm [shape: bf16[256,128], index: 17, kind: input, shape index: {}]   ;;  %s8992_s18 = inlined_call_operand.vmem [shape: f32[1,128], index: 18, kind: input, shape index: {}]   ;;  %s8993_s19 = inlined_call_operand.vmem [shape: f32[16,128], index: 19, kind: output, shape index: {}]  }
   0x1   :  { %9001 = sst [smem:[#allocation21_spill]] %s8974_s0 }
   0x2   :  { %9002 = sst [smem:[#allocation22_spill]] %s8975_s1 }
   0x3   :  { %9003 = sst [smem:[#allocation23_spill]] %s8976_s2 }
   0x4   :  { %9004 = sst [smem:[#allocation24_spill]] %s8977_s3 }
   0x5   :  { %24 = vsyncpa [#allocation3], 0 }
   0x6   :  { %25 = vsyncpa [#allocation5], 0 }
   0x7   :  { %26 = vsyncpa [#allocation8], 0 }
   0x8   :  { %27 = vsyncpa [#allocation11], 0 }
   0x9   :  { %28 = vsyncpa [#allocation14], 0  ;;  %s8586_s0 = smov [#allocation4]   ;;  %s8587_s20 = smov [#allocation7]  }
   0xa   :  { %s50_s30 = sshll.u32 %s8586_s0, 4  ;;  %s78_s21 = sshll.u32 %s8587_s20, 4  ;;  %s51_s30 = int_to_ptr.vmem [resolvable:$true] %s50_s30  ;;  %s8704_s21 = int_to_ptr.vmem [resolvable:$true] %s78_s21 }
   0xb   :  { %s9005_s2 = sld [smem:[#allocation24_spill]] }
  0x11   :  { %s8378_s23 = scalar_lea.hbm %s9005_s2, 16384 }
  0x12   :  { %p8379_p0 = scmp.ne.s32.totalorder %s9005_s2, %s8378_s23  ;;  %p8382_p1 = scmp.lt.u32.totalorder %s8378_s23, %s9005_s2 }
  0x14   :  { %p8384_p2 = pnand %p8382_p1, %p8379_p0 }
  0x16   :  { %8387 = shalt.err (!%p8384_p2)
}
  0x17   :  { %s8388_s27 = scalar_lea.vmem %s51_s30, 16384  ;;  %p8393_p4 = scmp.lt.s32.totalorder %s51_s30, %s51_s30 }
  0x18   :  { %p8389_p3 = scmp.ne.s32.totalorder %s51_s30, %s8388_s27  ;;  %p8394_p5 = scmp.lt.s32.totalorder %s8388_s27, %s8388_s27 }
  0x1a   :  { %p8395_p6 = por %p8394_p5, %p8393_p4 }
  0x1c   :  { %p8396_p7 = pnand %p8395_p6, %p8389_p3 }
  0x1e   :  { %8399 = shalt.err (!%p8396_p7)
}
  0x1f   :  { %s8997_s28 = smov 256   ;;  %s8999_s29 = smov 16  }
  0x20   :  { %56 = dma.hbm_to_vmem [thread:$0]  %s9005_s2, 16384, %s51_s30, [#allocation5], %s8997_s28, %s8997_s28, %s8999_s29  }
  0x21   :  { %s8400_s23 = scalar_lea.hbm %s8981_s7, 16384 }
  0x22   :  { %p8401_p8 = scmp.ne.s32.totalorder %s8981_s7, %s8400_s23  ;;  %p8404_p9 = scmp.lt.u32.totalorder %s8400_s23, %s8981_s7 }
  0x24   :  { %p8406_p10 = pnand %p8404_p9, %p8401_p8 }
  0x26   :  { %8409 = shalt.err (!%p8406_p10)
}
  0x27   :  { %s8410_s27 = scalar_lea.vmem %s8704_s21, 16384  ;;  %p8415_p12 = scmp.lt.s32.totalorder %s8704_s21, %s8704_s21 }
  0x28   :  { %p8411_p11 = scmp.ne.s32.totalorder %s8704_s21, %s8410_s27  ;;  %p8416_p13 = scmp.lt.s32.totalorder %s8410_s27, %s8410_s27 }
  0x2a   :  { %p8417_p0 = por %p8416_p13, %p8415_p12 }
  0x2c   :  { %p8418_p1 = pnand %p8417_p0, %p8411_p11 }
  0x2e   :  { %8421 = shalt.err (!%p8418_p1)
}
  0x2f   :  { %84 = dma.hbm_to_vmem [thread:$0]  %s8981_s7, 16384, %s8704_s21, [#allocation8], %s8997_s28, %s8997_s28, %s8999_s29  }
  0x30   :  { %s8590_s0 = smov [#allocation10]   ;;  %s8422_s23 = scalar_lea.hbm %s8985_s11, 8192 }
  0x31   :  { %s106_s20 = sshll.u32 %s8590_s0, 4  ;;  %p8423_p2 = scmp.ne.s32.totalorder %s8985_s11, %s8422_s23  ;;  %s107_s20 = int_to_ptr.vmem [resolvable:$true] %s106_s20 }
  0x32   :  { %p8426_p3 = scmp.lt.u32.totalorder %s8422_s23, %s8985_s11 }
  0x34   :  { %p8428_p4 = pnand %p8426_p3, %p8423_p2 }
  0x36   :  { %8431 = shalt.err (!%p8428_p4)
}
  0x37   :  { %s8432_s27 = scalar_lea.vmem %s107_s20, 8192  ;;  %p8437_p6 = scmp.lt.s32.totalorder %s107_s20, %s107_s20 }
  0x38   :  { %p8433_p5 = scmp.ne.s32.totalorder %s107_s20, %s8432_s27  ;;  %p8438_p7 = scmp.lt.s32.totalorder %s8432_s27, %s8432_s27 }
  0x3a   :  { %p8439_p8 = por %p8438_p7, %p8437_p6 }
  0x3c   :  { %p8440_p9 = pnand %p8439_p8, %p8433_p5 }
  0x3e   :  { %8443 = shalt.err (!%p8440_p9)
}
  0x3f   :  { %s8591_s7 = smov 128   ;;  %s8592_s21 = smov 8  }
  0x40   :  { %112 = dma.hbm_to_vmem [thread:$0]  %s8985_s11, 8192, %s107_s20, [#allocation11], %s8591_s7, %s8591_s7, %s8592_s21  }
  0x41   :  { %s8593_s0 = smov [#allocation13]   ;;  %s8594_s22 = smov [#allocation2]  }
  0x42   :  { %s134_s1 = sshll.u32 %s8593_s0, 4  ;;  %s36_s23 = sshll.u32 %s8594_s22, 4  ;;  %s135_s1 = int_to_ptr.vmem [resolvable:$true] %s134_s1  ;;  %s37_s23 = int_to_ptr.vmem [resolvable:$true] %s36_s23 }
  0x43   :  { %s8444_s3 = scalar_lea.hbm %s8989_s15, 8192 }
  0x44   :  { %p8445_p10 = scmp.ne.s32.totalorder %s8989_s15, %s8444_s3  ;;  %p8448_p11 = scmp.lt.u32.totalorder %s8444_s3, %s8989_s15 }
  0x46   :  { %p8450_p12 = pnand %p8448_p11, %p8445_p10 }
  0x48   :  { %8453 = shalt.err (!%p8450_p12)
}
  0x49   :  { %s8454_s11 = scalar_lea.vmem %s135_s1, 8192  ;;  %p8459_p0 = scmp.lt.s32.totalorder %s135_s1, %s135_s1 }
  0x4a   :  { %p8455_p13 = scmp.ne.s32.totalorder %s135_s1, %s8454_s11  ;;  %p8460_p1 = scmp.lt.s32.totalorder %s8454_s11, %s8454_s11 }
  0x4c   :  { %p8461_p2 = por %p8460_p1, %p8459_p0 }
  0x4e   :  { %p8462_p3 = pnand %p8461_p2, %p8455_p13 }
  0x50   :  { %8465 = shalt.err (!%p8462_p3)
}
  0x51   :  { %140 = dma.hbm_to_vmem [thread:$0]  %s8989_s15, 8192, %s135_s1, [#allocation14], %s8591_s7, %s8591_s7, %s8592_s21  }
  0x52   :  { %s9006_s22 = sld [smem:[#allocation22_spill]] }
  0x58   :  { %s8466_s24 = scalar_lea.hbm %s9006_s22, 1024 }
  0x59   :  { %p8467_p4 = scmp.ne.s32.totalorder %s9006_s22, %s8466_s24  ;;  %p8470_p5 = scmp.lt.u32.totalorder %s8466_s24, %s9006_s22 }
  0x5b   :  { %p8472_p6 = pnand %p8470_p5, %p8467_p4 }
  0x5d   :  { %8475 = shalt.err (!%p8472_p6)
}
  0x5e   :  { %s8476_s26 = scalar_lea.vmem %s37_s23, 1024  ;;  %p8481_p8 = scmp.lt.s32.totalorder %s37_s23, %s37_s23 }
  0x5f   :  { %p8477_p7 = scmp.ne.s32.totalorder %s37_s23, %s8476_s26  ;;  %p8482_p9 = scmp.lt.s32.totalorder %s8476_s26, %s8476_s26 }
  0x61   :  { %p8483_p10 = por %p8482_p9, %p8481_p8 }
  0x63   :  { %p8484_p11 = pnand %p8483_p10, %p8477_p7 }
  0x65   :  { %8487 = shalt.err (!%p8484_p11)
}
  0x66   :  { %s9007_s15 = smov 16   ;;  %s9008_s7 = smov 256  }
  0x67   :  { %42 = dma.hbm_to_vmem [thread:$0]  %s9006_s22, 1024, %s37_s23, [#allocation3], %s9008_s7, %s9008_s7, %s9007_s15  }
  0x68   :  { %s8595_s27 = smov [#allocation6]   ;;  %s8596_s20 = smov [#allocation9]  }
  0x69   :  { %s64_s11 = sshll.u32 %s8595_s27, 4  ;;  %s92_s30 = sshll.u32 %s8596_s20, 4  ;;  %s65_s11 = int_to_ptr.vmem [resolvable:$true] %s64_s11  ;;  %s93_s30 = int_to_ptr.vmem [resolvable:$true] %s92_s30 }
  0x6a   :  { %s8488_s24 = scalar_lea.hbm %s8979_s5, 16384 }
  0x6b   :  { %p8489_p12 = scmp.ne.s32.totalorder %s8979_s5, %s8488_s24  ;;  %p8492_p13 = scmp.lt.u32.totalorder %s8488_s24, %s8979_s5 }
  0x6d   :  { %p8494_p0 = pnand %p8492_p13, %p8489_p12 }
  0x6f   :  { %8497 = shalt.err (!%p8494_p0)
}
  0x70   :  { %s8498_s23 = scalar_lea.vmem %s65_s11, 16384  ;;  %p8503_p2 = scmp.lt.s32.totalorder %s65_s11, %s65_s11 }
  0x71   :  { %p8499_p1 = scmp.ne.s32.totalorder %s65_s11, %s8498_s23  ;;  %p8504_p3 = scmp.lt.s32.totalorder %s8498_s23, %s8498_s23 }
  0x73   :  { %p8505_p4 = por %p8504_p3, %p8503_p2 }
  0x75   :  { %p8506_p5 = pnand %p8505_p4, %p8499_p1 }
  0x77   :  { %8509 = shalt.err (!%p8506_p5)
}
  0x78   :  { %70 = dma.hbm_to_vmem [thread:$0]  %s8979_s5, 16384, %s65_s11, [#allocation5], %s9008_s7, %s9008_s7, %s9007_s15  }
  0x79   :  { %s8510_s27 = scalar_lea.hbm %s8983_s9, 32768 }
  0x7a   :  { %p8511_p6 = scmp.ne.s32.totalorder %s8983_s9, %s8510_s27  ;;  %p8514_p7 = scmp.lt.u32.totalorder %s8510_s27, %s8983_s9 }
  0x7c   :  { %p8516_p8 = pnand %p8514_p7, %p8511_p6 }
  0x7e   :  { %8519 = shalt.err (!%p8516_p8)
}
  0x7f   :  { %s8520_s28 = scalar_lea.vmem %s93_s30, 32768  ;;  %p8525_p10 = scmp.lt.s32.totalorder %s93_s30, %s93_s30 }
  0x80   :  { %p8521_p9 = scmp.ne.s32.totalorder %s93_s30, %s8520_s28  ;;  %p8526_p11 = scmp.lt.s32.totalorder %s8520_s28, %s8520_s28 }
  0x82   :  { %p8527_p12 = por %p8526_p11, %p8525_p10 }
  0x84   :  { %p8528_p13 = pnand %p8527_p12, %p8521_p9 }
  0x86   :  { %8531 = shalt.err (!%p8528_p13)
}
  0x87   :  { %s8597_s5 = smov 512   ;;  %s8598_s15 = smov 32  }
  0x88   :  { %98 = dma.hbm_to_vmem [thread:$0]  %s8983_s9, 32768, %s93_s30, [#allocation8], %s8597_s5, %s8597_s5, %s8598_s15  }
  0x89   :  { %s8599_s29 = smov [#allocation12]   ;;  %s8532_s22 = scalar_lea.hbm %s8987_s13, 2048 }
  0x8a   :  { %s120_s25 = sshll.u32 %s8599_s29, 4  ;;  %p8533_p0 = scmp.ne.s32.totalorder %s8987_s13, %s8532_s22  ;;  %s121_s25 = int_to_ptr.vmem [resolvable:$true] %s120_s25 }
  0x8b   :  { %p8536_p1 = scmp.lt.u32.totalorder %s8532_s22, %s8987_s13 }
  0x8d   :  { %p8538_p2 = pnand %p8536_p1, %p8533_p0 }
  0x8f   :  { %8541 = shalt.err (!%p8538_p2)
}
  0x90   :  { %s8542_s20 = scalar_lea.vmem %s121_s25, 2048  ;;  %p8547_p4 = scmp.lt.s32.totalorder %s121_s25, %s121_s25 }
  0x91   :  { %p8543_p3 = scmp.ne.s32.totalorder %s121_s25, %s8542_s20  ;;  %p8548_p5 = scmp.lt.s32.totalorder %s8542_s20, %s8542_s20 }
  0x93   :  { %p8549_p6 = por %p8548_p5, %p8547_p4 }
  0x95   :  { %p8550_p7 = pnand %p8549_p6, %p8543_p3 }
  0x97   :  { %8553 = shalt.err (!%p8550_p7)
}
  0x98   :  { %s8600_s9 = smov 64   ;;  %s8601_s30 = smov 4  }
  0x99   :  { %126 = dma.hbm_to_vmem [thread:$0]  %s8987_s13, 2048, %s121_s25, [#allocation11], %s8600_s9, %s8600_s9, %s8601_s30  }
  0x9a   :  { %s8602_s24 = smov [#allocation15]   ;;  %s8554_s7 = scalar_lea.hbm %s8991_s17, 2048 }
  0x9b   :  { %s148_s28 = sshll.u32 %s8602_s24, 4  ;;  %p8555_p8 = scmp.ne.s32.totalorder %s8991_s17, %s8554_s7  ;;  %s149_s28 = int_to_ptr.vmem [resolvable:$true] %s148_s28 }
  0x9c   :  { %p8558_p9 = scmp.lt.u32.totalorder %s8554_s7, %s8991_s17 }
  0x9e   :  { %p8560_p10 = pnand %p8558_p9, %p8555_p8 }
  0xa0   :  { %8563 = shalt.err (!%p8560_p10)
}
  0xa1   :  { %s8564_s22 = scalar_lea.vmem %s149_s28, 2048  ;;  %p8569_p12 = scmp.lt.s32.totalorder %s149_s28, %s149_s28 }
  0xa2   :  { %p8565_p11 = scmp.ne.s32.totalorder %s149_s28, %s8564_s22  ;;  %p8570_p13 = scmp.lt.s32.totalorder %s8564_s22, %s8564_s22 }
  0xa4   :  { %p8571_p0 = por %p8570_p13, %p8569_p12 }
  0xa6   :  { %p8572_p1 = pnand %p8571_p0, %p8565_p11 }
  0xa8   :  { %8575 = shalt.err (!%p8572_p1)
}
  0xa9   :  { %154 = dma.hbm_to_vmem [thread:$0]  %s8991_s17, 2048, %s149_s28, [#allocation14], %s8600_s9, %s8600_s9, %s8601_s30  }
  0xaa   :  { %8576 = dma.done.wait [#allocation3], 1024  }
  0xab   :  { %8577 = vsyncadd [#allocation3], 4294966272 }
  0xac   :  { %8578 = dma.done.wait [#allocation5], 32768  }
  0xad   :  { %8579 = vsyncadd [#allocation5], 4294934528 }
  0xae   :  { %8580 = dma.done.wait [#allocation8], 49152  }
  0xaf   :  { %8581 = vsyncadd [#allocation8], 4294918144 }
  0xb0   :  { %8582 = dma.done.wait [#allocation11], 10240  }
  0xb1   :  { %8583 = vsyncadd [#allocation11], 4294957056 }
  0xb2   :  { %8584 = dma.done.wait [#allocation14], 10240  }
  0xb3   :  { %8585 = vsyncadd [#allocation14], 4294957056  ;;  %v8603_v0 = vmov 0   ;;  %v7558_v1 = vld [vmem:[#allocation2 + $0x4] ss:$16 sps:$4 sm:$0xff]   ;;  %s9009_s21 = sld [smem:[#allocation21_spill]] }
  0xb4   :  { %294 = vmatprep.mubr.bf16.mxu0 %v8603_v0  ;;  %337 = vmatprep.mubr.bf16.mxu1 %v8603_v0  ;;  %v7560_v2 = vld [vmem:[#allocation2] ss:$16 sps:$4 sm:$0xff]   ;;  %v7561_v3 = vld [vmem:[#allocation2 + $0x24] ss:$16 sps:$4 sm:$0xff]   ;;  %v7564_v7 = vld [vmem:[#allocation2 + $0xc] ss:$16 sps:$4 sm:$0xff]  }
  0xb5   :  { %262 = vmatprep.subr.bf16.mxu0 %v7558_v1  ;;  %v7563_v4 = vld [vmem:[#allocation2 + $0x20] ss:$16 sps:$4 sm:$0xff]   ;;  %v7566_v8 = vld [vmem:[#allocation2 + $0x8] ss:$16 sps:$4 sm:$0xff]   ;;  %v7567_v9 = vld [vmem:[#allocation2 + $0x2c] ss:$16 sps:$4 sm:$0xff]   ;;  %305 = vmatprep.subr.bf16.mxu1 %v7564_v7 }
  0xb6   :  { %263 = vmatpush1.bf16.msra.mxu0 %v7560_v2  ;;  %v7569_v10 = vld [vmem:[#allocation2 + $0x28] ss:$16 sps:$4 sm:$0xff]   ;;  %v7570_v12 = vld [vmem:[#allocation4] ss:$16 sps:$4 sm:$0xff]   ;;  %vm258_vm0 = vcmask 261120   ;;  %306 = vmatpush1.bf16.msra.mxu1 %v7566_v8  ;;  %s9010_s30 = sld [smem:[#allocation23_spill]] }
  0xb7   :  { %264 = vmatprep.subr.bf16.mxu0 %v7561_v3  ;;  %v7572_v13 = vld [vmem:[#allocation4 + $0x4] ss:$16 sps:$4 sm:$0xff]   ;;  %307 = vmatprep.subr.bf16.mxu1 %v7567_v9  ;;  %v7575_v14 = vld [vmem:[#allocation4 + $0xc] ss:$16 sps:$4 sm:$0xff]   ;;  %v7573_v16 = vld [vmem:[#allocation4 + $0x8] ss:$16 sps:$4 sm:$0xff]  }
  0xb8   :  { %v7578_v15 = vld [vmem:[#allocation4 + $0x24] ss:$16 sps:$4 sm:$0xff]   ;;  %v7576_v17 = vld [vmem:[#allocation4 + $0x20] ss:$16 sps:$4 sm:$0xff]   ;;  %v7581_v18 = vld [vmem:[#allocation4 + $0x2c] ss:$16 sps:$4 sm:$0xff]  }
  0xb9   :  { %v185_v5 = vld [vmem:[%s9009_s21] sm:$0xff]  ;;  %v186_v6 = vld [vmem:[%s9009_s21 + $0x8] sm:$0xff] }
  0xba   :  { %v187_v11 = vpack.c.bf16 %v186_v6, %v185_v5  ;;  %265 = vmatpush1.bf16.msra.mxu0 %v7563_v4  ;;  %308 = vmatpush1.bf16.msra.mxu1 %v7569_v10  ;;  %v7584_v19 = vld [vmem:[#allocation4 + $0x44] ss:$16 sps:$4 sm:$0xff]   ;;  %v7579_v20 = vld [vmem:[#allocation4 + $0x28] ss:$16 sps:$4 sm:$0xff]   ;;  %v7582_v21 = vld [vmem:[#allocation4 + $0x40] ss:$16 sps:$4 sm:$0xff]  }
  0xbb   :  { %1150 = vmatprep.subr.bf16.mxu0 %v7572_v13  ;;  %1236 = vmatprep.subr.bf16.mxu1 %v7575_v14  ;;  %v7587_v22 = vld [vmem:[#allocation4 + $0x4c] ss:$16 sps:$4 sm:$0xff]   ;;  %v7590_v23 = vld [vmem:[#allocation4 + $0x64] ss:$16 sps:$4 sm:$0xff]   ;;  %v7585_v24 = vld [vmem:[#allocation4 + $0x48] ss:$16 sps:$4 sm:$0xff]   ;;  %v198_v14 = vlaneseq }
  0xbc   :  { %v7588_v25 = vld [vmem:[#allocation4 + $0x60] ss:$16 sps:$4 sm:$0xff]   ;;  %v7593_v26 = vld [vmem:[#allocation4 + $0x6c] ss:$16 sps:$4 sm:$0xff]   ;;  %v7596_v27 = vld [vmem:[#allocation4 + $0x84] ss:$16 sps:$4 sm:$0xff]  }
  0xbd   :  { %6594 = vmatmul.mubr.msk.bf16.vlgmr.msra.gmra.mrb[0].mxu0 %vm258_vm0, %v187_v11  ;;  %6595 = vmatmul.mubr.msk.bf16.vlgmr.msra.gmra.mrb[0].mxu1 %vm258_vm0, %v187_v11  ;;  %v7591_v28 = vld [vmem:[#allocation4 + $0x68] ss:$16 sps:$4 sm:$0xff]   ;;  %v7594_v29 = vld [vmem:[#allocation4 + $0x80] ss:$16 sps:$4 sm:$0xff]   ;;  %v7599_v30 = vld [vmem:[#allocation4 + $0x8c] ss:$16 sps:$4 sm:$0xff]  }
  0xbe   :  { %1151 = vmatpush1.bf16.msra.mxu0 %v7570_v12  ;;  %1237 = vmatpush1.bf16.msra.mxu1 %v7573_v16  ;;  %v7602_v31 = vld [vmem:[#allocation4 + $0xa4] ss:$16 sps:$4 sm:$0xff]   ;;  %v7597_v32 = vld [vmem:[#allocation4 + $0x88] ss:$16 sps:$4 sm:$0xff]   ;;  %v7600_v33 = vld [vmem:[#allocation4 + $0xa0] ss:$16 sps:$4 sm:$0xff]  }
  0xbf   :  { %1152 = vmatprep.subr.bf16.mxu0 %v7578_v15  ;;  %1238 = vmatprep.subr.bf16.mxu1 %v7581_v18  ;;  %v7605_v34 = vld [vmem:[#allocation4 + $0xac] ss:$16 sps:$4 sm:$0xff]   ;;  %v7608_v35 = vld [vmem:[#allocation4 + $0xc4] ss:$16 sps:$4 sm:$0xff]   ;;  %v7603_v36 = vld [vmem:[#allocation4 + $0xa8] ss:$16 sps:$4 sm:$0xff]  }
  0xc0   :  { %v7606_v37 = vld [vmem:[#allocation4 + $0xc0] ss:$16 sps:$4 sm:$0xff]   ;;  %v7611_v38 = vld [vmem:[#allocation4 + $0xcc] ss:$16 sps:$4 sm:$0xff]   ;;  %v7614_v39 = vld [vmem:[#allocation4 + $0xe4] ss:$16 sps:$4 sm:$0xff]  }
  0xc1   :  { %v7609_v40 = vld [vmem:[#allocation4 + $0xc8] ss:$16 sps:$4 sm:$0xff]   ;;  %v7612_v41 = vld [vmem:[#allocation4 + $0xe0] ss:$16 sps:$4 sm:$0xff]   ;;  %v7617_v42 = vld [vmem:[#allocation4 + $0xec] ss:$16 sps:$4 sm:$0xff]  }
  0xc2   :  { %1153 = vmatpush1.bf16.msra.mxu0 %v7576_v17  ;;  %1239 = vmatpush1.bf16.msra.mxu1 %v7579_v20  ;;  %v7620_v43 = vld [vmem:[#allocation4 + $0x104] ss:$16 sps:$4 sm:$0xff]   ;;  %v7615_v44 = vld [vmem:[#allocation4 + $0xe8] ss:$16 sps:$4 sm:$0xff]   ;;  %v7618_v45 = vld [vmem:[#allocation4 + $0x100] ss:$16 sps:$4 sm:$0xff]  }
  0xc3   :  { %1154 = vmatprep.subr.bf16.mxu0 %v7584_v19  ;;  %1240 = vmatprep.subr.bf16.mxu1 %v7587_v22  ;;  %v7623_v46 = vld [vmem:[#allocation4 + $0x10c] ss:$16 sps:$4 sm:$0xff]   ;;  %v7626_v47 = vld [vmem:[#allocation4 + $0x124] ss:$16 sps:$4 sm:$0xff]   ;;  %v7621_v48 = vld [vmem:[#allocation4 + $0x108] ss:$16 sps:$4 sm:$0xff]  }
  0xc4   :  { %v7624_v49 = vld [vmem:[#allocation4 + $0x120] ss:$16 sps:$4 sm:$0xff]   ;;  %v7629_v50 = vld [vmem:[#allocation4 + $0x12c] ss:$16 sps:$4 sm:$0xff]   ;;  %v7632_v51 = vld [vmem:[#allocation4 + $0x144] ss:$16 sps:$4 sm:$0xff]  }
  0xc5   :  { %v7627_v52 = vld [vmem:[#allocation4 + $0x128] ss:$16 sps:$4 sm:$0xff]   ;;  %v7630_v53 = vld [vmem:[#allocation4 + $0x140] ss:$16 sps:$4 sm:$0xff]   ;;  %v7635_v54 = vld [vmem:[#allocation4 + $0x14c] ss:$16 sps:$4 sm:$0xff]  }
  0xc6   :  { %1155 = vmatpush1.bf16.msra.mxu0 %v7582_v21  ;;  %1241 = vmatpush1.bf16.msra.mxu1 %v7585_v24  ;;  %v7638_v55 = vld [vmem:[#allocation4 + $0x164] ss:$16 sps:$4 sm:$0xff]   ;;  %v7633_v56 = vld [vmem:[#allocation4 + $0x148] ss:$16 sps:$4 sm:$0xff]   ;;  %v7636_v57 = vld [vmem:[#allocation4 + $0x160] ss:$16 sps:$4 sm:$0xff]  }
  0xc7   :  { %1156 = vmatprep.subr.bf16.mxu0 %v7590_v23  ;;  %1242 = vmatprep.subr.bf16.mxu1 %v7593_v26  ;;  %v7641_v58 = vld [vmem:[#allocation4 + $0x16c] ss:$16 sps:$4 sm:$0xff]   ;;  %v7644_v59 = vld [vmem:[#allocation4 + $0x184] ss:$16 sps:$4 sm:$0xff]   ;;  %v7639_v60 = vld [vmem:[#allocation4 + $0x168] ss:$16 sps:$4 sm:$0xff]  }
  0xc8   :  { %v7642_v61 = vld [vmem:[#allocation4 + $0x180] ss:$16 sps:$4 sm:$0xff]   ;;  %v7647_v62 = vld [vmem:[#allocation4 + $0x18c] ss:$16 sps:$4 sm:$0xff]   ;;  %v7650_v63 = vld [vmem:[#allocation4 + $0x1a4] ss:$16 sps:$4 sm:$0xff]  }
  0xc9   :  { %v7645_v0 = vld [vmem:[#allocation4 + $0x188] ss:$16 sps:$4 sm:$0xff]   ;;  %v7648_v1 = vld [vmem:[#allocation4 + $0x1a0] ss:$16 sps:$4 sm:$0xff]   ;;  %v7653_v2 = vld [vmem:[#allocation4 + $0x1ac] ss:$16 sps:$4 sm:$0xff]  }
  0xca   :  { %1157 = vmatpush1.bf16.msra.mxu0 %v7588_v25  ;;  %1243 = vmatpush1.bf16.msra.mxu1 %v7591_v28  ;;  %v7651_v3 = vld [vmem:[#allocation4 + $0x1a8] ss:$16 sps:$4 sm:$0xff]   ;;  %v7656_v4 = vld [vmem:[#allocation4 + $0x1c4] ss:$16 sps:$4 sm:$0xff]   ;;  %v7659_v5 = vld [vmem:[#allocation4 + $0x1cc] ss:$16 sps:$4 sm:$0xff]  }
  0xcb   :  { %1158 = vmatprep.subr.bf16.mxu0 %v7596_v27  ;;  %1244 = vmatprep.subr.bf16.mxu1 %v7599_v30  ;;  %v7654_v6 = vld [vmem:[#allocation4 + $0x1c0] ss:$16 sps:$4 sm:$0xff]   ;;  %v7657_v7 = vld [vmem:[#allocation4 + $0x1c8] ss:$16 sps:$4 sm:$0xff]   ;;  %v7662_v8 = vld [vmem:[#allocation4 + $0x1e4] ss:$16 sps:$4 sm:$0xff]  }
  0xcc   :  { %v7665_v9 = vld [vmem:[#allocation4 + $0x1ec] ss:$16 sps:$4 sm:$0xff]   ;;  %v7660_v10 = vld [vmem:[#allocation4 + $0x1e0] ss:$16 sps:$4 sm:$0xff]   ;;  %v7663_v11 = vld [vmem:[#allocation4 + $0x1e8] ss:$16 sps:$4 sm:$0xff]  }
  0xcd   :  { %v7668_v12 = vld [vmem:[#allocation4 + $0x204] ss:$16 sps:$4 sm:$0xff]   ;;  %v7671_v13 = vld [vmem:[#allocation4 + $0x20c] ss:$16 sps:$4 sm:$0xff]   ;;  %v8840_v15 = vshrl.u32 %v198_v14, 7 }
  0xce   :  { %1159 = vmatpush1.bf16.msra.mxu0 %v7594_v29  ;;  %1245 = vmatpush1.bf16.msra.mxu1 %v7597_v32  ;;  %v196_v16 = vld [vmem:[%s9010_s30] sm:$0xf] }
  0xcf   :  { %1160 = vmatprep.subr.bf16.mxu0 %v7602_v31  ;;  %1246 = vmatprep.subr.bf16.mxu1 %v7605_v34  ;;  %v8846_v17 = vsub.s32 0, %v8840_v15  ;;  %v8849_v18 = vsub.s32 1, %v8840_v15  ;;  %v8853_v20 = vsub.s32 2, %v8840_v15  ;;  %v8856_v21 = vsub.s32 3, %v8840_v15 }
  0xd1   :  { %v201_v19 = vrot.slane %v196_v16, %v8846_v17  ;;  %v205_v22 = vrot.slane %v196_v16, %v8849_v18  ;;  %v209_v26 = vrot.slane %v196_v16, %v8853_v20  ;;  %v213_v29 = vrot.slane %v196_v16, %v8856_v21  ;;  %v7705_v16 = vld [vmem:[#allocation4 + $0x2c8] ss:$16 sps:$4 sm:$0xff]  }
  0xd2   :  { %1161 = vmatpush1.bf16.msra.mxu0 %v7600_v33  ;;  %1247 = vmatpush1.bf16.msra.mxu1 %v7603_v36 }
  0xd3   :  { %1162 = vmatprep.subr.bf16.mxu0 %v7608_v35  ;;  %1248 = vmatprep.subr.bf16.mxu1 %v7611_v38 }
  0xd6   :  { %1163 = vmatpush1.bf16.msra.mxu0 %v7606_v37  ;;  %1249 = vmatpush1.bf16.msra.mxu1 %v7609_v40  ;;  %v7666_v40 = vld [vmem:[#allocation4 + $0x200] ss:$16 sps:$4 sm:$0xff]  }
  0xd7   :  { %1164 = vmatprep.subr.bf16.mxu0 %v7614_v39  ;;  %1250 = vmatprep.subr.bf16.mxu1 %v7617_v42 }
  0xda   :  { %1165 = vmatpush1.bf16.msra.mxu0 %v7612_v41  ;;  %1251 = vmatpush1.bf16.msra.mxu1 %v7615_v44  ;;  %v7669_v41 = vld [vmem:[#allocation4 + $0x208] ss:$16 sps:$4 sm:$0xff]  }
  0xdb   :  { %1166 = vmatprep.subr.bf16.mxu0 %v7620_v43  ;;  %1252 = vmatprep.subr.bf16.mxu1 %v7623_v46  ;;  %v7677_v46 = vld [vmem:[#allocation4 + $0x22c] ss:$16 sps:$4 sm:$0xff]  }
  0xde   :  { %1167 = vmatpush1.bf16.msra.mxu0 %v7618_v45  ;;  %1253 = vmatpush1.bf16.msra.mxu1 %v7621_v48  ;;  %v7674_v45 = vld [vmem:[#allocation4 + $0x224] ss:$16 sps:$4 sm:$0xff]  }
  0xdf   :  { %1168 = vmatprep.subr.bf16.mxu0 %v7626_v47  ;;  %1254 = vmatprep.subr.bf16.mxu1 %v7629_v50 }
  0xe2   :  { %1169 = vmatpush1.bf16.msra.mxu0 %v7624_v49  ;;  %1255 = vmatpush1.bf16.msra.mxu1 %v7627_v52 }
  0xe3   :  { %1170 = vmatprep.subr.bf16.mxu0 %v7632_v51  ;;  %1256 = vmatprep.subr.bf16.mxu1 %v7635_v54  ;;  %v7672_v54 = vld [vmem:[#allocation4 + $0x220] ss:$16 sps:$4 sm:$0xff]  }
  0xe6   :  { %1171 = vmatpush1.bf16.msra.mxu0 %v7630_v53  ;;  %1257 = vmatpush1.bf16.msra.mxu1 %v7633_v56 }
  0xe7   :  { %1172 = vmatprep.subr.bf16.mxu0 %v7638_v55  ;;  %1258 = vmatprep.subr.bf16.mxu1 %v7641_v58  ;;  %v7675_v55 = vld [vmem:[#allocation4 + $0x228] ss:$16 sps:$4 sm:$0xff]   ;;  %v7683_v58 = vld [vmem:[#allocation4 + $0x24c] ss:$16 sps:$4 sm:$0xff]  }
  0xea   :  { %1173 = vmatpush1.bf16.msra.mxu0 %v7636_v57  ;;  %1259 = vmatpush1.bf16.msra.mxu1 %v7639_v60  ;;  %v7680_v57 = vld [vmem:[#allocation4 + $0x244] ss:$16 sps:$4 sm:$0xff]  }
  0xeb   :  { %1174 = vmatprep.subr.bf16.mxu0 %v7644_v59  ;;  %1260 = vmatprep.subr.bf16.mxu1 %v7647_v62  ;;  %v7681_v62 = vld [vmem:[#allocation4 + $0x248] ss:$16 sps:$4 sm:$0xff]  }
  0xee   :  { %1175 = vmatpush1.bf16.msra.mxu0 %v7642_v61  ;;  %1261 = vmatpush1.bf16.msra.mxu1 %v7645_v0  ;;  %v7678_v61 = vld [vmem:[#allocation4 + $0x240] ss:$16 sps:$4 sm:$0xff]   ;;  %v7689_v0 = vld [vmem:[#allocation4 + $0x26c] ss:$16 sps:$4 sm:$0xff]  }
  0xef   :  { %1176 = vmatprep.subr.bf16.mxu0 %v7650_v63  ;;  %1262 = vmatprep.subr.bf16.mxu1 %v7653_v2  ;;  %v7686_v63 = vld [vmem:[#allocation4 + $0x264] ss:$16 sps:$4 sm:$0xff]   ;;  %v7687_v2 = vld [vmem:[#allocation4 + $0x268] ss:$16 sps:$4 sm:$0xff]  }
  0xf2   :  { %1177 = vmatpush1.bf16.msra.mxu0 %v7648_v1  ;;  %1263 = vmatpush1.bf16.msra.mxu1 %v7651_v3  ;;  %v7684_v1 = vld [vmem:[#allocation4 + $0x260] ss:$16 sps:$4 sm:$0xff]   ;;  %v7692_v3 = vld [vmem:[#allocation4 + $0x284] ss:$16 sps:$4 sm:$0xff]  }
  0xf3   :  { %1178 = vmatprep.subr.bf16.mxu0 %v7656_v4  ;;  %1264 = vmatprep.subr.bf16.mxu1 %v7659_v5  ;;  %v7695_v4 = vld [vmem:[#allocation4 + $0x28c] ss:$16 sps:$4 sm:$0xff]   ;;  %v7690_v5 = vld [vmem:[#allocation4 + $0x280] ss:$16 sps:$4 sm:$0xff]  }
  0xf6   :  { %1179 = vmatpush1.bf16.msra.mxu0 %v7654_v6  ;;  %1265 = vmatpush1.bf16.msra.mxu1 %v7657_v7  ;;  %v7693_v6 = vld [vmem:[#allocation4 + $0x288] ss:$16 sps:$4 sm:$0xff]   ;;  %v7698_v7 = vld [vmem:[#allocation4 + $0x2a4] ss:$16 sps:$4 sm:$0xff]  }
  0xf7   :  { %1180 = vmatprep.subr.bf16.mxu0 %v7662_v8  ;;  %1266 = vmatprep.subr.bf16.mxu1 %v7665_v9  ;;  %v7701_v8 = vld [vmem:[#allocation4 + $0x2ac] ss:$16 sps:$4 sm:$0xff]   ;;  %v7696_v9 = vld [vmem:[#allocation4 + $0x2a0] ss:$16 sps:$4 sm:$0xff]  }
  0xfa   :  { %1181 = vmatpush1.bf16.msra.mxu0 %v7660_v10  ;;  %1267 = vmatpush1.bf16.msra.mxu1 %v7663_v11  ;;  %v7699_v10 = vld [vmem:[#allocation4 + $0x2a8] ss:$16 sps:$4 sm:$0xff]   ;;  %v7704_v11 = vld [vmem:[#allocation4 + $0x2c4] ss:$16 sps:$4 sm:$0xff]  }
  0xfb   :  { %1193 = vmatprep.subr.bf16.mxu0 %v7668_v12  ;;  %1279 = vmatprep.subr.bf16.mxu1 %v7671_v13  ;;  %v7707_v12 = vld [vmem:[#allocation4 + $0x2cc] ss:$16 sps:$4 sm:$0xff]   ;;  %v7702_v13 = vld [vmem:[#allocation4 + $0x2c0] ss:$16 sps:$4 sm:$0xff]  }
 0x190   :  { %v296_v23 = vpop.f32.mrb[0].mxu0  ;;  %v339_v35 = vpop.f32.mrb[0].mxu1 }
 0x191   :  { %v297_v24 = vadd.f32 %v296_v23, %v201_v19  ;;  %v298_v25 = vpop.f32.mrb[1].mxu0  ;;  %v340_v37 = vadd.f32 %v339_v35, %v209_v26  ;;  %v341_v38 = vpop.f32.mrb[1].mxu1  ;;  %v7708_v23 = vld [vmem:[#allocation4 + $0x2e0] ss:$16 sps:$4 sm:$0xff]  }
 0x192   :  { %v299_v27 = vadd.f32 %v298_v25, %v205_v22  ;;  %v300_v28 = vpop.f32.mrb[2].mxu0  ;;  %v342_v42 = vadd.f32 %v341_v38, %v213_v29  ;;  %v343_v43 = vpop.f32.mrb[2].mxu1  ;;  %v7716_v25 = vld [vmem:[#allocation4 + $0x304] ss:$16 sps:$4 sm:$0xff]   ;;  %v7726_v35 = vld [vmem:[#allocation4 + $0x340] ss:$16 sps:$4 sm:$0xff]  }
 0x193   :  { %v348_v30 = vmax.f32 %v297_v24, 0.0  ;;  %v301_v31 = vadd.f32 %v300_v28, %v201_v19  ;;  %v302_v32 = vpop.f32.mrb[3].mxu0  ;;  %v350_v47 = vmax.f32 %v340_v37, 0.0  ;;  %v344_v48 = vadd.f32 %v343_v43, %v209_v26  ;;  %v345_v49 = vpop.f32.mrb[3].mxu1  ;;  %v7710_v19 = vld [vmem:[#allocation4 + $0x2e4] ss:$16 sps:$4 sm:$0xff]  }
 0x194   :  { %v349_v33 = vmax.f32 %v299_v27, 0.0  ;;  %v303_v34 = vadd.f32 %v302_v32, %v205_v22  ;;  %v351_v51 = vmax.f32 %v342_v42, 0.0  ;;  %v346_v52 = vadd.f32 %v345_v49, %v213_v29  ;;  %v7713_v22 = vld [vmem:[#allocation4 + $0x2ec] ss:$16 sps:$4 sm:$0xff]   ;;  %v7711_v24 = vld [vmem:[#allocation4 + $0x2e8] ss:$16 sps:$4 sm:$0xff]  }
 0x195   :  { %v352_v36 = vmax.f32 %v301_v31, 0.0  ;;  %v354_v53 = vmax.f32 %v344_v48, 0.0  ;;  %v7719_v26 = vld [vmem:[#allocation4 + $0x30c] ss:$16 sps:$4 sm:$0xff]   ;;  %v7714_v27 = vld [vmem:[#allocation4 + $0x300] ss:$16 sps:$4 sm:$0xff]  }
 0x196   :  { %v353_v39 = vmax.f32 %v303_v34, 0.0  ;;  %v355_v56 = vmax.f32 %v346_v52, 0.0  ;;  %v7717_v28 = vld [vmem:[#allocation4 + $0x308] ss:$16 sps:$4 sm:$0xff]   ;;  %v7722_v29 = vld [vmem:[#allocation4 + $0x324] ss:$16 sps:$4 sm:$0xff]  }
 0x197   :  { %v356_v44 = vpack.c.bf16 %v352_v36, %v348_v30  ;;  %v8861_v59 = vpack.c.bf16 %v354_v53, %v350_v47  ;;  %v7725_v30 = vld [vmem:[#allocation4 + $0x32c] ss:$16 sps:$4 sm:$0xff]   ;;  %v7720_v31 = vld [vmem:[#allocation4 + $0x320] ss:$16 sps:$4 sm:$0xff]   ;;  %v7723_v32 = vld [vmem:[#allocation4 + $0x328] ss:$16 sps:$4 sm:$0xff]  }
 0x198   :  { %v357_v50 = vpack.c.bf16 %v353_v39, %v349_v33  ;;  %v359_v60 = vpack.c.bf16 %v355_v56, %v351_v51  ;;  %v7728_v33 = vld [vmem:[#allocation4 + $0x344] ss:$16 sps:$4 sm:$0xff]   ;;  %v7731_v34 = vld [vmem:[#allocation4 + $0x34c] ss:$16 sps:$4 sm:$0xff]   ;;  %v7729_v36 = vld [vmem:[#allocation4 + $0x348] ss:$16 sps:$4 sm:$0xff]  }
 0x199   :  { %v7734_v37 = vld [vmem:[#allocation4 + $0x364] ss:$16 sps:$4 sm:$0xff]   ;;  %v7737_v38 = vld [vmem:[#allocation4 + $0x36c] ss:$16 sps:$4 sm:$0xff]   ;;  %v7732_v39 = vld [vmem:[#allocation4 + $0x360] ss:$16 sps:$4 sm:$0xff]  }
 0x19a   :  { %1182 = vmatprep.mubr.bf16.mxu0 %v357_v50  ;;  %1268 = vmatprep.mubr.bf16.mxu1 %v357_v50  ;;  %v7743_v42 = vld [vmem:[#allocation4 + $0x38c] ss:$16 sps:$4 sm:$0xff]   ;;  %v7738_v43 = vld [vmem:[#allocation4 + $0x380] ss:$16 sps:$4 sm:$0xff]   ;;  %v7747_v48 = vld [vmem:[#allocation4 + $0x3a8] ss:$16 sps:$4 sm:$0xff]  }
 0x19b   :  { %1183 = vmatmul.mubr.bf16.vlgmr.msra.gmra.mrb[4].mxu0 %v356_v44  ;;  %1269 = vmatmul.mubr.bf16.vlgmr.msra.gmra.mrb[4].mxu1 %v356_v44  ;;  %v7741_v44 = vld [vmem:[#allocation4 + $0x388] ss:$16 sps:$4 sm:$0xff]   ;;  %v7744_v47 = vld [vmem:[#allocation4 + $0x3a0] ss:$16 sps:$4 sm:$0xff]   ;;  %v7752_v49 = vld [vmem:[#allocation4 + $0x3c4] ss:$16 sps:$4 sm:$0xff]  }
 0x19c   :  { %1194 = vmatpush1.bf16.msra.mxu0 %v7666_v40  ;;  %1280 = vmatpush1.bf16.msra.mxu1 %v7669_v41  ;;  %v7735_v40 = vld [vmem:[#allocation4 + $0x368] ss:$16 sps:$4 sm:$0xff]   ;;  %v7740_v41 = vld [vmem:[#allocation4 + $0x384] ss:$16 sps:$4 sm:$0xff]   ;;  %v7755_v50 = vld [vmem:[#allocation4 + $0x3cc] ss:$16 sps:$4 sm:$0xff]  }
 0x19d   :  { %1195 = vmatprep.subr.bf16.mxu0 %v7674_v45  ;;  %1281 = vmatprep.subr.bf16.mxu1 %v7677_v46  ;;  %v7746_v45 = vld [vmem:[#allocation4 + $0x3a4] ss:$16 sps:$4 sm:$0xff]   ;;  %v7749_v46 = vld [vmem:[#allocation4 + $0x3ac] ss:$16 sps:$4 sm:$0xff]   ;;  %v7750_v51 = vld [vmem:[#allocation4 + $0x3c0] ss:$16 sps:$4 sm:$0xff]  }
 0x19e   :  { %1225 = vmatprep.mubr.bf16.mxu0 %v359_v60  ;;  %1311 = vmatprep.mubr.bf16.mxu1 %v359_v60  ;;  %v7753_v52 = vld [vmem:[#allocation4 + $0x3c8] ss:$16 sps:$4 sm:$0xff]   ;;  %v7758_v53 = vld [vmem:[#allocation4 + $0x3e4] ss:$16 sps:$4 sm:$0xff]   ;;  %v7762_v60 = vld [vmem:[#allocation6] ss:$16 sps:$4 sm:$0xff]  }
 0x19f   :  { %v7759_v56 = vld [vmem:[#allocation4 + $0x3e8] ss:$16 sps:$4 sm:$0xff]  }
 0x1a0   :  { %1196 = vmatpush1.bf16.msra.mxu0 %v7672_v54  ;;  %1282 = vmatpush1.bf16.msra.mxu1 %v7675_v55  ;;  %v7761_v54 = vld [vmem:[#allocation4 + $0x3ec] ss:$16 sps:$4 sm:$0xff]   ;;  %v7756_v55 = vld [vmem:[#allocation4 + $0x3e0] ss:$16 sps:$4 sm:$0xff]  }
 0x1a1   :  { %1197 = vmatprep.subr.bf16.mxu0 %v7680_v57  ;;  %1283 = vmatprep.subr.bf16.mxu1 %v7683_v58  ;;  %v7764_v57 = vld [vmem:[#allocation6 + $0x4] ss:$16 sps:$4 sm:$0xff]   ;;  %v7767_v58 = vld [vmem:[#allocation6 + $0xc] ss:$16 sps:$4 sm:$0xff]  }
 0x1a4   :  { %1198 = vmatpush1.bf16.msra.mxu0 %v7678_v61  ;;  %1284 = vmatpush1.bf16.msra.mxu1 %v7681_v62  ;;  %v7765_v61 = vld [vmem:[#allocation6 + $0x8] ss:$16 sps:$4 sm:$0xff]   ;;  %v7770_v62 = vld [vmem:[#allocation6 + $0x24] ss:$16 sps:$4 sm:$0xff]  }
 0x1a5   :  { %1199 = vmatprep.subr.bf16.mxu0 %v7686_v63  ;;  %1285 = vmatprep.subr.bf16.mxu1 %v7689_v0  ;;  %v7773_v63 = vld [vmem:[#allocation6 + $0x2c] ss:$16 sps:$4 sm:$0xff]   ;;  %v7768_v0 = vld [vmem:[#allocation6 + $0x20] ss:$16 sps:$4 sm:$0xff]  }
 0x1a8   :  { %1200 = vmatpush1.bf16.msra.mxu0 %v7684_v1  ;;  %1286 = vmatpush1.bf16.msra.mxu1 %v7687_v2  ;;  %v7771_v1 = vld [vmem:[#allocation6 + $0x28] ss:$16 sps:$4 sm:$0xff]   ;;  %v7776_v2 = vld [vmem:[#allocation6 + $0x44] ss:$16 sps:$4 sm:$0xff]  }
 0x1a9   :  { %1201 = vmatprep.subr.bf16.mxu0 %v7692_v3  ;;  %1287 = vmatprep.subr.bf16.mxu1 %v7695_v4  ;;  %v7779_v3 = vld [vmem:[#allocation6 + $0x4c] ss:$16 sps:$4 sm:$0xff]   ;;  %v7774_v4 = vld [vmem:[#allocation6 + $0x40] ss:$16 sps:$4 sm:$0xff]  }
 0x1ac   :  { %1202 = vmatpush1.bf16.msra.mxu0 %v7690_v5  ;;  %1288 = vmatpush1.bf16.msra.mxu1 %v7693_v6  ;;  %v7777_v5 = vld [vmem:[#allocation6 + $0x48] ss:$16 sps:$4 sm:$0xff]   ;;  %v7782_v6 = vld [vmem:[#allocation6 + $0x64] ss:$16 sps:$4 sm:$0xff]  }
 0x1ad   :  { %1203 = vmatprep.subr.bf16.mxu0 %v7698_v7  ;;  %1289 = vmatprep.subr.bf16.mxu1 %v7701_v8  ;;  %v7785_v7 = vld [vmem:[#allocation6 + $0x6c] ss:$16 sps:$4 sm:$0xff]   ;;  %v7780_v8 = vld [vmem:[#allocation6 + $0x60] ss:$16 sps:$4 sm:$0xff]  }
 0x1b0   :  { %1204 = vmatpush1.bf16.msra.mxu0 %v7696_v9  ;;  %1290 = vmatpush1.bf16.msra.mxu1 %v7699_v10  ;;  %v7788_v9 = vld [vmem:[#allocation6 + $0x84] ss:$16 sps:$4 sm:$0xff]   ;;  %v7791_v10 = vld [vmem:[#allocation6 + $0x8c] ss:$16 sps:$4 sm:$0xff]  }
 0x1b1   :  { %1205 = vmatprep.subr.bf16.mxu0 %v7704_v11  ;;  %1291 = vmatprep.subr.bf16.mxu1 %v7707_v12  ;;  %v7786_v11 = vld [vmem:[#allocation6 + $0x80] ss:$16 sps:$4 sm:$0xff]   ;;  %v7789_v12 = vld [vmem:[#allocation6 + $0x88] ss:$16 sps:$4 sm:$0xff]  }
 0x1b4   :  { %1206 = vmatpush1.bf16.msra.mxu0 %v7702_v13  ;;  %1292 = vmatpush1.bf16.msra.mxu1 %v7705_v16  ;;  %v7794_v13 = vld [vmem:[#allocation6 + $0xa4] ss:$16 sps:$4 sm:$0xff]   ;;  %v7797_v16 = vld [vmem:[#allocation6 + $0xac] ss:$16 sps:$4 sm:$0xff]  }
 0x1b5   :  { %1207 = vmatprep.subr.bf16.mxu0 %v7710_v19  ;;  %1293 = vmatprep.subr.bf16.mxu1 %v7713_v22  ;;  %v7792_v19 = vld [vmem:[#allocation6 + $0xa0] ss:$16 sps:$4 sm:$0xff]   ;;  %v7795_v22 = vld [vmem:[#allocation6 + $0xa8] ss:$16 sps:$4 sm:$0xff]  }
 0x1b8   :  { %1208 = vmatpush1.bf16.msra.mxu0 %v7708_v23  ;;  %1294 = vmatpush1.bf16.msra.mxu1 %v7711_v24  ;;  %v7800_v23 = vld [vmem:[#allocation6 + $0xc4] ss:$16 sps:$4 sm:$0xff]   ;;  %v7803_v24 = vld [vmem:[#allocation6 + $0xcc] ss:$16 sps:$4 sm:$0xff]  }
 0x1b9   :  { %1209 = vmatprep.subr.bf16.mxu0 %v7716_v25  ;;  %1295 = vmatprep.subr.bf16.mxu1 %v7719_v26  ;;  %v7798_v25 = vld [vmem:[#allocation6 + $0xc0] ss:$16 sps:$4 sm:$0xff]   ;;  %v7801_v26 = vld [vmem:[#allocation6 + $0xc8] ss:$16 sps:$4 sm:$0xff]  }
 0x1bc   :  { %1210 = vmatpush1.bf16.msra.mxu0 %v7714_v27  ;;  %1296 = vmatpush1.bf16.msra.mxu1 %v7717_v28  ;;  %v7806_v27 = vld [vmem:[#allocation6 + $0xe4] ss:$16 sps:$4 sm:$0xff]   ;;  %v7809_v28 = vld [vmem:[#allocation6 + $0xec] ss:$16 sps:$4 sm:$0xff]  }
 0x1bd   :  { %1211 = vmatprep.subr.bf16.mxu0 %v7722_v29  ;;  %1297 = vmatprep.subr.bf16.mxu1 %v7725_v30  ;;  %v7804_v29 = vld [vmem:[#allocation6 + $0xe0] ss:$16 sps:$4 sm:$0xff]   ;;  %v7807_v30 = vld [vmem:[#allocation6 + $0xe8] ss:$16 sps:$4 sm:$0xff]  }
 0x1c0   :  { %1212 = vmatpush1.bf16.msra.mxu0 %v7720_v31  ;;  %1298 = vmatpush1.bf16.msra.mxu1 %v7723_v32  ;;  %v7812_v31 = vld [vmem:[#allocation6 + $0x104] ss:$16 sps:$4 sm:$0xff]   ;;  %v7815_v32 = vld [vmem:[#allocation6 + $0x10c] ss:$16 sps:$4 sm:$0xff]  }
 0x1c1   :  { %1213 = vmatprep.subr.bf16.mxu0 %v7728_v33  ;;  %1299 = vmatprep.subr.bf16.mxu1 %v7731_v34  ;;  %v7810_v33 = vld [vmem:[#allocation6 + $0x100] ss:$16 sps:$4 sm:$0xff]   ;;  %v7813_v34 = vld [vmem:[#allocation6 + $0x108] ss:$16 sps:$4 sm:$0xff]  }
 0x1c4   :  { %1214 = vmatpush1.bf16.msra.mxu0 %v7726_v35  ;;  %1300 = vmatpush1.bf16.msra.mxu1 %v7729_v36  ;;  %v7818_v35 = vld [vmem:[#allocation6 + $0x124] ss:$16 sps:$4 sm:$0xff]   ;;  %v7821_v36 = vld [vmem:[#allocation6 + $0x12c] ss:$16 sps:$4 sm:$0xff]  }
 0x1c5   :  { %1215 = vmatprep.subr.bf16.mxu0 %v7734_v37  ;;  %1301 = vmatprep.subr.bf16.mxu1 %v7737_v38  ;;  %v7816_v37 = vld [vmem:[#allocation6 + $0x120] ss:$16 sps:$4 sm:$0xff]   ;;  %v7819_v38 = vld [vmem:[#allocation6 + $0x128] ss:$16 sps:$4 sm:$0xff]  }
 0x1c8   :  { %1216 = vmatpush1.bf16.msra.mxu0 %v7732_v39  ;;  %1302 = vmatpush1.bf16.msra.mxu1 %v7735_v40  ;;  %v7824_v39 = vld [vmem:[#allocation6 + $0x144] ss:$16 sps:$4 sm:$0xff]   ;;  %v7827_v40 = vld [vmem:[#allocation6 + $0x14c] ss:$16 sps:$4 sm:$0xff]  }
 0x1c9   :  { %1217 = vmatprep.subr.bf16.mxu0 %v7740_v41  ;;  %1303 = vmatprep.subr.bf16.mxu1 %v7743_v42  ;;  %v7822_v41 = vld [vmem:[#allocation6 + $0x140] ss:$16 sps:$4 sm:$0xff]   ;;  %v7825_v42 = vld [vmem:[#allocation6 + $0x148] ss:$16 sps:$4 sm:$0xff]  }
 0x1cc   :  { %1218 = vmatpush1.bf16.msra.mxu0 %v7738_v43  ;;  %1304 = vmatpush1.bf16.msra.mxu1 %v7741_v44  ;;  %v7830_v43 = vld [vmem:[#allocation6 + $0x164] ss:$16 sps:$4 sm:$0xff]   ;;  %v7833_v44 = vld [vmem:[#allocation6 + $0x16c] ss:$16 sps:$4 sm:$0xff]  }
 0x1cd   :  { %1219 = vmatprep.subr.bf16.mxu0 %v7746_v45  ;;  %1305 = vmatprep.subr.bf16.mxu1 %v7749_v46  ;;  %v7828_v45 = vld [vmem:[#allocation6 + $0x160] ss:$16 sps:$4 sm:$0xff]   ;;  %v7831_v46 = vld [vmem:[#allocation6 + $0x168] ss:$16 sps:$4 sm:$0xff]  }
 0x1d0   :  { %1220 = vmatpush1.bf16.msra.mxu0 %v7744_v47  ;;  %1306 = vmatpush1.bf16.msra.mxu1 %v7747_v48  ;;  %v7836_v47 = vld [vmem:[#allocation6 + $0x184] ss:$16 sps:$4 sm:$0xff]   ;;  %v7839_v48 = vld [vmem:[#allocation6 + $0x18c] ss:$16 sps:$4 sm:$0xff]  }
 0x1d1   :  { %1221 = vmatprep.subr.bf16.mxu0 %v7752_v49  ;;  %1307 = vmatprep.subr.bf16.mxu1 %v7755_v50  ;;  %v7834_v49 = vld [vmem:[#allocation6 + $0x180] ss:$16 sps:$4 sm:$0xff]   ;;  %v7837_v50 = vld [vmem:[#allocation6 + $0x188] ss:$16 sps:$4 sm:$0xff]  }
 0x1d4   :  { %1222 = vmatpush1.bf16.msra.mxu0 %v7750_v51  ;;  %1308 = vmatpush1.bf16.msra.mxu1 %v7753_v52  ;;  %v7842_v51 = vld [vmem:[#allocation6 + $0x1a4] ss:$16 sps:$4 sm:$0xff]   ;;  %v7845_v52 = vld [vmem:[#allocation6 + $0x1ac] ss:$16 sps:$4 sm:$0xff]  }
 0x1d5   :  { %1223 = vmatprep.subr.bf16.mxu0 %v7758_v53  ;;  %1309 = vmatprep.subr.bf16.mxu1 %v7761_v54  ;;  %v7840_v53 = vld [vmem:[#allocation6 + $0x1a0] ss:$16 sps:$4 sm:$0xff]   ;;  %v7843_v54 = vld [vmem:[#allocation6 + $0x1a8] ss:$16 sps:$4 sm:$0xff]  }
 0x1d8   :  { %1224 = vmatpush1.bf16.msra.mxu0 %v7756_v55  ;;  %1310 = vmatpush1.bf16.msra.mxu1 %v7759_v56  ;;  %v7848_v55 = vld [vmem:[#allocation6 + $0x1c4] ss:$16 sps:$4 sm:$0xff]   ;;  %v7851_v56 = vld [vmem:[#allocation6 + $0x1cc] ss:$16 sps:$4 sm:$0xff]  }
 0x1d9   :  { %2124 = vmatprep.subr.bf16.mxu0 %v7764_v57  ;;  %2210 = vmatprep.subr.bf16.mxu1 %v7767_v58  ;;  %v7846_v57 = vld [vmem:[#allocation6 + $0x1c0] ss:$16 sps:$4 sm:$0xff]   ;;  %v7849_v58 = vld [vmem:[#allocation6 + $0x1c8] ss:$16 sps:$4 sm:$0xff]  }
 0x1db   :  { %1226 = vmatmul.mubr.bf16.vlgmr.msra.gmra.mrb[4].mxu0 %v8861_v59  ;;  %1312 = vmatmul.mubr.bf16.vlgmr.msra.gmra.mrb[4].mxu1 %v8861_v59  ;;  %v7783_v59 = vld [vmem:[#allocation6 + $0x68] ss:$16 sps:$4 sm:$0xff]  }
 0x1dc   :  { %2125 = vmatpush1.bf16.msra.mxu0 %v7762_v60  ;;  %2211 = vmatpush1.bf16.msra.mxu1 %v7765_v61  ;;  %v7854_v60 = vld [vmem:[#allocation6 + $0x1e4] ss:$16 sps:$4 sm:$0xff]   ;;  %v7857_v61 = vld [vmem:[#allocation6 + $0x1ec] ss:$16 sps:$4 sm:$0xff]  }
 0x1dd   :  { %2126 = vmatprep.subr.bf16.mxu0 %v7770_v62  ;;  %2212 = vmatprep.subr.bf16.mxu1 %v7773_v63  ;;  %v7852_v62 = vld [vmem:[#allocation6 + $0x1e0] ss:$16 sps:$4 sm:$0xff]   ;;  %v7855_v63 = vld [vmem:[#allocation6 + $0x1e8] ss:$16 sps:$4 sm:$0xff]  }
 0x1e0   :  { %2127 = vmatpush1.bf16.msra.mxu0 %v7768_v0  ;;  %2213 = vmatpush1.bf16.msra.mxu1 %v7771_v1  ;;  %v7860_v0 = vld [vmem:[#allocation6 + $0x204] ss:$16 sps:$4 sm:$0xff]   ;;  %v7863_v1 = vld [vmem:[#allocation6 + $0x20c] ss:$16 sps:$4 sm:$0xff]  }
 0x1e1   :  { %2128 = vmatprep.subr.bf16.mxu0 %v7776_v2  ;;  %2214 = vmatprep.subr.bf16.mxu1 %v7779_v3  ;;  %v488_v2 = vld [vmem:[%s8978_s4] sm:$0xf] }
 0x1e2   :  { %v493_v3 = vrot.slane %v488_v2, %v8846_v17 }
 0x1e4   :  { %2129 = vmatpush1.bf16.msra.mxu0 %v7774_v4  ;;  %2215 = vmatpush1.bf16.msra.mxu1 %v7777_v5  ;;  %v501_v4 = vrot.slane %v488_v2, %v8853_v20  ;;  %v497_v5 = vrot.slane %v488_v2, %v8849_v18 }
 0x1e5   :  { %2130 = vmatprep.subr.bf16.mxu0 %v7782_v6  ;;  %2216 = vmatprep.subr.bf16.mxu1 %v7785_v7  ;;  %v505_v6 = vrot.slane %v488_v2, %v8856_v21  ;;  %v7897_v2 = vld [vmem:[#allocation6 + $0x2c8] ss:$16 sps:$4 sm:$0xff]  }
 0x1e8   :  { %2131 = vmatpush1.bf16.msra.mxu0 %v7780_v8  ;;  %2217 = vmatpush1.bf16.msra.mxu1 %v7783_v59 }
 0x1e9   :  { %2132 = vmatprep.subr.bf16.mxu0 %v7788_v9  ;;  %2218 = vmatprep.subr.bf16.mxu1 %v7791_v10 }
 0x1ec   :  { %2133 = vmatpush1.bf16.msra.mxu0 %v7786_v11  ;;  %2219 = vmatpush1.bf16.msra.mxu1 %v7789_v12 }
 0x1ed   :  { %2134 = vmatprep.subr.bf16.mxu0 %v7794_v13  ;;  %2220 = vmatprep.subr.bf16.mxu1 %v7797_v16 }
 0x1f0   :  { %2135 = vmatpush1.bf16.msra.mxu0 %v7792_v19  ;;  %2221 = vmatpush1.bf16.msra.mxu1 %v7795_v22 }
 0x1f1   :  { %2136 = vmatprep.subr.bf16.mxu0 %v7800_v23  ;;  %2222 = vmatprep.subr.bf16.mxu1 %v7803_v24 }
 0x1f4   :  { %2137 = vmatpush1.bf16.msra.mxu0 %v7798_v25  ;;  %2223 = vmatpush1.bf16.msra.mxu1 %v7801_v26 }
 0x1f5   :  { %2138 = vmatprep.subr.bf16.mxu0 %v7806_v27  ;;  %2224 = vmatprep.subr.bf16.mxu1 %v7809_v28 }
 0x1f8   :  { %2139 = vmatpush1.bf16.msra.mxu0 %v7804_v29  ;;  %2225 = vmatpush1.bf16.msra.mxu1 %v7807_v30 }
 0x1f9   :  { %2140 = vmatprep.subr.bf16.mxu0 %v7812_v31  ;;  %2226 = vmatprep.subr.bf16.mxu1 %v7815_v32 }
 0x1fc   :  { %2141 = vmatpush1.bf16.msra.mxu0 %v7810_v33  ;;  %2227 = vmatpush1.bf16.msra.mxu1 %v7813_v34 }
 0x1fd   :  { %2142 = vmatprep.subr.bf16.mxu0 %v7818_v35  ;;  %2228 = vmatprep.subr.bf16.mxu1 %v7821_v36 }
 0x200   :  { %2143 = vmatpush1.bf16.msra.mxu0 %v7816_v37  ;;  %2229 = vmatpush1.bf16.msra.mxu1 %v7819_v38 }
 0x201   :  { %2144 = vmatprep.subr.bf16.mxu0 %v7824_v39  ;;  %2230 = vmatprep.subr.bf16.mxu1 %v7827_v40  ;;  %v7858_v40 = vld [vmem:[#allocation6 + $0x200] ss:$16 sps:$4 sm:$0xff]  }
 0x204   :  { %2145 = vmatpush1.bf16.msra.mxu0 %v7822_v41  ;;  %2231 = vmatpush1.bf16.msra.mxu1 %v7825_v42  ;;  %v7861_v41 = vld [vmem:[#allocation6 + $0x208] ss:$16 sps:$4 sm:$0xff]   ;;  %v7866_v42 = vld [vmem:[#allocation6 + $0x224] ss:$16 sps:$4 sm:$0xff]  }
 0x205   :  { %2146 = vmatprep.subr.bf16.mxu0 %v7830_v43  ;;  %2232 = vmatprep.subr.bf16.mxu1 %v7833_v44  ;;  %v7869_v43 = vld [vmem:[#allocation6 + $0x22c] ss:$16 sps:$4 sm:$0xff]   ;;  %v7864_v44 = vld [vmem:[#allocation6 + $0x220] ss:$16 sps:$4 sm:$0xff]  }
 0x208   :  { %2147 = vmatpush1.bf16.msra.mxu0 %v7828_v45  ;;  %2233 = vmatpush1.bf16.msra.mxu1 %v7831_v46  ;;  %v7867_v45 = vld [vmem:[#allocation6 + $0x228] ss:$16 sps:$4 sm:$0xff]   ;;  %v7872_v46 = vld [vmem:[#allocation6 + $0x244] ss:$16 sps:$4 sm:$0xff]  }
 0x209   :  { %2148 = vmatprep.subr.bf16.mxu0 %v7836_v47  ;;  %2234 = vmatprep.subr.bf16.mxu1 %v7839_v48  ;;  %v7875_v47 = vld [vmem:[#allocation6 + $0x24c] ss:$16 sps:$4 sm:$0xff]   ;;  %v7870_v48 = vld [vmem:[#allocation6 + $0x240] ss:$16 sps:$4 sm:$0xff]  }
 0x20c   :  { %2149 = vmatpush1.bf16.msra.mxu0 %v7834_v49  ;;  %2235 = vmatpush1.bf16.msra.mxu1 %v7837_v50  ;;  %v7873_v49 = vld [vmem:[#allocation6 + $0x248] ss:$16 sps:$4 sm:$0xff]   ;;  %v7878_v50 = vld [vmem:[#allocation6 + $0x264] ss:$16 sps:$4 sm:$0xff]  }
 0x20d   :  { %2150 = vmatprep.subr.bf16.mxu0 %v7842_v51  ;;  %2236 = vmatprep.subr.bf16.mxu1 %v7845_v52  ;;  %v7881_v51 = vld [vmem:[#allocation6 + $0x26c] ss:$16 sps:$4 sm:$0xff]   ;;  %v7876_v52 = vld [vmem:[#allocation6 + $0x260] ss:$16 sps:$4 sm:$0xff]  }
 0x210   :  { %2151 = vmatpush1.bf16.msra.mxu0 %v7840_v53  ;;  %2237 = vmatpush1.bf16.msra.mxu1 %v7843_v54  ;;  %v7879_v53 = vld [vmem:[#allocation6 + $0x268] ss:$16 sps:$4 sm:$0xff]   ;;  %v7884_v54 = vld [vmem:[#allocation6 + $0x284] ss:$16 sps:$4 sm:$0xff]  }
 0x211   :  { %2152 = vmatprep.subr.bf16.mxu0 %v7848_v55  ;;  %2238 = vmatprep.subr.bf16.mxu1 %v7851_v56  ;;  %v7887_v55 = vld [vmem:[#allocation6 + $0x28c] ss:$16 sps:$4 sm:$0xff]   ;;  %v7882_v56 = vld [vmem:[#allocation6 + $0x280] ss:$16 sps:$4 sm:$0xff]  }
 0x214   :  { %2153 = vmatpush1.bf16.msra.mxu0 %v7846_v57  ;;  %2239 = vmatpush1.bf16.msra.mxu1 %v7849_v58  ;;  %v7885_v57 = vld [vmem:[#allocation6 + $0x288] ss:$16 sps:$4 sm:$0xff]   ;;  %v7890_v58 = vld [vmem:[#allocation6 + $0x2a4] ss:$16 sps:$4 sm:$0xff]  }
 0x215   :  { %2154 = vmatprep.subr.bf16.mxu0 %v7854_v60  ;;  %2240 = vmatprep.subr.bf16.mxu1 %v7857_v61  ;;  %v7893_v60 = vld [vmem:[#allocation6 + $0x2ac] ss:$16 sps:$4 sm:$0xff]   ;;  %v7888_v61 = vld [vmem:[#allocation6 + $0x2a0] ss:$16 sps:$4 sm:$0xff]  }
 0x218   :  { %2155 = vmatpush1.bf16.msra.mxu0 %v7852_v62  ;;  %2241 = vmatpush1.bf16.msra.mxu1 %v7855_v63  ;;  %v7891_v62 = vld [vmem:[#allocation6 + $0x2a8] ss:$16 sps:$4 sm:$0xff]   ;;  %v7896_v63 = vld [vmem:[#allocation6 + $0x2c4] ss:$16 sps:$4 sm:$0xff]  }
 0x219   :  { %2167 = vmatprep.subr.bf16.mxu0 %v7860_v0  ;;  %2253 = vmatprep.subr.bf16.mxu1 %v7863_v1  ;;  %v7899_v0 = vld [vmem:[#allocation6 + $0x2cc] ss:$16 sps:$4 sm:$0xff]   ;;  %v7894_v1 = vld [vmem:[#allocation6 + $0x2c0] ss:$16 sps:$4 sm:$0xff]  }
 0x2ae   :  { %v1227_v7 = vpop.f32.mrb[4].mxu0  ;;  %v1313_v8 = vpop.f32.mrb[4].mxu1 }
 0x2af   :  { %v7444_v59 = vadd.f32 %v1227_v7, %v493_v3  ;;  %v7448_v9 = vadd.f32 %v1313_v8, %v501_v4  ;;  %v1229_v10 = vpop.f32.mrb[5].mxu0  ;;  %v1315_v11 = vpop.f32.mrb[5].mxu1  ;;  %v7908_v7 = vld [vmem:[#allocation6 + $0x304] ss:$16 sps:$4 sm:$0xff]   ;;  %v7911_v8 = vld [vmem:[#allocation6 + $0x30c] ss:$16 sps:$4 sm:$0xff]  }
 0x2b0   :  { %v7445_v12 = vadd.f32 %v1229_v10, %v497_v5  ;;  %v7449_v13 = vadd.f32 %v1315_v11, %v505_v6  ;;  %v1231_v16 = vpop.f32.mrb[6].mxu0  ;;  %v1317_v19 = vpop.f32.mrb[6].mxu1  ;;  %v7914_v10 = vld [vmem:[#allocation6 + $0x324] ss:$16 sps:$4 sm:$0xff]   ;;  %v7917_v11 = vld [vmem:[#allocation6 + $0x32c] ss:$16 sps:$4 sm:$0xff]  }
 0x2b1   :  { %v7446_v22 = vadd.f32 %v1231_v16, %v493_v3  ;;  %v7450_v23 = vadd.f32 %v1317_v19, %v501_v4  ;;  %v1233_v24 = vpop.f32.mrb[7].mxu0  ;;  %v1319_v25 = vpop.f32.mrb[7].mxu1  ;;  %v1322_v28 = vmax.f32 %v7444_v59, 0.0  ;;  %v1324_v29 = vmax.f32 %v7448_v9, 0.0  ;;  %v7902_v3 = vld [vmem:[#allocation6 + $0x2e4] ss:$16 sps:$4 sm:$0xff]  }
 0x2b2   :  { %v7447_v26 = vadd.f32 %v1233_v24, %v497_v5  ;;  %v7451_v27 = vadd.f32 %v1319_v25, %v505_v6  ;;  %v1323_v32 = vmax.f32 %v7445_v12, 0.0  ;;  %v1325_v33 = vmax.f32 %v7449_v13, 0.0  ;;  %v7905_v4 = vld [vmem:[#allocation6 + $0x2ec] ss:$16 sps:$4 sm:$0xff]   ;;  %v7900_v5 = vld [vmem:[#allocation6 + $0x2e0] ss:$16 sps:$4 sm:$0xff]  }
 0x2b3   :  { %v1326_v30 = vmax.f32 %v7446_v22, 0.0  ;;  %v1328_v31 = vmax.f32 %v7450_v23, 0.0  ;;  %v7903_v6 = vld [vmem:[#allocation6 + $0x2e8] ss:$16 sps:$4 sm:$0xff]   ;;  %v7906_v59 = vld [vmem:[#allocation6 + $0x300] ss:$16 sps:$4 sm:$0xff]  }
 0x2b4   :  { %v1327_v34 = vmax.f32 %v7447_v26, 0.0  ;;  %v1329_v35 = vmax.f32 %v7451_v27, 0.0  ;;  %v7909_v9 = vld [vmem:[#allocation6 + $0x308] ss:$16 sps:$4 sm:$0xff]   ;;  %v7912_v12 = vld [vmem:[#allocation6 + $0x320] ss:$16 sps:$4 sm:$0xff]  }
 0x2b5   :  { %v1330_v36 = vpack.c.bf16 %v1326_v30, %v1322_v28  ;;  %v8872_v37 = vpack.c.bf16 %v1328_v31, %v1324_v29  ;;  %v7915_v13 = vld [vmem:[#allocation6 + $0x328] ss:$16 sps:$4 sm:$0xff]   ;;  %v7920_v16 = vld [vmem:[#allocation6 + $0x344] ss:$16 sps:$4 sm:$0xff]   ;;  %v7923_v19 = vld [vmem:[#allocation6 + $0x34c] ss:$16 sps:$4 sm:$0xff]  }
 0x2b6   :  { %v1331_v38 = vpack.c.bf16 %v1327_v34, %v1323_v32  ;;  %v1333_v39 = vpack.c.bf16 %v1329_v35, %v1325_v33  ;;  %v7918_v22 = vld [vmem:[#allocation6 + $0x340] ss:$16 sps:$4 sm:$0xff]   ;;  %v7921_v23 = vld [vmem:[#allocation6 + $0x348] ss:$16 sps:$4 sm:$0xff]   ;;  %v7926_v24 = vld [vmem:[#allocation6 + $0x364] ss:$16 sps:$4 sm:$0xff]  }
 0x2b7   :  { %v7929_v25 = vld [vmem:[#allocation6 + $0x36c] ss:$16 sps:$4 sm:$0xff]   ;;  %v7924_v26 = vld [vmem:[#allocation6 + $0x360] ss:$16 sps:$4 sm:$0xff]   ;;  %v7927_v27 = vld [vmem:[#allocation6 + $0x368] ss:$16 sps:$4 sm:$0xff]  }
 0x2b8   :  { %2156 = vmatprep.mubr.bf16.mxu0 %v1331_v38  ;;  %2242 = vmatprep.mubr.bf16.mxu1 %v1331_v38  ;;  %v7932_v28 = vld [vmem:[#allocation6 + $0x384] ss:$16 sps:$4 sm:$0xff]   ;;  %v7935_v29 = vld [vmem:[#allocation6 + $0x38c] ss:$16 sps:$4 sm:$0xff]   ;;  %v7930_v30 = vld [vmem:[#allocation6 + $0x380] ss:$16 sps:$4 sm:$0xff]  }
 0x2b9   :  { %2157 = vmatmul.mubr.bf16.vlgmr.msra.gmra.mrb[8].mxu0 %v1330_v36  ;;  %2243 = vmatmul.mubr.bf16.vlgmr.msra.gmra.mrb[8].mxu1 %v1330_v36  ;;  %v7933_v31 = vld [vmem:[#allocation6 + $0x388] ss:$16 sps:$4 sm:$0xff]   ;;  %v7938_v32 = vld [vmem:[#allocation6 + $0x3a4] ss:$16 sps:$4 sm:$0xff]   ;;  %v7941_v33 = vld [vmem:[#allocation6 + $0x3ac] ss:$16 sps:$4 sm:$0xff]  }
 0x2ba   :  { %2168 = vmatpush1.bf16.msra.mxu0 %v7858_v40  ;;  %2254 = vmatpush1.bf16.msra.mxu1 %v7861_v41  ;;  %v7936_v34 = vld [vmem:[#allocation6 + $0x3a0] ss:$16 sps:$4 sm:$0xff]   ;;  %v7939_v35 = vld [vmem:[#allocation6 + $0x3a8] ss:$16 sps:$4 sm:$0xff]   ;;  %v7944_v36 = vld [vmem:[#allocation6 + $0x3c4] ss:$16 sps:$4 sm:$0xff]  }
 0x2bb   :  { %2199 = vmatprep.mubr.bf16.mxu0 %v1333_v39  ;;  %2285 = vmatprep.mubr.bf16.mxu1 %v1333_v39  ;;  %v7947_v38 = vld [vmem:[#allocation6 + $0x3cc] ss:$16 sps:$4 sm:$0xff]   ;;  %v7942_v39 = vld [vmem:[#allocation6 + $0x3c0] ss:$16 sps:$4 sm:$0xff]   ;;  %v7945_v40 = vld [vmem:[#allocation6 + $0x3c8] ss:$16 sps:$4 sm:$0xff]  }
 0x2bc   :  { %2169 = vmatprep.subr.bf16.mxu0 %v7866_v42  ;;  %2255 = vmatprep.subr.bf16.mxu1 %v7869_v43  ;;  %v7950_v41 = vld [vmem:[#allocation6 + $0x3e4] ss:$16 sps:$4 sm:$0xff]   ;;  %v7953_v42 = vld [vmem:[#allocation6 + $0x3ec] ss:$16 sps:$4 sm:$0xff]   ;;  %v7948_v43 = vld [vmem:[#allocation6 + $0x3e0] ss:$16 sps:$4 sm:$0xff]  }
 0x2be   :  { %2170 = vmatpush1.bf16.msra.mxu0 %v7864_v44  ;;  %2256 = vmatpush1.bf16.msra.mxu1 %v7867_v45  ;;  %v7951_v44 = vld [vmem:[#allocation6 + $0x3e8] ss:$16 sps:$4 sm:$0xff]   ;;  %v7956_v45 = vld [vmem:[#allocation7 + $0x4] ss:$16 sps:$4 sm:$0xff]  }
 0x2bf   :  { %2171 = vmatprep.subr.bf16.mxu0 %v7872_v46  ;;  %2257 = vmatprep.subr.bf16.mxu1 %v7875_v47  ;;  %v7959_v46 = vld [vmem:[#allocation7 + $0xc] ss:$16 sps:$4 sm:$0xff]   ;;  %v7954_v47 = vld [vmem:[#allocation7] ss:$16 sps:$4 sm:$0xff]  }
 0x2c2   :  { %2172 = vmatpush1.bf16.msra.mxu0 %v7870_v48  ;;  %2258 = vmatpush1.bf16.msra.mxu1 %v7873_v49  ;;  %v7957_v48 = vld [vmem:[#allocation7 + $0x8] ss:$16 sps:$4 sm:$0xff]   ;;  %v7962_v49 = vld [vmem:[#allocation7 + $0x24] ss:$16 sps:$4 sm:$0xff]  }
 0x2c3   :  { %2173 = vmatprep.subr.bf16.mxu0 %v7878_v50  ;;  %2259 = vmatprep.subr.bf16.mxu1 %v7881_v51  ;;  %v7965_v50 = vld [vmem:[#allocation7 + $0x2c] ss:$16 sps:$4 sm:$0xff]   ;;  %v7960_v51 = vld [vmem:[#allocation7 + $0x20] ss:$16 sps:$4 sm:$0xff]  }
 0x2c6   :  { %2174 = vmatpush1.bf16.msra.mxu0 %v7876_v52  ;;  %2260 = vmatpush1.bf16.msra.mxu1 %v7879_v53  ;;  %v7963_v52 = vld [vmem:[#allocation7 + $0x28] ss:$16 sps:$4 sm:$0xff]   ;;  %v7968_v53 = vld [vmem:[#allocation7 + $0x44] ss:$16 sps:$4 sm:$0xff]  }
 0x2c7   :  { %2175 = vmatprep.subr.bf16.mxu0 %v7884_v54  ;;  %2261 = vmatprep.subr.bf16.mxu1 %v7887_v55  ;;  %v7971_v54 = vld [vmem:[#allocation7 + $0x4c] ss:$16 sps:$4 sm:$0xff]   ;;  %v7966_v55 = vld [vmem:[#allocation7 + $0x40] ss:$16 sps:$4 sm:$0xff]  }
 0x2ca   :  { %2176 = vmatpush1.bf16.msra.mxu0 %v7882_v56  ;;  %2262 = vmatpush1.bf16.msra.mxu1 %v7885_v57  ;;  %v7969_v56 = vld [vmem:[#allocation7 + $0x48] ss:$16 sps:$4 sm:$0xff]   ;;  %v7974_v57 = vld [vmem:[#allocation7 + $0x64] ss:$16 sps:$4 sm:$0xff]  }
 0x2cb   :  { %2177 = vmatprep.subr.bf16.mxu0 %v7890_v58  ;;  %2263 = vmatprep.subr.bf16.mxu1 %v7893_v60  ;;  %v7977_v58 = vld [vmem:[#allocation7 + $0x6c] ss:$16 sps:$4 sm:$0xff]   ;;  %v7972_v60 = vld [vmem:[#allocation7 + $0x60] ss:$16 sps:$4 sm:$0xff]  }
 0x2ce   :  { %2178 = vmatpush1.bf16.msra.mxu0 %v7888_v61  ;;  %2264 = vmatpush1.bf16.msra.mxu1 %v7891_v62  ;;  %v7980_v61 = vld [vmem:[#allocation7 + $0x84] ss:$16 sps:$4 sm:$0xff]   ;;  %v7983_v62 = vld [vmem:[#allocation7 + $0x8c] ss:$16 sps:$4 sm:$0xff]  }
 0x2cf   :  { %2179 = vmatprep.subr.bf16.mxu0 %v7896_v63  ;;  %2265 = vmatprep.subr.bf16.mxu1 %v7899_v0  ;;  %v7978_v63 = vld [vmem:[#allocation7 + $0x80] ss:$16 sps:$4 sm:$0xff]   ;;  %v7981_v0 = vld [vmem:[#allocation7 + $0x88] ss:$16 sps:$4 sm:$0xff]  }
 0x2d2   :  { %2180 = vmatpush1.bf16.msra.mxu0 %v7894_v1  ;;  %2266 = vmatpush1.bf16.msra.mxu1 %v7897_v2  ;;  %v7986_v1 = vld [vmem:[#allocation7 + $0xa4] ss:$16 sps:$4 sm:$0xff]   ;;  %v7989_v2 = vld [vmem:[#allocation7 + $0xac] ss:$16 sps:$4 sm:$0xff]  }
 0x2d3   :  { %2181 = vmatprep.subr.bf16.mxu0 %v7902_v3  ;;  %2267 = vmatprep.subr.bf16.mxu1 %v7905_v4  ;;  %v7984_v3 = vld [vmem:[#allocation7 + $0xa0] ss:$16 sps:$4 sm:$0xff]   ;;  %v7987_v4 = vld [vmem:[#allocation7 + $0xa8] ss:$16 sps:$4 sm:$0xff]  }
 0x2d6   :  { %2182 = vmatpush1.bf16.msra.mxu0 %v7900_v5  ;;  %2268 = vmatpush1.bf16.msra.mxu1 %v7903_v6  ;;  %v7992_v5 = vld [vmem:[#allocation7 + $0xc4] ss:$16 sps:$4 sm:$0xff]   ;;  %v7995_v6 = vld [vmem:[#allocation7 + $0xcc] ss:$16 sps:$4 sm:$0xff]  }
 0x2d7   :  { %2183 = vmatprep.subr.bf16.mxu0 %v7908_v7  ;;  %2269 = vmatprep.subr.bf16.mxu1 %v7911_v8  ;;  %v7990_v7 = vld [vmem:[#allocation7 + $0xc0] ss:$16 sps:$4 sm:$0xff]   ;;  %v7993_v8 = vld [vmem:[#allocation7 + $0xc8] ss:$16 sps:$4 sm:$0xff]  }
 0x2da   :  { %2184 = vmatpush1.bf16.msra.mxu0 %v7906_v59  ;;  %2270 = vmatpush1.bf16.msra.mxu1 %v7909_v9  ;;  %v7998_v59 = vld [vmem:[#allocation7 + $0xe4] ss:$16 sps:$4 sm:$0xff]   ;;  %v8001_v9 = vld [vmem:[#allocation7 + $0xec] ss:$16 sps:$4 sm:$0xff]  }
 0x2db   :  { %2185 = vmatprep.subr.bf16.mxu0 %v7914_v10  ;;  %2271 = vmatprep.subr.bf16.mxu1 %v7917_v11  ;;  %v7996_v10 = vld [vmem:[#allocation7 + $0xe0] ss:$16 sps:$4 sm:$0xff]   ;;  %v7999_v11 = vld [vmem:[#allocation7 + $0xe8] ss:$16 sps:$4 sm:$0xff]  }
 0x2de   :  { %2186 = vmatpush1.bf16.msra.mxu0 %v7912_v12  ;;  %2272 = vmatpush1.bf16.msra.mxu1 %v7915_v13  ;;  %v8004_v12 = vld [vmem:[#allocation7 + $0x104] ss:$16 sps:$4 sm:$0xff]   ;;  %v8007_v13 = vld [vmem:[#allocation7 + $0x10c] ss:$16 sps:$4 sm:$0xff]  }
 0x2df   :  { %2187 = vmatprep.subr.bf16.mxu0 %v7920_v16  ;;  %2273 = vmatprep.subr.bf16.mxu1 %v7923_v19  ;;  %v8002_v16 = vld [vmem:[#allocation7 + $0x100] ss:$16 sps:$4 sm:$0xff]   ;;  %v8005_v19 = vld [vmem:[#allocation7 + $0x108] ss:$16 sps:$4 sm:$0xff]  }
 0x2e2   :  { %2188 = vmatpush1.bf16.msra.mxu0 %v7918_v22  ;;  %2274 = vmatpush1.bf16.msra.mxu1 %v7921_v23  ;;  %v8010_v22 = vld [vmem:[#allocation7 + $0x124] ss:$16 sps:$4 sm:$0xff]   ;;  %v8013_v23 = vld [vmem:[#allocation7 + $0x12c] ss:$16 sps:$4 sm:$0xff]  }
 0x2e3   :  { %2189 = vmatprep.subr.bf16.mxu0 %v7926_v24  ;;  %2275 = vmatprep.subr.bf16.mxu1 %v7929_v25  ;;  %v8008_v24 = vld [vmem:[#allocation7 + $0x120] ss:$16 sps:$4 sm:$0xff]   ;;  %v8011_v25 = vld [vmem:[#allocation7 + $0x128] ss:$16 sps:$4 sm:$0xff]  }
 0x2e6   :  { %2190 = vmatpush1.bf16.msra.mxu0 %v7924_v26  ;;  %2276 = vmatpush1.bf16.msra.mxu1 %v7927_v27  ;;  %v8016_v26 = vld [vmem:[#allocation7 + $0x144] ss:$16 sps:$4 sm:$0xff]   ;;  %v8019_v27 = vld [vmem:[#allocation7 + $0x14c] ss:$16 sps:$4 sm:$0xff]  }
 0x2e7   :  { %2191 = vmatprep.subr.bf16.mxu0 %v7932_v28  ;;  %2277 = vmatprep.subr.bf16.mxu1 %v7935_v29  ;;  %v8014_v28 = vld [vmem:[#allocation7 + $0x140] ss:$16 sps:$4 sm:$0xff]   ;;  %v8017_v29 = vld [vmem:[#allocation7 + $0x148] ss:$16 sps:$4 sm:$0xff]  }
 0x2ea   :  { %2192 = vmatpush1.bf16.msra.mxu0 %v7930_v30  ;;  %2278 = vmatpush1.bf16.msra.mxu1 %v7933_v31  ;;  %v8022_v30 = vld [vmem:[#allocation7 + $0x164] ss:$16 sps:$4 sm:$0xff]   ;;  %v8025_v31 = vld [vmem:[#allocation7 + $0x16c] ss:$16 sps:$4 sm:$0xff]  }
 0x2eb   :  { %2193 = vmatprep.subr.bf16.mxu0 %v7938_v32  ;;  %2279 = vmatprep.subr.bf16.mxu1 %v7941_v33  ;;  %v8020_v32 = vld [vmem:[#allocation7 + $0x160] ss:$16 sps:$4 sm:$0xff]   ;;  %v8023_v33 = vld [vmem:[#allocation7 + $0x168] ss:$16 sps:$4 sm:$0xff]  }
 0x2ee   :  { %2194 = vmatpush1.bf16.msra.mxu0 %v7936_v34  ;;  %2280 = vmatpush1.bf16.msra.mxu1 %v7939_v35  ;;  %v8028_v34 = vld [vmem:[#allocation7 + $0x184] ss:$16 sps:$4 sm:$0xff]   ;;  %v8031_v35 = vld [vmem:[#allocation7 + $0x18c] ss:$16 sps:$4 sm:$0xff]  }
 0x2ef   :  { %2195 = vmatprep.subr.bf16.mxu0 %v7944_v36  ;;  %2281 = vmatprep.subr.bf16.mxu1 %v7947_v38  ;;  %v8026_v36 = vld [vmem:[#allocation7 + $0x180] ss:$16 sps:$4 sm:$0xff]   ;;  %v8029_v38 = vld [vmem:[#allocation7 + $0x188] ss:$16 sps:$4 sm:$0xff]  }
 0x2f2   :  { %2196 = vmatpush1.bf16.msra.mxu0 %v7942_v39  ;;  %2282 = vmatpush1.bf16.msra.mxu1 %v7945_v40  ;;  %v8034_v39 = vld [vmem:[#allocation7 + $0x1a4] ss:$16 sps:$4 sm:$0xff]   ;;  %v8037_v40 = vld [vmem:[#allocation7 + $0x1ac] ss:$16 sps:$4 sm:$0xff]  }
 0x2f3   :  { %2197 = vmatprep.subr.bf16.mxu0 %v7950_v41  ;;  %2283 = vmatprep.subr.bf16.mxu1 %v7953_v42  ;;  %v8032_v41 = vld [vmem:[#allocation7 + $0x1a0] ss:$16 sps:$4 sm:$0xff]   ;;  %v8035_v42 = vld [vmem:[#allocation7 + $0x1a8] ss:$16 sps:$4 sm:$0xff]  }
 0x2f6   :  { %2198 = vmatpush1.bf16.msra.mxu0 %v7948_v43  ;;  %2284 = vmatpush1.bf16.msra.mxu1 %v7951_v44  ;;  %v8040_v43 = vld [vmem:[#allocation7 + $0x1c4] ss:$16 sps:$4 sm:$0xff]   ;;  %v8043_v44 = vld [vmem:[#allocation7 + $0x1cc] ss:$16 sps:$4 sm:$0xff]  }
 0x2f7   :  { %3098 = vmatprep.subr.bf16.mxu0 %v7956_v45  ;;  %3184 = vmatprep.subr.bf16.mxu1 %v7959_v46  ;;  %v8038_v45 = vld [vmem:[#allocation7 + $0x1c0] ss:$16 sps:$4 sm:$0xff]   ;;  %v8041_v46 = vld [vmem:[#allocation7 + $0x1c8] ss:$16 sps:$4 sm:$0xff]  }
 0x2f9   :  { %2200 = vmatmul.mubr.bf16.vlgmr.msra.gmra.mrb[8].mxu0 %v8872_v37  ;;  %2286 = vmatmul.mubr.bf16.vlgmr.msra.gmra.mrb[8].mxu1 %v8872_v37  ;;  %v7975_v37 = vld [vmem:[#allocation7 + $0x68] ss:$16 sps:$4 sm:$0xff]  }
 0x2fa   :  { %3099 = vmatpush1.bf16.msra.mxu0 %v7954_v47  ;;  %3185 = vmatpush1.bf16.msra.mxu1 %v7957_v48  ;;  %v8046_v47 = vld [vmem:[#allocation7 + $0x1e4] ss:$16 sps:$4 sm:$0xff]   ;;  %v8049_v48 = vld [vmem:[#allocation7 + $0x1ec] ss:$16 sps:$4 sm:$0xff]  }
 0x2fb   :  { %3100 = vmatprep.subr.bf16.mxu0 %v7962_v49  ;;  %3186 = vmatprep.subr.bf16.mxu1 %v7965_v50  ;;  %v8044_v49 = vld [vmem:[#allocation7 + $0x1e0] ss:$16 sps:$4 sm:$0xff]   ;;  %v8047_v50 = vld [vmem:[#allocation7 + $0x1e8] ss:$16 sps:$4 sm:$0xff]  }
 0x2fe   :  { %3101 = vmatpush1.bf16.msra.mxu0 %v7960_v51  ;;  %3187 = vmatpush1.bf16.msra.mxu1 %v7963_v52  ;;  %v8052_v51 = vld [vmem:[#allocation7 + $0x204] ss:$16 sps:$4 sm:$0xff]   ;;  %v8055_v52 = vld [vmem:[#allocation7 + $0x20c] ss:$16 sps:$4 sm:$0xff]  }
 0x2ff   :  { %3102 = vmatprep.subr.bf16.mxu0 %v7968_v53  ;;  %3188 = vmatprep.subr.bf16.mxu1 %v7971_v54  ;;  %v1462_v53 = vld [vmem:[%s8980_s6] sm:$0xf] }
 0x300   :  { %v1467_v54 = vrot.slane %v1462_v53, %v8846_v17 }
 0x302   :  { %3103 = vmatpush1.bf16.msra.mxu0 %v7966_v55  ;;  %3189 = vmatpush1.bf16.msra.mxu1 %v7969_v56  ;;  %v1475_v55 = vrot.slane %v1462_v53, %v8853_v20  ;;  %v1471_v56 = vrot.slane %v1462_v53, %v8849_v18 }
 0x303   :  { %3104 = vmatprep.subr.bf16.mxu0 %v7974_v57  ;;  %3190 = vmatprep.subr.bf16.mxu1 %v7977_v58  ;;  %v1479_v57 = vrot.slane %v1462_v53, %v8856_v21  ;;  %v8089_v53 = vld [vmem:[#allocation7 + $0x2c8] ss:$16 sps:$4 sm:$0xff]  }
 0x306   :  { %3105 = vmatpush1.bf16.msra.mxu0 %v7972_v60  ;;  %3191 = vmatpush1.bf16.msra.mxu1 %v7975_v37 }
 0x307   :  { %3106 = vmatprep.subr.bf16.mxu0 %v7980_v61  ;;  %3192 = vmatprep.subr.bf16.mxu1 %v7983_v62 }
 0x30a   :  { %3107 = vmatpush1.bf16.msra.mxu0 %v7978_v63  ;;  %3193 = vmatpush1.bf16.msra.mxu1 %v7981_v0 }
 0x30b   :  { %3108 = vmatprep.subr.bf16.mxu0 %v7986_v1  ;;  %3194 = vmatprep.subr.bf16.mxu1 %v7989_v2 }
 0x30e   :  { %3109 = vmatpush1.bf16.msra.mxu0 %v7984_v3  ;;  %3195 = vmatpush1.bf16.msra.mxu1 %v7987_v4 }
 0x30f   :  { %3110 = vmatprep.subr.bf16.mxu0 %v7992_v5  ;;  %3196 = vmatprep.subr.bf16.mxu1 %v7995_v6 }
 0x312   :  { %3111 = vmatpush1.bf16.msra.mxu0 %v7990_v7  ;;  %3197 = vmatpush1.bf16.msra.mxu1 %v7993_v8 }
 0x313   :  { %3112 = vmatprep.subr.bf16.mxu0 %v7998_v59  ;;  %3198 = vmatprep.subr.bf16.mxu1 %v8001_v9 }
 0x316   :  { %3113 = vmatpush1.bf16.msra.mxu0 %v7996_v10  ;;  %3199 = vmatpush1.bf16.msra.mxu1 %v7999_v11 }
 0x317   :  { %3114 = vmatprep.subr.bf16.mxu0 %v8004_v12  ;;  %3200 = vmatprep.subr.bf16.mxu1 %v8007_v13 }
 0x31a   :  { %3115 = vmatpush1.bf16.msra.mxu0 %v8002_v16  ;;  %3201 = vmatpush1.bf16.msra.mxu1 %v8005_v19 }
 0x31b   :  { %3116 = vmatprep.subr.bf16.mxu0 %v8010_v22  ;;  %3202 = vmatprep.subr.bf16.mxu1 %v8013_v23 }
 0x31e   :  { %3117 = vmatpush1.bf16.msra.mxu0 %v8008_v24  ;;  %3203 = vmatpush1.bf16.msra.mxu1 %v8011_v25 }
 0x31f   :  { %3118 = vmatprep.subr.bf16.mxu0 %v8016_v26  ;;  %3204 = vmatprep.subr.bf16.mxu1 %v8019_v27  ;;  %v8050_v27 = vld [vmem:[#allocation7 + $0x200] ss:$16 sps:$4 sm:$0xff]  }
 0x322   :  { %3119 = vmatpush1.bf16.msra.mxu0 %v8014_v28  ;;  %3205 = vmatpush1.bf16.msra.mxu1 %v8017_v29  ;;  %v8053_v28 = vld [vmem:[#allocation7 + $0x208] ss:$16 sps:$4 sm:$0xff]   ;;  %v8058_v29 = vld [vmem:[#allocation7 + $0x224] ss:$16 sps:$4 sm:$0xff]  }
 0x323   :  { %3120 = vmatprep.subr.bf16.mxu0 %v8022_v30  ;;  %3206 = vmatprep.subr.bf16.mxu1 %v8025_v31  ;;  %v8061_v30 = vld [vmem:[#allocation7 + $0x22c] ss:$16 sps:$4 sm:$0xff]   ;;  %v8056_v31 = vld [vmem:[#allocation7 + $0x220] ss:$16 sps:$4 sm:$0xff]  }
 0x326   :  { %3121 = vmatpush1.bf16.msra.mxu0 %v8020_v32  ;;  %3207 = vmatpush1.bf16.msra.mxu1 %v8023_v33  ;;  %v8059_v32 = vld [vmem:[#allocation7 + $0x228] ss:$16 sps:$4 sm:$0xff]   ;;  %v8064_v33 = vld [vmem:[#allocation7 + $0x244] ss:$16 sps:$4 sm:$0xff]  }
 0x327   :  { %3122 = vmatprep.subr.bf16.mxu0 %v8028_v34  ;;  %3208 = vmatprep.subr.bf16.mxu1 %v8031_v35  ;;  %v8067_v34 = vld [vmem:[#allocation7 + $0x24c] ss:$16 sps:$4 sm:$0xff]   ;;  %v8062_v35 = vld [vmem:[#allocation7 + $0x240] ss:$16 sps:$4 sm:$0xff]  }
 0x32a   :  { %3123 = vmatpush1.bf16.msra.mxu0 %v8026_v36  ;;  %3209 = vmatpush1.bf16.msra.mxu1 %v8029_v38  ;;  %v8065_v36 = vld [vmem:[#allocation7 + $0x248] ss:$16 sps:$4 sm:$0xff]   ;;  %v8070_v38 = vld [vmem:[#allocation7 + $0x264] ss:$16 sps:$4 sm:$0xff]  }
 0x32b   :  { %3124 = vmatprep.subr.bf16.mxu0 %v8034_v39  ;;  %3210 = vmatprep.subr.bf16.mxu1 %v8037_v40  ;;  %v8073_v39 = vld [vmem:[#allocation7 + $0x26c] ss:$16 sps:$4 sm:$0xff]   ;;  %v8068_v40 = vld [vmem:[#allocation7 + $0x260] ss:$16 sps:$4 sm:$0xff]  }
 0x32e   :  { %3125 = vmatpush1.bf16.msra.mxu0 %v8032_v41  ;;  %3211 = vmatpush1.bf16.msra.mxu1 %v8035_v42  ;;  %v8071_v41 = vld [vmem:[#allocation7 + $0x268] ss:$16 sps:$4 sm:$0xff]   ;;  %v8076_v42 = vld [vmem:[#allocation7 + $0x284] ss:$16 sps:$4 sm:$0xff]  }
 0x32f   :  { %3126 = vmatprep.subr.bf16.mxu0 %v8040_v43  ;;  %3212 = vmatprep.subr.bf16.mxu1 %v8043_v44  ;;  %v8079_v43 = vld [vmem:[#allocation7 + $0x28c] ss:$16 sps:$4 sm:$0xff]   ;;  %v8074_v44 = vld [vmem:[#allocation7 + $0x280] ss:$16 sps:$4 sm:$0xff]  }
 0x332   :  { %3127 = vmatpush1.bf16.msra.mxu0 %v8038_v45  ;;  %3213 = vmatpush1.bf16.msra.mxu1 %v8041_v46  ;;  %v8077_v45 = vld [vmem:[#allocation7 + $0x288] ss:$16 sps:$4 sm:$0xff]   ;;  %v8082_v46 = vld [vmem:[#allocation7 + $0x2a4] ss:$16 sps:$4 sm:$0xff]  }
 0x333   :  { %3128 = vmatprep.subr.bf16.mxu0 %v8046_v47  ;;  %3214 = vmatprep.subr.bf16.mxu1 %v8049_v48  ;;  %v8085_v47 = vld [vmem:[#allocation7 + $0x2ac] ss:$16 sps:$4 sm:$0xff]   ;;  %v8080_v48 = vld [vmem:[#allocation7 + $0x2a0] ss:$16 sps:$4 sm:$0xff]  }
 0x336   :  { %3129 = vmatpush1.bf16.msra.mxu0 %v8044_v49  ;;  %3215 = vmatpush1.bf16.msra.mxu1 %v8047_v50  ;;  %v8083_v49 = vld [vmem:[#allocation7 + $0x2a8] ss:$16 sps:$4 sm:$0xff]   ;;  %v8088_v50 = vld [vmem:[#allocation7 + $0x2c4] ss:$16 sps:$4 sm:$0xff]  }
 0x337   :  { %3141 = vmatprep.subr.bf16.mxu0 %v8052_v51  ;;  %3227 = vmatprep.subr.bf16.mxu1 %v8055_v52  ;;  %v8091_v51 = vld [vmem:[#allocation7 + $0x2cc] ss:$16 sps:$4 sm:$0xff]   ;;  %v8086_v52 = vld [vmem:[#allocation7 + $0x2c0] ss:$16 sps:$4 sm:$0xff]  }
 0x3cc   :  { %v2201_v58 = vpop.f32.mrb[8].mxu0  ;;  %v2287_v60 = vpop.f32.mrb[8].mxu1 }
 0x3cd   :  { %v7452_v37 = vadd.f32 %v2201_v58, %v1467_v54  ;;  %v7456_v61 = vadd.f32 %v2287_v60, %v1475_v55  ;;  %v2203_v62 = vpop.f32.mrb[9].mxu0  ;;  %v2289_v63 = vpop.f32.mrb[9].mxu1  ;;  %v8100_v58 = vld [vmem:[#allocation7 + $0x304] ss:$16 sps:$4 sm:$0xff]   ;;  %v8103_v60 = vld [vmem:[#allocation7 + $0x30c] ss:$16 sps:$4 sm:$0xff]  }
 0x3ce   :  { %v7453_v0 = vadd.f32 %v2203_v62, %v1471_v56  ;;  %v7457_v1 = vadd.f32 %v2289_v63, %v1479_v57  ;;  %v2205_v2 = vpop.f32.mrb[10].mxu0  ;;  %v2291_v3 = vpop.f32.mrb[10].mxu1  ;;  %v8106_v62 = vld [vmem:[#allocation7 + $0x324] ss:$16 sps:$4 sm:$0xff]   ;;  %v8109_v63 = vld [vmem:[#allocation7 + $0x32c] ss:$16 sps:$4 sm:$0xff]  }
 0x3cf   :  { %v7454_v4 = vadd.f32 %v2205_v2, %v1467_v54  ;;  %v7458_v5 = vadd.f32 %v2291_v3, %v1475_v55  ;;  %v2207_v6 = vpop.f32.mrb[11].mxu0  ;;  %v2293_v7 = vpop.f32.mrb[11].mxu1  ;;  %v2296_v9 = vmax.f32 %v7452_v37, 0.0  ;;  %v2298_v10 = vmax.f32 %v7456_v61, 0.0  ;;  %v8094_v54 = vld [vmem:[#allocation7 + $0x2e4] ss:$16 sps:$4 sm:$0xff]  }
 0x3d0   :  { %v7455_v8 = vadd.f32 %v2207_v6, %v1471_v56  ;;  %v7459_v59 = vadd.f32 %v2293_v7, %v1479_v57  ;;  %v2297_v13 = vmax.f32 %v7453_v0, 0.0  ;;  %v2299_v16 = vmax.f32 %v7457_v1, 0.0  ;;  %v8097_v55 = vld [vmem:[#allocation7 + $0x2ec] ss:$16 sps:$4 sm:$0xff]   ;;  %v8092_v56 = vld [vmem:[#allocation7 + $0x2e0] ss:$16 sps:$4 sm:$0xff]  }
 0x3d1   :  { %v2300_v11 = vmax.f32 %v7454_v4, 0.0  ;;  %v2302_v12 = vmax.f32 %v7458_v5, 0.0  ;;  %v8095_v57 = vld [vmem:[#allocation7 + $0x2e8] ss:$16 sps:$4 sm:$0xff]   ;;  %v8098_v37 = vld [vmem:[#allocation7 + $0x300] ss:$16 sps:$4 sm:$0xff]  }
 0x3d2   :  { %v2301_v19 = vmax.f32 %v7455_v8, 0.0  ;;  %v2303_v22 = vmax.f32 %v7459_v59, 0.0  ;;  %v8101_v61 = vld [vmem:[#allocation7 + $0x308] ss:$16 sps:$4 sm:$0xff]   ;;  %v8104_v0 = vld [vmem:[#allocation7 + $0x320] ss:$16 sps:$4 sm:$0xff]  }
 0x3d3   :  { %v2304_v23 = vpack.c.bf16 %v2300_v11, %v2296_v9  ;;  %v8883_v24 = vpack.c.bf16 %v2302_v12, %v2298_v10  ;;  %v8107_v1 = vld [vmem:[#allocation7 + $0x328] ss:$16 sps:$4 sm:$0xff]   ;;  %v8112_v2 = vld [vmem:[#allocation7 + $0x344] ss:$16 sps:$4 sm:$0xff]   ;;  %v8115_v3 = vld [vmem:[#allocation7 + $0x34c] ss:$16 sps:$4 sm:$0xff]  }
 0x3d4   :  { %v2305_v25 = vpack.c.bf16 %v2301_v19, %v2297_v13  ;;  %v2307_v26 = vpack.c.bf16 %v2303_v22, %v2299_v16  ;;  %v8110_v4 = vld [vmem:[#allocation7 + $0x340] ss:$16 sps:$4 sm:$0xff]   ;;  %v8113_v5 = vld [vmem:[#allocation7 + $0x348] ss:$16 sps:$4 sm:$0xff]   ;;  %v8118_v6 = vld [vmem:[#allocation7 + $0x364] ss:$16 sps:$4 sm:$0xff]  }
 0x3d5   :  { %v8121_v7 = vld [vmem:[#allocation7 + $0x36c] ss:$16 sps:$4 sm:$0xff]   ;;  %v8116_v8 = vld [vmem:[#allocation7 + $0x360] ss:$16 sps:$4 sm:$0xff]   ;;  %v8119_v59 = vld [vmem:[#allocation7 + $0x368] ss:$16 sps:$4 sm:$0xff]  }
 0x3d6   :  { %3130 = vmatprep.mubr.bf16.mxu0 %v2305_v25  ;;  %3216 = vmatprep.mubr.bf16.mxu1 %v2305_v25  ;;  %v8124_v9 = vld [vmem:[#allocation7 + $0x384] ss:$16 sps:$4 sm:$0xff]   ;;  %v8127_v10 = vld [vmem:[#allocation7 + $0x38c] ss:$16 sps:$4 sm:$0xff]   ;;  %v8122_v11 = vld [vmem:[#allocation7 + $0x380] ss:$16 sps:$4 sm:$0xff]  }
 0x3d7   :  { %3131 = vmatmul.mubr.bf16.vlgmr.msra.gmra.mrb[12].mxu0 %v2304_v23  ;;  %3217 = vmatmul.mubr.bf16.vlgmr.msra.gmra.mrb[12].mxu1 %v2304_v23  ;;  %v8125_v12 = vld [vmem:[#allocation7 + $0x388] ss:$16 sps:$4 sm:$0xff]   ;;  %v8130_v13 = vld [vmem:[#allocation7 + $0x3a4] ss:$16 sps:$4 sm:$0xff]   ;;  %v8133_v16 = vld [vmem:[#allocation7 + $0x3ac] ss:$16 sps:$4 sm:$0xff]  }
 0x3d8   :  { %3142 = vmatpush1.bf16.msra.mxu0 %v8050_v27  ;;  %3228 = vmatpush1.bf16.msra.mxu1 %v8053_v28  ;;  %v8128_v19 = vld [vmem:[#allocation7 + $0x3a0] ss:$16 sps:$4 sm:$0xff]   ;;  %v8131_v22 = vld [vmem:[#allocation7 + $0x3a8] ss:$16 sps:$4 sm:$0xff]   ;;  %v8136_v23 = vld [vmem:[#allocation7 + $0x3c4] ss:$16 sps:$4 sm:$0xff]  }
 0x3d9   :  { %3173 = vmatprep.mubr.bf16.mxu0 %v2307_v26  ;;  %3259 = vmatprep.mubr.bf16.mxu1 %v2307_v26  ;;  %v8139_v25 = vld [vmem:[#allocation7 + $0x3cc] ss:$16 sps:$4 sm:$0xff]   ;;  %v8134_v26 = vld [vmem:[#allocation7 + $0x3c0] ss:$16 sps:$4 sm:$0xff]   ;;  %v8137_v27 = vld [vmem:[#allocation7 + $0x3c8] ss:$16 sps:$4 sm:$0xff]  }
 0x3da   :  { %3143 = vmatprep.subr.bf16.mxu0 %v8058_v29  ;;  %3229 = vmatprep.subr.bf16.mxu1 %v8061_v30  ;;  %v8142_v28 = vld [vmem:[#allocation7 + $0x3e4] ss:$16 sps:$4 sm:$0xff]   ;;  %v8145_v29 = vld [vmem:[#allocation7 + $0x3ec] ss:$16 sps:$4 sm:$0xff]  }
 0x3db   :  { %v3282_v30 = vld [vmem:[#allocation9] sm:$0xff] }
 0x3dc   :  { %3144 = vmatpush1.bf16.msra.mxu0 %v8056_v31  ;;  %3230 = vmatpush1.bf16.msra.mxu1 %v8059_v32  ;;  %v3286_v31 = vld [vmem:[#allocation9 + $0x20] sm:$0xff]  ;;  %v3283_v32 = vld [vmem:[#allocation9 + $0x8] sm:$0xff] }
 0x3dd   :  { %3145 = vmatprep.subr.bf16.mxu0 %v8064_v33  ;;  %3231 = vmatprep.subr.bf16.mxu1 %v8067_v34  ;;  %v3287_v33 = vld [vmem:[#allocation9 + $0x28] sm:$0xff]  ;;  %v8140_v34 = vld [vmem:[#allocation7 + $0x3e0] ss:$16 sps:$4 sm:$0xff]  }
 0x3e0   :  { %3146 = vmatpush1.bf16.msra.mxu0 %v8062_v35  ;;  %3232 = vmatpush1.bf16.msra.mxu1 %v8065_v36  ;;  %v8143_v35 = vld [vmem:[#allocation7 + $0x3e8] ss:$16 sps:$4 sm:$0xff]   ;;  %v6981_v36 = vcombine.high %v3282_v30, %v3286_v31 }
 0x3e1   :  { %3147 = vmatprep.subr.bf16.mxu0 %v8070_v38  ;;  %3233 = vmatprep.subr.bf16.mxu1 %v8073_v39  ;;  %v6983_v38 = vcombine.high %v3283_v32, %v3287_v33  ;;  %v3290_v39 = vld [vmem:[#allocation9 + $0x40] sm:$0xff] }
 0x3e4   :  { %3148 = vmatpush1.bf16.msra.mxu0 %v8068_v40  ;;  %3234 = vmatpush1.bf16.msra.mxu1 %v8071_v41  ;;  %v3294_v40 = vld [vmem:[#allocation9 + $0x60] sm:$0xff]  ;;  %v3291_v41 = vld [vmem:[#allocation9 + $0x48] sm:$0xff] }
 0x3e5   :  { %3149 = vmatprep.subr.bf16.mxu0 %v8076_v42  ;;  %3235 = vmatprep.subr.bf16.mxu1 %v8079_v43  ;;  %v3295_v42 = vld [vmem:[#allocation9 + $0x68] sm:$0xff]  ;;  %v6980_v43 = vcombine.low %v3282_v30, %v3286_v31 }
 0x3e6   :  { %v3339_v30 = vld [vmem:[#allocation9 + $0x1c8] sm:$0xff] }
 0x3e7   :  { %v3343_v31 = vld [vmem:[#allocation9 + $0x1e8] sm:$0xff] }
 0x3e8   :  { %3150 = vmatpush1.bf16.msra.mxu0 %v8074_v44  ;;  %3236 = vmatpush1.bf16.msra.mxu1 %v8077_v45  ;;  %v6982_v44 = vcombine.low %v3283_v32, %v3287_v33  ;;  %v6989_v45 = vcombine.high %v3290_v39, %v3294_v40 }
 0x3e9   :  { %3151 = vmatprep.subr.bf16.mxu0 %v8082_v46  ;;  %3237 = vmatprep.subr.bf16.mxu1 %v8085_v47  ;;  %v6991_v46 = vcombine.high %v3291_v41, %v3295_v42  ;;  %v3298_v47 = vld [vmem:[#allocation9 + $0x80] sm:$0xff] }
 0x3ec   :  { %3152 = vmatpush1.bf16.msra.mxu0 %v8080_v48  ;;  %3238 = vmatpush1.bf16.msra.mxu1 %v8083_v49  ;;  %v3302_v48 = vld [vmem:[#allocation9 + $0xa0] sm:$0xff]  ;;  %v3299_v49 = vld [vmem:[#allocation9 + $0x88] sm:$0xff] }
 0x3ed   :  { %3153 = vmatprep.subr.bf16.mxu0 %v8088_v50  ;;  %3239 = vmatprep.subr.bf16.mxu1 %v8091_v51  ;;  %v3303_v50 = vld [vmem:[#allocation9 + $0xa8] sm:$0xff]  ;;  %v6988_v51 = vcombine.low %v3290_v39, %v3294_v40 }
 0x3ee   :  { %v3347_v39 = vld [vmem:[#allocation9 + $0x208] sm:$0xff] }
 0x3ef   :  { %v3351_v40 = vld [vmem:[#allocation9 + $0x228] sm:$0xff] }
 0x3f0   :  { %3154 = vmatpush1.bf16.msra.mxu0 %v8086_v52  ;;  %3240 = vmatpush1.bf16.msra.mxu1 %v8089_v53  ;;  %v6990_v52 = vcombine.low %v3291_v41, %v3295_v42  ;;  %v6997_v53 = vcombine.high %v3298_v47, %v3302_v48  ;;  %v7038_v42 = vcombine.low %v3339_v30, %v3343_v31 }
 0x3f1   :  { %3155 = vmatprep.subr.bf16.mxu0 %v8094_v54  ;;  %3241 = vmatprep.subr.bf16.mxu1 %v8097_v55  ;;  %v6999_v54 = vcombine.high %v3299_v49, %v3303_v50  ;;  %v3306_v55 = vld [vmem:[#allocation9 + $0xc0] sm:$0xff] }
 0x3f4   :  { %3156 = vmatpush1.bf16.msra.mxu0 %v8092_v56  ;;  %3242 = vmatpush1.bf16.msra.mxu1 %v8095_v57  ;;  %v3310_v56 = vld [vmem:[#allocation9 + $0xe0] sm:$0xff]  ;;  %v3307_v57 = vld [vmem:[#allocation9 + $0xc8] sm:$0xff] }
 0x3f5   :  { %3157 = vmatprep.subr.bf16.mxu0 %v8100_v58  ;;  %3243 = vmatprep.subr.bf16.mxu1 %v8103_v60  ;;  %v3311_v58 = vld [vmem:[#allocation9 + $0xe8] sm:$0xff]  ;;  %v6996_v60 = vcombine.low %v3298_v47, %v3302_v48 }
 0x3f6   :  { %v3355_v47 = vld [vmem:[#allocation9 + $0x248] sm:$0xff] }
 0x3f7   :  { %v3359_v48 = vld [vmem:[#allocation9 + $0x268] sm:$0xff] }
 0x3f8   :  { %3158 = vmatpush1.bf16.msra.mxu0 %v8098_v37  ;;  %3244 = vmatpush1.bf16.msra.mxu1 %v8101_v61  ;;  %v6998_v37 = vcombine.low %v3299_v49, %v3303_v50  ;;  %v7005_v61 = vcombine.high %v3306_v55, %v3310_v56  ;;  %v7046_v50 = vcombine.low %v3347_v39, %v3351_v40 }
 0x3f9   :  { %3159 = vmatprep.subr.bf16.mxu0 %v8106_v62  ;;  %3245 = vmatprep.subr.bf16.mxu1 %v8109_v63  ;;  %v3314_v62 = vld [vmem:[#allocation9 + $0x100] sm:$0xff] }
 0x3fa   :  { %v3318_v63 = vld [vmem:[#allocation9 + $0x120] sm:$0xff] }
 0x3fc   :  { %3160 = vmatpush1.bf16.msra.mxu0 %v8104_v0  ;;  %3246 = vmatpush1.bf16.msra.mxu1 %v8107_v1  ;;  %v3315_v0 = vld [vmem:[#allocation9 + $0x108] sm:$0xff] }
 0x3fd   :  { %3161 = vmatprep.subr.bf16.mxu0 %v8112_v2  ;;  %3247 = vmatprep.subr.bf16.mxu1 %v8115_v3  ;;  %v3319_v1 = vld [vmem:[#allocation9 + $0x128] sm:$0xff]  ;;  %v7004_v2 = vcombine.low %v3306_v55, %v3310_v56  ;;  %v7006_v3 = vcombine.low %v3307_v57, %v3311_v58 }
 0x3fe   :  { %v3363_v55 = vld [vmem:[#allocation9 + $0x288] sm:$0xff] }
 0x3ff   :  { %v3367_v56 = vld [vmem:[#allocation9 + $0x2a8] sm:$0xff] }
 0x400   :  { %3162 = vmatpush1.bf16.msra.mxu0 %v8110_v4  ;;  %3248 = vmatpush1.bf16.msra.mxu1 %v8113_v5  ;;  %v7013_v4 = vcombine.high %v3314_v62, %v3318_v63  ;;  %v7015_v5 = vcombine.high %v3315_v0, %v3319_v1 }
 0x401   :  { %3163 = vmatprep.subr.bf16.mxu0 %v8118_v6  ;;  %3249 = vmatprep.subr.bf16.mxu1 %v8121_v7  ;;  %v3322_v6 = vld [vmem:[#allocation9 + $0x140] sm:$0xff] }
 0x402   :  { %v3326_v7 = vld [vmem:[#allocation9 + $0x160] sm:$0xff] }
 0x404   :  { %3164 = vmatpush1.bf16.msra.mxu0 %v8116_v8  ;;  %3250 = vmatpush1.bf16.msra.mxu1 %v8119_v59  ;;  %v3323_v8 = vld [vmem:[#allocation9 + $0x148] sm:$0xff] }
 0x405   :  { %3165 = vmatprep.subr.bf16.mxu0 %v8124_v9  ;;  %3251 = vmatprep.subr.bf16.mxu1 %v8127_v10  ;;  %v3327_v59 = vld [vmem:[#allocation9 + $0x168] sm:$0xff]  ;;  %v7012_v9 = vcombine.low %v3314_v62, %v3318_v63  ;;  %v7014_v10 = vcombine.low %v3315_v0, %v3319_v1  ;;  %v7062_v1 = vcombine.low %v3363_v55, %v3367_v56 }
 0x406   :  { %v3371_v62 = vld [vmem:[#allocation9 + $0x2c8] sm:$0xff] }
 0x407   :  { %v3375_v63 = vld [vmem:[#allocation9 + $0x2e8] sm:$0xff] }
 0x408   :  { %3166 = vmatpush1.bf16.msra.mxu0 %v8122_v11  ;;  %3252 = vmatpush1.bf16.msra.mxu1 %v8125_v12  ;;  %v7021_v11 = vcombine.high %v3322_v6, %v3326_v7  ;;  %v7023_v12 = vcombine.high %v3323_v8, %v3327_v59 }
 0x409   :  { %3167 = vmatprep.subr.bf16.mxu0 %v8130_v13  ;;  %3253 = vmatprep.subr.bf16.mxu1 %v8133_v16  ;;  %v3330_v13 = vld [vmem:[#allocation9 + $0x180] sm:$0xff] }
 0x40a   :  { %v3334_v16 = vld [vmem:[#allocation9 + $0x1a0] sm:$0xff] }
 0x40b   :  { %v7028_v32 = vcombine.low %v3330_v13, %v3334_v16 }
 0x40c   :  { %3168 = vmatpush1.bf16.msra.mxu0 %v8128_v19  ;;  %3254 = vmatpush1.bf16.msra.mxu1 %v8131_v22  ;;  %v3331_v19 = vld [vmem:[#allocation9 + $0x188] sm:$0xff] }
 0x40d   :  { %3169 = vmatprep.subr.bf16.mxu0 %v8136_v23  ;;  %3255 = vmatprep.subr.bf16.mxu1 %v8139_v25  ;;  %v3335_v22 = vld [vmem:[#allocation9 + $0x1a8] sm:$0xff]  ;;  %v7020_v23 = vcombine.low %v3322_v6, %v3326_v7  ;;  %v7022_v25 = vcombine.low %v3323_v8, %v3327_v59  ;;  %v7070_v59 = vcombine.low %v3371_v62, %v3375_v63 }
 0x40e   :  { %v7030_v33 = vcombine.low %v3331_v19, %v3335_v22  ;;  %v3379_v6 = vld [vmem:[#allocation9 + $0x308] sm:$0xff] }
 0x40f   :  { %v3383_v7 = vld [vmem:[#allocation9 + $0x328] sm:$0xff] }
 0x410   :  { %3170 = vmatpush1.bf16.msra.mxu0 %v8134_v26  ;;  %3256 = vmatpush1.bf16.msra.mxu1 %v8137_v27  ;;  %v7029_v26 = vcombine.high %v3330_v13, %v3334_v16  ;;  %v7031_v27 = vcombine.high %v3331_v19, %v3335_v22  ;;  %v3387_v13 = vld [vmem:[#allocation9 + $0x348] sm:$0xff]  ;;  %v7078_v22 = vcombine.low %v3379_v6, %v3383_v7 }
 0x411   :  { %3171 = vmatprep.subr.bf16.mxu0 %v8142_v28  ;;  %3257 = vmatprep.subr.bf16.mxu1 %v8145_v29  ;;  %v3338_v28 = vld [vmem:[#allocation9 + $0x1c0] sm:$0xff]  ;;  %v3391_v16 = vld [vmem:[#allocation9 + $0x368] sm:$0xff] }
 0x412   :  { %v3342_v29 = vld [vmem:[#allocation9 + $0x1e0] sm:$0xff] }
 0x413   :  { %v7036_v41 = vcombine.low %v3338_v28, %v3342_v29 }
 0x414   :  { %3172 = vmatpush1.bf16.msra.mxu0 %v8140_v34  ;;  %3258 = vmatpush1.bf16.msra.mxu1 %v8143_v35  ;;  %v7037_v34 = vcombine.high %v3338_v28, %v3342_v29  ;;  %v7039_v35 = vcombine.high %v3339_v30, %v3343_v31  ;;  %v3394_v28 = vld [vmem:[#allocation9 + $0x380] sm:$0xff]  ;;  %v3395_v30 = vld [vmem:[#allocation9 + $0x388] sm:$0xff] }
 0x415   :  { %4860 = vmatprep.subr.bf16.mxu0 %v6981_v36  ;;  %4946 = vmatprep.subr.bf16.mxu1 %v6983_v38  ;;  %v3346_v36 = vld [vmem:[#allocation9 + $0x200] sm:$0xff] }
 0x416   :  { %v3350_v38 = vld [vmem:[#allocation9 + $0x220] sm:$0xff] }
 0x417   :  { %3174 = vmatmul.mubr.bf16.vlgmr.msra.gmra.mrb[12].mxu0 %v8883_v24  ;;  %3260 = vmatmul.mubr.bf16.vlgmr.msra.gmra.mrb[12].mxu1 %v8883_v24  ;;  %v7007_v24 = vcombine.high %v3307_v57, %v3311_v58  ;;  %v7044_v49 = vcombine.low %v3346_v36, %v3350_v38  ;;  %v7054_v58 = vcombine.low %v3355_v47, %v3359_v48  ;;  %v3398_v29 = vld [vmem:[#allocation9 + $0x3a0] sm:$0xff] }
 0x418   :  { %4861 = vmatpush1.bf16.msra.mxu0 %v6980_v43  ;;  %4947 = vmatpush1.bf16.msra.mxu1 %v6982_v44  ;;  %v7045_v43 = vcombine.high %v3346_v36, %v3350_v38  ;;  %v7047_v44 = vcombine.high %v3347_v39, %v3351_v40  ;;  %v7093_v31 = vcombine.high %v3394_v28, %v3398_v29  ;;  %v3402_v36 = vld [vmem:[#allocation9 + $0x3c0] sm:$0xff]  ;;  %v3403_v39 = vld [vmem:[#allocation9 + $0x3c8] sm:$0xff] }
 0x419   :  { %4862 = vmatprep.subr.bf16.mxu0 %v6989_v45  ;;  %4948 = vmatprep.subr.bf16.mxu1 %v6991_v46  ;;  %v3354_v45 = vld [vmem:[#allocation9 + $0x240] sm:$0xff] }
 0x41a   :  { %v3358_v46 = vld [vmem:[#allocation9 + $0x260] sm:$0xff] }
 0x41b   :  { %v7052_v57 = vcombine.low %v3354_v45, %v3358_v46  ;;  %v3406_v38 = vld [vmem:[#allocation9 + $0x3e0] sm:$0xff] }
 0x41c   :  { %4863 = vmatpush1.bf16.msra.mxu0 %v6988_v51  ;;  %4949 = vmatpush1.bf16.msra.mxu1 %v6990_v52  ;;  %v7053_v51 = vcombine.high %v3354_v45, %v3358_v46  ;;  %v7055_v52 = vcombine.high %v3355_v47, %v3359_v48  ;;  %v7101_v40 = vcombine.high %v3402_v36, %v3406_v38  ;;  %v3410_v45 = vld [vmem:[#allocation9 + $0x400] sm:$0xff]  ;;  %v3411_v47 = vld [vmem:[#allocation9 + $0x408] sm:$0xff] }
 0x41d   :  { %4864 = vmatprep.subr.bf16.mxu0 %v6997_v53  ;;  %4950 = vmatprep.subr.bf16.mxu1 %v6999_v54  ;;  %v3362_v53 = vld [vmem:[#allocation9 + $0x280] sm:$0xff] }
 0x41e   :  { %v3366_v54 = vld [vmem:[#allocation9 + $0x2a0] sm:$0xff] }
 0x41f   :  { %v7060_v0 = vcombine.low %v3362_v53, %v3366_v54  ;;  %v3414_v46 = vld [vmem:[#allocation9 + $0x420] sm:$0xff] }
 0x420   :  { %4865 = vmatpush1.bf16.msra.mxu0 %v6996_v60  ;;  %4951 = vmatpush1.bf16.msra.mxu1 %v6998_v37  ;;  %v7061_v60 = vcombine.high %v3362_v53, %v3366_v54  ;;  %v7063_v37 = vcombine.high %v3363_v55, %v3367_v56  ;;  %v7109_v48 = vcombine.high %v3410_v45, %v3414_v46  ;;  %v2436_v53 = vld [vmem:[%s8982_s8] sm:$0xf] }
 0x421   :  { %4866 = vmatprep.subr.bf16.mxu0 %v7005_v61  ;;  %4952 = vmatprep.subr.bf16.mxu1 %v7007_v24  ;;  %v3370_v61 = vld [vmem:[#allocation9 + $0x2c0] sm:$0xff]  ;;  %v2441_v54 = vrot.slane %v2436_v53, %v8846_v17  ;;  %v2449_v55 = vrot.slane %v2436_v53, %v8853_v20  ;;  %v2445_v56 = vrot.slane %v2436_v53, %v8849_v18 }
 0x422   :  { %v3374_v24 = vld [vmem:[#allocation9 + $0x2e0] sm:$0xff] }
 0x423   :  { %v7068_v8 = vcombine.low %v3370_v61, %v3374_v24 }
 0x424   :  { %4867 = vmatpush1.bf16.msra.mxu0 %v7004_v2  ;;  %4953 = vmatpush1.bf16.msra.mxu1 %v7006_v3  ;;  %v7069_v2 = vcombine.high %v3370_v61, %v3374_v24  ;;  %v7071_v3 = vcombine.high %v3371_v62, %v3375_v63 }
 0x425   :  { %4868 = vmatprep.subr.bf16.mxu0 %v7013_v4  ;;  %4954 = vmatprep.subr.bf16.mxu1 %v7015_v5  ;;  %v3378_v4 = vld [vmem:[#allocation9 + $0x300] sm:$0xff] }
 0x426   :  { %v3382_v5 = vld [vmem:[#allocation9 + $0x320] sm:$0xff] }
 0x427   :  { %v7076_v19 = vcombine.low %v3378_v4, %v3382_v5 }
 0x428   :  { %4869 = vmatpush1.bf16.msra.mxu0 %v7012_v9  ;;  %4955 = vmatpush1.bf16.msra.mxu1 %v7014_v10  ;;  %v7077_v9 = vcombine.high %v3378_v4, %v3382_v5  ;;  %v7079_v10 = vcombine.high %v3379_v6, %v3383_v7 }
 0x429   :  { %4870 = vmatprep.subr.bf16.mxu0 %v7021_v11  ;;  %4956 = vmatprep.subr.bf16.mxu1 %v7023_v12  ;;  %v3386_v11 = vld [vmem:[#allocation9 + $0x340] sm:$0xff] }
 0x42a   :  { %v3390_v12 = vld [vmem:[#allocation9 + $0x360] sm:$0xff] }
 0x42c   :  { %4871 = vmatpush1.bf16.msra.mxu0 %v7020_v23  ;;  %4957 = vmatpush1.bf16.msra.mxu1 %v7022_v25  ;;  %v7085_v23 = vcombine.high %v3386_v11, %v3390_v12  ;;  %v7087_v25 = vcombine.high %v3387_v13, %v3391_v16 }
 0x42d   :  { %4872 = vmatprep.subr.bf16.mxu0 %v7029_v26  ;;  %4958 = vmatprep.subr.bf16.mxu1 %v7031_v27  ;;  %v7084_v26 = vcombine.low %v3386_v11, %v3390_v12  ;;  %v7086_v27 = vcombine.low %v3387_v13, %v3391_v16 }
 0x430   :  { %4873 = vmatpush1.bf16.msra.mxu0 %v7028_v32  ;;  %4959 = vmatpush1.bf16.msra.mxu1 %v7030_v33  ;;  %v3399_v32 = vld [vmem:[#allocation9 + $0x3a8] sm:$0xff]  ;;  %v7092_v33 = vcombine.low %v3394_v28, %v3398_v29 }
 0x431   :  { %4874 = vmatprep.subr.bf16.mxu0 %v7037_v34  ;;  %4960 = vmatprep.subr.bf16.mxu1 %v7039_v35  ;;  %v7094_v34 = vcombine.low %v3395_v30, %v3399_v32  ;;  %v7095_v35 = vcombine.high %v3395_v30, %v3399_v32  ;;  %v3423_v28 = vld [vmem:[#allocation9 + $0x468] sm:$0xff] }
 0x434   :  { %4875 = vmatpush1.bf16.msra.mxu0 %v7036_v41  ;;  %4961 = vmatpush1.bf16.msra.mxu1 %v7038_v42  ;;  %v3407_v41 = vld [vmem:[#allocation9 + $0x3e8] sm:$0xff]  ;;  %v7100_v42 = vcombine.low %v3402_v36, %v3406_v38 }
 0x435   :  { %4876 = vmatprep.subr.bf16.mxu0 %v7045_v43  ;;  %4962 = vmatprep.subr.bf16.mxu1 %v7047_v44  ;;  %v7102_v43 = vcombine.low %v3403_v39, %v3407_v41  ;;  %v7103_v44 = vcombine.high %v3403_v39, %v3407_v41  ;;  %v3431_v36 = vld [vmem:[#allocation9 + $0x4a8] sm:$0xff] }
 0x438   :  { %4877 = vmatpush1.bf16.msra.mxu0 %v7044_v49  ;;  %4963 = vmatpush1.bf16.msra.mxu1 %v7046_v50  ;;  %v3415_v49 = vld [vmem:[#allocation9 + $0x428] sm:$0xff]  ;;  %v7108_v50 = vcombine.low %v3410_v45, %v3414_v46 }
 0x439   :  { %4878 = vmatprep.subr.bf16.mxu0 %v7053_v51  ;;  %4964 = vmatprep.subr.bf16.mxu1 %v7055_v52  ;;  %v7110_v51 = vcombine.low %v3411_v47, %v3415_v49  ;;  %v7111_v52 = vcombine.high %v3411_v47, %v3415_v49  ;;  %v3439_v45 = vld [vmem:[#allocation9 + $0x4e8] sm:$0xff] }
 0x43c   :  { %4879 = vmatpush1.bf16.msra.mxu0 %v7052_v57  ;;  %4965 = vmatpush1.bf16.msra.mxu1 %v7054_v58  ;;  %v2453_v57 = vrot.slane %v2436_v53, %v8856_v21  ;;  %v3447_v53 = vld [vmem:[#allocation9 + $0x528] sm:$0xff] }
 0x43d   :  { %4880 = vmatprep.subr.bf16.mxu0 %v7061_v60  ;;  %4966 = vmatprep.subr.bf16.mxu1 %v7063_v37 }
 0x440   :  { %4881 = vmatpush1.bf16.msra.mxu0 %v7060_v0  ;;  %4967 = vmatpush1.bf16.msra.mxu1 %v7062_v1 }
 0x441   :  { %4882 = vmatprep.subr.bf16.mxu0 %v7069_v2  ;;  %4968 = vmatprep.subr.bf16.mxu1 %v7071_v3 }
 0x444   :  { %4883 = vmatpush1.bf16.msra.mxu0 %v7068_v8  ;;  %4969 = vmatpush1.bf16.msra.mxu1 %v7070_v59 }
 0x445   :  { %4884 = vmatprep.subr.bf16.mxu0 %v7077_v9  ;;  %4970 = vmatprep.subr.bf16.mxu1 %v7079_v10 }
 0x448   :  { %4885 = vmatpush1.bf16.msra.mxu0 %v7076_v19  ;;  %4971 = vmatpush1.bf16.msra.mxu1 %v7078_v22  ;;  %v3418_v22 = vld [vmem:[#allocation9 + $0x440] sm:$0xff] }
 0x449   :  { %4886 = vmatprep.subr.bf16.mxu0 %v7085_v23  ;;  %4972 = vmatprep.subr.bf16.mxu1 %v7087_v25 }
 0x44c   :  { %4887 = vmatpush1.bf16.msra.mxu0 %v7084_v26  ;;  %4973 = vmatpush1.bf16.msra.mxu1 %v7086_v27  ;;  %v3422_v26 = vld [vmem:[#allocation9 + $0x460] sm:$0xff]  ;;  %v3419_v27 = vld [vmem:[#allocation9 + $0x448] sm:$0xff] }
 0x44d   :  { %4888 = vmatprep.subr.bf16.mxu0 %v7093_v31  ;;  %4974 = vmatprep.subr.bf16.mxu1 %v7095_v35  ;;  %v3426_v31 = vld [vmem:[#allocation9 + $0x480] sm:$0xff]  ;;  %v7117_v32 = vcombine.high %v3418_v22, %v3422_v26  ;;  %v3427_v35 = vld [vmem:[#allocation9 + $0x488] sm:$0xff]  ;;  %v7116_v38 = vcombine.low %v3418_v22, %v3422_v26  ;;  %v7118_v39 = vcombine.low %v3419_v27, %v3423_v28 }
 0x44e   :  { %v7127_v41 = vcombine.high %v3427_v35, %v3431_v36  ;;  %v7126_v47 = vcombine.low %v3427_v35, %v3431_v36  ;;  %v3474_v22 = vld [vmem:[#allocation9 + $0x600] sm:$0xff] }
 0x44f   :  { %v3478_v26 = vld [vmem:[#allocation9 + $0x620] sm:$0xff] }
 0x450   :  { %4889 = vmatpush1.bf16.msra.mxu0 %v7092_v33  ;;  %4975 = vmatpush1.bf16.msra.mxu1 %v7094_v34  ;;  %v7119_v33 = vcombine.high %v3419_v27, %v3423_v28  ;;  %v3430_v34 = vld [vmem:[#allocation9 + $0x4a0] sm:$0xff]  ;;  %v3475_v27 = vld [vmem:[#allocation9 + $0x608] sm:$0xff] }
 0x451   :  { %4890 = vmatprep.subr.bf16.mxu0 %v7101_v40  ;;  %4976 = vmatprep.subr.bf16.mxu1 %v7103_v44  ;;  %v7125_v40 = vcombine.high %v3426_v31, %v3430_v34  ;;  %v3435_v44 = vld [vmem:[#allocation9 + $0x4c8] sm:$0xff]  ;;  %v7124_v46 = vcombine.low %v3426_v31, %v3430_v34  ;;  %v3482_v35 = vld [vmem:[#allocation9 + $0x640] sm:$0xff] }
 0x452   :  { %v7135_v49 = vcombine.high %v3435_v44, %v3439_v45  ;;  %v3479_v28 = vld [vmem:[#allocation9 + $0x628] sm:$0xff]  ;;  %v3486_v36 = vld [vmem:[#allocation9 + $0x660] sm:$0xff] }
 0x453   :  { %v7175_v34 = vcombine.high %v3475_v27, %v3479_v28 }
 0x454   :  { %4891 = vmatpush1.bf16.msra.mxu0 %v7100_v42  ;;  %4977 = vmatpush1.bf16.msra.mxu1 %v7102_v43  ;;  %v3434_v42 = vld [vmem:[#allocation9 + $0x4c0] sm:$0xff] }
 0x455   :  { %4903 = vmatprep.subr.bf16.mxu0 %v7109_v48  ;;  %4989 = vmatprep.subr.bf16.mxu1 %v7111_v52  ;;  %v3438_v43 = vld [vmem:[#allocation9 + $0x4e0] sm:$0xff]  ;;  %v3443_v52 = vld [vmem:[#allocation9 + $0x508] sm:$0xff] }
 0x456   :  { %v7133_v48 = vcombine.high %v3434_v42, %v3438_v43 }
 0x4ea   :  { %v3175_v58 = vpop.f32.mrb[12].mxu0  ;;  %v3261_v60 = vpop.f32.mrb[12].mxu1 }
 0x4eb   :  { %v7460_v37 = vadd.f32 %v3175_v58, %v2441_v54  ;;  %v7464_v61 = vadd.f32 %v3261_v60, %v2449_v55  ;;  %v3177_v24 = vpop.f32.mrb[13].mxu0  ;;  %v3263_v62 = vpop.f32.mrb[13].mxu1  ;;  %v3450_v58 = vld [vmem:[#allocation9 + $0x540] sm:$0xff] }
 0x4ec   :  { %v7461_v63 = vadd.f32 %v3177_v24, %v2445_v56  ;;  %v7465_v0 = vadd.f32 %v3263_v62, %v2453_v57  ;;  %v3179_v1 = vpop.f32.mrb[14].mxu0  ;;  %v3265_v2 = vpop.f32.mrb[14].mxu1  ;;  %v3454_v60 = vld [vmem:[#allocation9 + $0x560] sm:$0xff]  ;;  %v7142_v62 = vcombine.low %v3443_v52, %v3447_v53 }
 0x4ed   :  { %v7462_v3 = vadd.f32 %v3179_v1, %v2441_v54  ;;  %v7466_v4 = vadd.f32 %v3265_v2, %v2449_v55  ;;  %v3181_v5 = vpop.f32.mrb[15].mxu0  ;;  %v3267_v6 = vpop.f32.mrb[15].mxu1  ;;  %v3270_v59 = vmax.f32 %v7460_v37, 0.0  ;;  %v3272_v9 = vmax.f32 %v7464_v61, 0.0  ;;  %v3451_v37 = vld [vmem:[#allocation9 + $0x548] sm:$0xff]  ;;  %v3458_v1 = vld [vmem:[#allocation9 + $0x580] sm:$0xff] }
 0x4ee   :  { %v7463_v7 = vadd.f32 %v3181_v5, %v2445_v56  ;;  %v7467_v8 = vadd.f32 %v3267_v6, %v2453_v57  ;;  %v3271_v12 = vmax.f32 %v7461_v63, 0.0  ;;  %v3273_v13 = vmax.f32 %v7465_v0, 0.0  ;;  %v3455_v61 = vld [vmem:[#allocation9 + $0x568] sm:$0xff]  ;;  %v3462_v2 = vld [vmem:[#allocation9 + $0x5a0] sm:$0xff] }
 0x4ef   :  { %v3274_v10 = vmax.f32 %v7462_v3, 0.0  ;;  %v3276_v11 = vmax.f32 %v7466_v4, 0.0  ;;  %v7132_v54 = vcombine.low %v3434_v42, %v3438_v43  ;;  %v7134_v55 = vcombine.low %v3435_v44, %v3439_v45  ;;  %v3459_v3 = vld [vmem:[#allocation9 + $0x588] sm:$0xff]  ;;  %v3490_v44 = vld [vmem:[#allocation9 + $0x680] sm:$0xff] }
 0x4f0   :  { %v3275_v16 = vmax.f32 %v7463_v7, 0.0  ;;  %v3277_v19 = vmax.f32 %v7467_v8, 0.0  ;;  %v7143_v57 = vcombine.high %v3443_v52, %v3447_v53  ;;  %v7149_v63 = vcombine.high %v3450_v58, %v3454_v60  ;;  %v3463_v4 = vld [vmem:[#allocation9 + $0x5a8] sm:$0xff]  ;;  %v3494_v45 = vld [vmem:[#allocation9 + $0x6a0] sm:$0xff] }
 0x4f1   :  { %v8894_v23 = vpack.c.bf16 %v3274_v10, %v3270_v59  ;;  %v8896_v25 = vpack.c.bf16 %v3276_v11, %v3272_v9  ;;  %v7151_v0 = vcombine.high %v3451_v37, %v3455_v61  ;;  %v7148_v5 = vcombine.low %v3450_v58, %v3454_v60  ;;  %v3466_v59 = vld [vmem:[#allocation9 + $0x5c0] sm:$0xff]  ;;  %v3467_v10 = vld [vmem:[#allocation9 + $0x5c8] sm:$0xff] }
 0x4f2   :  { %v8898_v29 = vpack.c.bf16 %v3275_v16, %v3271_v12  ;;  %v8900_v30 = vpack.c.bf16 %v3277_v19, %v3273_v13  ;;  %v7150_v6 = vcombine.low %v3451_v37, %v3455_v61  ;;  %v7157_v7 = vcombine.high %v3458_v1, %v3462_v2  ;;  %v3470_v9 = vld [vmem:[#allocation9 + $0x5e0] sm:$0xff]  ;;  %v3471_v11 = vld [vmem:[#allocation9 + $0x5e8] sm:$0xff] }
 0x4f3   :  { %v7159_v8 = vcombine.high %v3459_v3, %v3463_v4  ;;  %v7156_v12 = vcombine.low %v3458_v1, %v3462_v2  ;;  %v7158_v13 = vcombine.low %v3459_v3, %v3463_v4  ;;  %v7165_v16 = vcombine.high %v3466_v59, %v3470_v9  ;;  %v3498_v52 = vld [vmem:[#allocation9 + $0x6c0] sm:$0xff] }
 0x4f4   :  { %4892 = vmatprep.mubr.bf16.mxu0 %v8898_v29  ;;  %4978 = vmatprep.mubr.bf16.mxu1 %v8898_v29  ;;  %v7167_v19 = vcombine.high %v3467_v10, %v3471_v11  ;;  %v7164_v31 = vcombine.low %v3466_v59, %v3470_v9  ;;  %v7181_v42 = vcombine.high %v3482_v35, %v3486_v36  ;;  %v3502_v53 = vld [vmem:[#allocation9 + $0x6e0] sm:$0xff] }
 0x4f5   :  { %4893 = vmatmul.mubr.bf16.vlgmr.msra.gmra.mrb[16].mxu0 %v8894_v23  ;;  %4979 = vmatmul.mubr.bf16.vlgmr.msra.gmra.mrb[16].mxu1 %v8894_v23  ;;  %v7197_v58 = vcombine.high %v3498_v52, %v3502_v53  ;;  %v3506_v37 = vld [vmem:[#allocation9 + $0x700] sm:$0xff] }
 0x4f6   :  { %4904 = vmatpush1.bf16.msra.mxu0 %v7108_v50  ;;  %4990 = vmatpush1.bf16.msra.mxu1 %v7110_v51  ;;  %v3442_v50 = vld [vmem:[#allocation9 + $0x500] sm:$0xff] }
 0x4f7   :  { %4935 = vmatprep.mubr.bf16.mxu0 %v8900_v30  ;;  %5021 = vmatprep.mubr.bf16.mxu1 %v8900_v30  ;;  %v3446_v51 = vld [vmem:[#allocation9 + $0x520] sm:$0xff] }
 0x4f8   :  { %4905 = vmatprep.subr.bf16.mxu0 %v7117_v32  ;;  %4991 = vmatprep.subr.bf16.mxu1 %v7119_v33  ;;  %v7141_v56 = vcombine.high %v3442_v50, %v3446_v51  ;;  %v7140_v24 = vcombine.low %v3442_v50, %v3446_v51  ;;  %v7166_v32 = vcombine.low %v3467_v10, %v3471_v11  ;;  %v3510_v61 = vld [vmem:[#allocation9 + $0x720] sm:$0xff] }
 0x4f9   :  { %v7173_v33 = vcombine.high %v3474_v22, %v3478_v26  ;;  %v7189_v50 = vcombine.high %v3490_v44, %v3494_v45  ;;  %v7205_v1 = vcombine.high %v3506_v37, %v3510_v61  ;;  %v3514_v3 = vld [vmem:[#allocation9 + $0x740] sm:$0xff] }
 0x4fa   :  { %4906 = vmatpush1.bf16.msra.mxu0 %v7116_v38  ;;  %4992 = vmatpush1.bf16.msra.mxu1 %v7118_v39  ;;  %v3483_v38 = vld [vmem:[#allocation9 + $0x648] sm:$0xff]  ;;  %v3518_v4 = vld [vmem:[#allocation9 + $0x760] sm:$0xff] }
 0x4fb   :  { %4907 = vmatprep.subr.bf16.mxu0 %v7125_v40  ;;  %4993 = vmatprep.subr.bf16.mxu1 %v7127_v41  ;;  %v3487_v39 = vld [vmem:[#allocation9 + $0x668] sm:$0xff]  ;;  %v7172_v40 = vcombine.low %v3474_v22, %v3478_v26  ;;  %v7174_v41 = vcombine.low %v3475_v27, %v3479_v28  ;;  %v7213_v59 = vcombine.high %v3514_v3, %v3518_v4  ;;  %v3522_v10 = vld [vmem:[#allocation9 + $0x780] sm:$0xff] }
 0x4fc   :  { %v7183_v43 = vcombine.high %v3483_v38, %v3487_v39  ;;  %v3526_v11 = vld [vmem:[#allocation9 + $0x7a0] sm:$0xff] }
 0x4fd   :  { %v7221_v22 = vcombine.high %v3522_v10, %v3526_v11  ;;  %v3530_v27 = vld [vmem:[#allocation9 + $0x7c0] sm:$0xff] }
 0x4fe   :  { %4908 = vmatpush1.bf16.msra.mxu0 %v7124_v46  ;;  %4994 = vmatpush1.bf16.msra.mxu1 %v7126_v47  ;;  %v3491_v46 = vld [vmem:[#allocation9 + $0x688] sm:$0xff]  ;;  %v3534_v28 = vld [vmem:[#allocation9 + $0x7e0] sm:$0xff] }
 0x4ff   :  { %4909 = vmatprep.subr.bf16.mxu0 %v7133_v48  ;;  %4995 = vmatprep.subr.bf16.mxu1 %v7135_v49  ;;  %v3495_v47 = vld [vmem:[#allocation9 + $0x6a8] sm:$0xff]  ;;  %v7180_v48 = vcombine.low %v3482_v35, %v3486_v36  ;;  %v7182_v49 = vcombine.low %v3483_v38, %v3487_v39  ;;  %v7229_v35 = vcombine.high %v3530_v27, %v3534_v28  ;;  %v3284_v38 = vld [vmem:[#allocation9 + $0x10] sm:$0xff] }
 0x500   :  { %v7191_v51 = vcombine.high %v3491_v46, %v3495_v47  ;;  %v3288_v39 = vld [vmem:[#allocation9 + $0x30] sm:$0xff] }
 0x502   :  { %4910 = vmatpush1.bf16.msra.mxu0 %v7132_v54  ;;  %4996 = vmatpush1.bf16.msra.mxu1 %v7134_v55  ;;  %v3499_v54 = vld [vmem:[#allocation9 + $0x6c8] sm:$0xff] }
 0x503   :  { %4911 = vmatprep.subr.bf16.mxu0 %v7141_v56  ;;  %4997 = vmatprep.subr.bf16.mxu1 %v7143_v57  ;;  %v3503_v55 = vld [vmem:[#allocation9 + $0x6e8] sm:$0xff]  ;;  %v7188_v56 = vcombine.low %v3490_v44, %v3494_v45  ;;  %v7190_v57 = vcombine.low %v3491_v46, %v3495_v47  ;;  %v6985_v44 = vcombine.high %v3284_v38, %v3288_v39  ;;  %v3292_v46 = vld [vmem:[#allocation9 + $0x50] sm:$0xff] }
 0x504   :  { %v7199_v60 = vcombine.high %v3499_v54, %v3503_v55  ;;  %v3296_v47 = vld [vmem:[#allocation9 + $0x70] sm:$0xff] }
 0x506   :  { %4912 = vmatpush1.bf16.msra.mxu0 %v7140_v24  ;;  %4998 = vmatpush1.bf16.msra.mxu1 %v7142_v62  ;;  %v3507_v24 = vld [vmem:[#allocation9 + $0x708] sm:$0xff] }
 0x507   :  { %4913 = vmatprep.subr.bf16.mxu0 %v7149_v63  ;;  %4999 = vmatprep.subr.bf16.mxu1 %v7151_v0  ;;  %v3511_v62 = vld [vmem:[#allocation9 + $0x728] sm:$0xff]  ;;  %v7196_v63 = vcombine.low %v3498_v52, %v3502_v53  ;;  %v7198_v0 = vcombine.low %v3499_v54, %v3503_v55  ;;  %v6993_v52 = vcombine.high %v3292_v46, %v3296_v47  ;;  %v3300_v54 = vld [vmem:[#allocation9 + $0x90] sm:$0xff] }
 0x508   :  { %v7207_v2 = vcombine.high %v3507_v24, %v3511_v62  ;;  %v3304_v55 = vld [vmem:[#allocation9 + $0xb0] sm:$0xff] }
 0x50a   :  { %4914 = vmatpush1.bf16.msra.mxu0 %v7148_v5  ;;  %5000 = vmatpush1.bf16.msra.mxu1 %v7150_v6  ;;  %v3515_v5 = vld [vmem:[#allocation9 + $0x748] sm:$0xff] }
 0x50b   :  { %4915 = vmatprep.subr.bf16.mxu0 %v7157_v7  ;;  %5001 = vmatprep.subr.bf16.mxu1 %v7159_v8  ;;  %v3519_v6 = vld [vmem:[#allocation9 + $0x768] sm:$0xff]  ;;  %v7204_v7 = vcombine.low %v3506_v37, %v3510_v61  ;;  %v7206_v8 = vcombine.low %v3507_v24, %v3511_v62  ;;  %v7001_v37 = vcombine.high %v3300_v54, %v3304_v55  ;;  %v3308_v24 = vld [vmem:[#allocation9 + $0xd0] sm:$0xff] }
 0x50c   :  { %v7215_v9 = vcombine.high %v3515_v5, %v3519_v6  ;;  %v3312_v62 = vld [vmem:[#allocation9 + $0xf0] sm:$0xff] }
 0x50e   :  { %4916 = vmatpush1.bf16.msra.mxu0 %v7156_v12  ;;  %5002 = vmatpush1.bf16.msra.mxu1 %v7158_v13  ;;  %v3523_v12 = vld [vmem:[#allocation9 + $0x788] sm:$0xff] }
 0x50f   :  { %4917 = vmatprep.subr.bf16.mxu0 %v7165_v16  ;;  %5003 = vmatprep.subr.bf16.mxu1 %v7167_v19  ;;  %v3527_v13 = vld [vmem:[#allocation9 + $0x7a8] sm:$0xff]  ;;  %v7212_v16 = vcombine.low %v3514_v3, %v3518_v4  ;;  %v7214_v19 = vcombine.low %v3515_v5, %v3519_v6  ;;  %v7009_v3 = vcombine.high %v3308_v24, %v3312_v62  ;;  %v3316_v5 = vld [vmem:[#allocation9 + $0x110] sm:$0xff] }
 0x510   :  { %v7223_v26 = vcombine.high %v3523_v12, %v3527_v13  ;;  %v3320_v6 = vld [vmem:[#allocation9 + $0x130] sm:$0xff] }
 0x512   :  { %4918 = vmatpush1.bf16.msra.mxu0 %v7164_v31  ;;  %5004 = vmatpush1.bf16.msra.mxu1 %v7166_v32  ;;  %v3531_v31 = vld [vmem:[#allocation9 + $0x7c8] sm:$0xff] }
 0x513   :  { %4919 = vmatprep.subr.bf16.mxu0 %v7173_v33  ;;  %5005 = vmatprep.subr.bf16.mxu1 %v7175_v34  ;;  %v3535_v32 = vld [vmem:[#allocation9 + $0x7e8] sm:$0xff]  ;;  %v7220_v33 = vcombine.low %v3522_v10, %v3526_v11  ;;  %v7222_v34 = vcombine.low %v3523_v12, %v3527_v13  ;;  %v3324_v11 = vld [vmem:[#allocation9 + $0x150] sm:$0xff]  ;;  %v3325_v13 = vld [vmem:[#allocation9 + $0x158] sm:$0xff] }
 0x514   :  { %v7231_v36 = vcombine.high %v3531_v31, %v3535_v32  ;;  %v3328_v12 = vld [vmem:[#allocation9 + $0x170] sm:$0xff] }
 0x516   :  { %4920 = vmatpush1.bf16.msra.mxu0 %v7172_v40  ;;  %5006 = vmatpush1.bf16.msra.mxu1 %v7174_v41  ;;  %v3285_v40 = vld [vmem:[#allocation9 + $0x18] sm:$0xff] }
 0x517   :  { %4921 = vmatprep.subr.bf16.mxu0 %v7181_v42  ;;  %5007 = vmatprep.subr.bf16.mxu1 %v7183_v43  ;;  %v3289_v41 = vld [vmem:[#allocation9 + $0x38] sm:$0xff]  ;;  %v7228_v42 = vcombine.low %v3530_v27, %v3534_v28  ;;  %v7230_v43 = vcombine.low %v3531_v31, %v3535_v32  ;;  %v3332_v28 = vld [vmem:[#allocation9 + $0x190] sm:$0xff] }
 0x518   :  { %v6987_v45 = vcombine.high %v3285_v40, %v3289_v41  ;;  %v3336_v31 = vld [vmem:[#allocation9 + $0x1b0] sm:$0xff]  ;;  %v3333_v32 = vld [vmem:[#allocation9 + $0x198] sm:$0xff] }
 0x51a   :  { %4922 = vmatpush1.bf16.msra.mxu0 %v7180_v48  ;;  %5008 = vmatpush1.bf16.msra.mxu1 %v7182_v49  ;;  %v3293_v48 = vld [vmem:[#allocation9 + $0x58] sm:$0xff] }
 0x51b   :  { %4923 = vmatprep.subr.bf16.mxu0 %v7189_v50  ;;  %5009 = vmatprep.subr.bf16.mxu1 %v7191_v51  ;;  %v3297_v49 = vld [vmem:[#allocation9 + $0x78] sm:$0xff]  ;;  %v6984_v50 = vcombine.low %v3284_v38, %v3288_v39  ;;  %v6986_v51 = vcombine.low %v3285_v40, %v3289_v41  ;;  %v3340_v39 = vld [vmem:[#allocation9 + $0x1d0] sm:$0xff] }
 0x51c   :  { %v6995_v53 = vcombine.high %v3293_v48, %v3297_v49  ;;  %v3344_v40 = vld [vmem:[#allocation9 + $0x1f0] sm:$0xff]  ;;  %v3341_v41 = vld [vmem:[#allocation9 + $0x1d8] sm:$0xff] }
 0x51e   :  { %4924 = vmatpush1.bf16.msra.mxu0 %v7188_v56  ;;  %5010 = vmatpush1.bf16.msra.mxu1 %v7190_v57  ;;  %v3301_v56 = vld [vmem:[#allocation9 + $0x98] sm:$0xff] }
 0x51f   :  { %4925 = vmatprep.subr.bf16.mxu0 %v7197_v58  ;;  %5011 = vmatprep.subr.bf16.mxu1 %v7199_v60  ;;  %v3305_v57 = vld [vmem:[#allocation9 + $0xb8] sm:$0xff]  ;;  %v6992_v58 = vcombine.low %v3292_v46, %v3296_v47  ;;  %v6994_v60 = vcombine.low %v3293_v48, %v3297_v49  ;;  %v3348_v47 = vld [vmem:[#allocation9 + $0x210] sm:$0xff] }
 0x520   :  { %v7003_v61 = vcombine.high %v3301_v56, %v3305_v57  ;;  %v3352_v48 = vld [vmem:[#allocation9 + $0x230] sm:$0xff]  ;;  %v3349_v49 = vld [vmem:[#allocation9 + $0x218] sm:$0xff] }
 0x522   :  { %4926 = vmatpush1.bf16.msra.mxu0 %v7196_v63  ;;  %5012 = vmatpush1.bf16.msra.mxu1 %v7198_v0  ;;  %v3309_v63 = vld [vmem:[#allocation9 + $0xd8] sm:$0xff] }
 0x523   :  { %4927 = vmatprep.subr.bf16.mxu0 %v7205_v1  ;;  %5013 = vmatprep.subr.bf16.mxu1 %v7207_v2  ;;  %v3313_v0 = vld [vmem:[#allocation9 + $0xf8] sm:$0xff]  ;;  %v7000_v1 = vcombine.low %v3300_v54, %v3304_v55  ;;  %v7002_v2 = vcombine.low %v3301_v56, %v3305_v57  ;;  %v3356_v55 = vld [vmem:[#allocation9 + $0x250] sm:$0xff] }
 0x524   :  { %v7011_v4 = vcombine.high %v3309_v63, %v3313_v0  ;;  %v3360_v56 = vld [vmem:[#allocation9 + $0x270] sm:$0xff]  ;;  %v3357_v57 = vld [vmem:[#allocation9 + $0x258] sm:$0xff] }
 0x526   :  { %4928 = vmatpush1.bf16.msra.mxu0 %v7204_v7  ;;  %5014 = vmatpush1.bf16.msra.mxu1 %v7206_v8  ;;  %v3321_v7 = vld [vmem:[#allocation9 + $0x138] sm:$0xff]  ;;  %v7008_v8 = vcombine.low %v3308_v24, %v3312_v62  ;;  %v3364_v62 = vld [vmem:[#allocation9 + $0x290] sm:$0xff] }
 0x527   :  { %4929 = vmatprep.subr.bf16.mxu0 %v7213_v59  ;;  %5015 = vmatprep.subr.bf16.mxu1 %v7215_v9  ;;  %v7010_v59 = vcombine.low %v3309_v63, %v3313_v0  ;;  %v7017_v9 = vcombine.high %v3316_v5, %v3320_v6  ;;  %v3368_v63 = vld [vmem:[#allocation9 + $0x2b0] sm:$0xff]  ;;  %v3365_v0 = vld [vmem:[#allocation9 + $0x298] sm:$0xff] }
 0x52a   :  { %4930 = vmatpush1.bf16.msra.mxu0 %v7212_v16  ;;  %5016 = vmatpush1.bf16.msra.mxu1 %v7214_v19  ;;  %v3329_v16 = vld [vmem:[#allocation9 + $0x178] sm:$0xff]  ;;  %v7016_v19 = vcombine.low %v3316_v5, %v3320_v6  ;;  %v3372_v6 = vld [vmem:[#allocation9 + $0x2d0] sm:$0xff] }
 0x52b   :  { %4931 = vmatprep.subr.bf16.mxu0 %v7221_v22  ;;  %5017 = vmatprep.subr.bf16.mxu1 %v7223_v26  ;;  %v7025_v26 = vcombine.high %v3324_v11, %v3328_v12  ;;  %v7027_v27 = vcombine.high %v3325_v13, %v3329_v16 }
 0x52e   :  { %4932 = vmatpush1.bf16.msra.mxu0 %v7220_v33  ;;  %5018 = vmatpush1.bf16.msra.mxu1 %v7222_v34  ;;  %v3337_v33 = vld [vmem:[#allocation9 + $0x1b8] sm:$0xff]  ;;  %v7024_v34 = vcombine.low %v3324_v11, %v3328_v12  ;;  %v3380_v12 = vld [vmem:[#allocation9 + $0x310] sm:$0xff] }
 0x52f   :  { %4933 = vmatprep.subr.bf16.mxu0 %v7229_v35  ;;  %5019 = vmatprep.subr.bf16.mxu1 %v7231_v36  ;;  %v7026_v35 = vcombine.low %v3325_v13, %v3329_v16  ;;  %v7033_v36 = vcombine.high %v3332_v28, %v3336_v31  ;;  %v7035_v38 = vcombine.high %v3333_v32, %v3337_v33  ;;  %v3384_v13 = vld [vmem:[#allocation9 + $0x330] sm:$0xff]  ;;  %v3381_v16 = vld [vmem:[#allocation9 + $0x318] sm:$0xff] }
 0x532   :  { %4934 = vmatpush1.bf16.msra.mxu0 %v7228_v42  ;;  %5020 = vmatpush1.bf16.msra.mxu1 %v7230_v43  ;;  %v3345_v42 = vld [vmem:[#allocation9 + $0x1f8] sm:$0xff]  ;;  %v7032_v43 = vcombine.low %v3332_v28, %v3336_v31  ;;  %v3388_v31 = vld [vmem:[#allocation9 + $0x350] sm:$0xff] }
 0x533   :  { %5032 = vmatprep.subr.bf16.mxu0 %v6985_v44  ;;  %5118 = vmatprep.subr.bf16.mxu1 %v6987_v45  ;;  %v7034_v44 = vcombine.low %v3333_v32, %v3337_v33  ;;  %v7041_v45 = vcombine.high %v3340_v39, %v3344_v40  ;;  %v7043_v46 = vcombine.high %v3341_v41, %v3345_v42  ;;  %v3392_v32 = vld [vmem:[#allocation9 + $0x370] sm:$0xff]  ;;  %v3389_v33 = vld [vmem:[#allocation9 + $0x358] sm:$0xff] }
 0x535   :  { %4936 = vmatmul.mubr.bf16.vlgmr.msra.gmra.mrb[16].mxu0 %v8896_v25  ;;  %5022 = vmatmul.mubr.bf16.vlgmr.msra.gmra.mrb[16].mxu1 %v8896_v25 }
 0x536   :  { %5033 = vmatpush1.bf16.msra.mxu0 %v6984_v50  ;;  %5064 = vmatprep.mubr.bf16.mxu0 %v8898_v29  ;;  %v3353_v50 = vld [vmem:[#allocation9 + $0x238] sm:$0xff] }
 0x537   :  { %5119 = vmatpush1.bf16.msra.mxu1 %v6986_v51  ;;  %5150 = vmatprep.mubr.bf16.mxu1 %v8898_v29  ;;  %v3317_v29 = vld [vmem:[#allocation9 + $0x118] sm:$0xff]  ;;  %v7040_v51 = vcombine.low %v3340_v39, %v3344_v40  ;;  %v7051_v54 = vcombine.high %v3349_v49, %v3353_v50  ;;  %v3396_v40 = vld [vmem:[#allocation9 + $0x390] sm:$0xff] }
 0x538   :  { %5034 = vmatprep.subr.bf16.mxu0 %v6993_v52  ;;  %5120 = vmatprep.subr.bf16.mxu1 %v6995_v53  ;;  %v7019_v10 = vcombine.high %v3317_v29, %v3321_v7  ;;  %v7018_v22 = vcombine.low %v3317_v29, %v3321_v7  ;;  %v7042_v52 = vcombine.low %v3341_v41, %v3345_v42  ;;  %v3376_v29 = vld [vmem:[#allocation9 + $0x2f0] sm:$0xff]  ;;  %v3373_v7 = vld [vmem:[#allocation9 + $0x2d8] sm:$0xff] }
 0x539   :  { %v7049_v53 = vcombine.high %v3348_v47, %v3352_v48  ;;  %v3400_v41 = vld [vmem:[#allocation9 + $0x3b0] sm:$0xff]  ;;  %v3397_v42 = vld [vmem:[#allocation9 + $0x398] sm:$0xff] }
 0x53a   :  { %5035 = vmatpush1.bf16.msra.mxu0 %v6992_v58  ;;  %v3361_v58 = vld [vmem:[#allocation9 + $0x278] sm:$0xff] }
 0x53b   :  { %5121 = vmatpush1.bf16.msra.mxu1 %v6994_v60  ;;  %5036 = vmatprep.subr.bf16.mxu0 %v7001_v37  ;;  %v7048_v60 = vcombine.low %v3348_v47, %v3352_v48  ;;  %v7050_v37 = vcombine.low %v3349_v49, %v3353_v50  ;;  %v7059_v24 = vcombine.high %v3357_v57, %v3361_v58  ;;  %v3404_v48 = vld [vmem:[#allocation9 + $0x3d0] sm:$0xff]  ;;  %v3405_v50 = vld [vmem:[#allocation9 + $0x3d8] sm:$0xff] }
 0x53c   :  { %5122 = vmatprep.subr.bf16.mxu1 %v7003_v61  ;;  %v7057_v61 = vcombine.high %v3356_v55, %v3360_v56  ;;  %v3408_v49 = vld [vmem:[#allocation9 + $0x3f0] sm:$0xff] }
 0x53e   :  { %5037 = vmatpush1.bf16.msra.mxu0 %v7000_v1  ;;  %v3369_v1 = vld [vmem:[#allocation9 + $0x2b8] sm:$0xff] }
 0x53f   :  { %5123 = vmatpush1.bf16.msra.mxu1 %v7002_v2  ;;  %5038 = vmatprep.subr.bf16.mxu0 %v7009_v3  ;;  %v7056_v2 = vcombine.low %v3356_v55, %v3360_v56  ;;  %v7058_v3 = vcombine.low %v3357_v57, %v3361_v58  ;;  %v7067_v5 = vcombine.high %v3365_v0, %v3369_v1  ;;  %v3412_v56 = vld [vmem:[#allocation9 + $0x410] sm:$0xff]  ;;  %v3413_v58 = vld [vmem:[#allocation9 + $0x418] sm:$0xff] }
 0x540   :  { %5124 = vmatprep.subr.bf16.mxu1 %v7011_v4  ;;  %v7065_v4 = vcombine.high %v3364_v62, %v3368_v63  ;;  %v3416_v57 = vld [vmem:[#allocation9 + $0x430] sm:$0xff] }
 0x542   :  { %5039 = vmatpush1.bf16.msra.mxu0 %v7008_v8  ;;  %v3377_v8 = vld [vmem:[#allocation9 + $0x2f8] sm:$0xff] }
 0x543   :  { %5125 = vmatpush1.bf16.msra.mxu1 %v7010_v59  ;;  %5040 = vmatprep.subr.bf16.mxu0 %v7017_v9  ;;  %v7064_v59 = vcombine.low %v3364_v62, %v3368_v63  ;;  %v7066_v9 = vcombine.low %v3365_v0, %v3369_v1  ;;  %v7075_v11 = vcombine.high %v3373_v7, %v3377_v8  ;;  %v3420_v63 = vld [vmem:[#allocation9 + $0x450] sm:$0xff] }
 0x544   :  { %5126 = vmatprep.subr.bf16.mxu1 %v7019_v10  ;;  %v7073_v10 = vcombine.high %v3372_v6, %v3376_v29  ;;  %v3424_v0 = vld [vmem:[#allocation9 + $0x470] sm:$0xff]  ;;  %v7112_v1 = vcombine.low %v3412_v56, %v3416_v57 }
 0x546   :  { %5041 = vmatpush1.bf16.msra.mxu0 %v7016_v19  ;;  %v3385_v19 = vld [vmem:[#allocation9 + $0x338] sm:$0xff] }
 0x547   :  { %5127 = vmatpush1.bf16.msra.mxu1 %v7018_v22  ;;  %5042 = vmatprep.subr.bf16.mxu0 %v7025_v26  ;;  %v7072_v22 = vcombine.low %v3372_v6, %v3376_v29  ;;  %v7074_v26 = vcombine.low %v3373_v7, %v3377_v8  ;;  %v7083_v28 = vcombine.high %v3381_v16, %v3385_v19  ;;  %v3428_v6 = vld [vmem:[#allocation9 + $0x490] sm:$0xff]  ;;  %v3429_v8 = vld [vmem:[#allocation9 + $0x498] sm:$0xff] }
 0x548   :  { %5128 = vmatprep.subr.bf16.mxu1 %v7027_v27  ;;  %v7081_v27 = vcombine.high %v3380_v12, %v3384_v13  ;;  %v3432_v29 = vld [vmem:[#allocation9 + $0x4b0] sm:$0xff] }
 0x54a   :  { %5043 = vmatpush1.bf16.msra.mxu0 %v7024_v34  ;;  %v3393_v34 = vld [vmem:[#allocation9 + $0x378] sm:$0xff] }
 0x54b   :  { %5129 = vmatpush1.bf16.msra.mxu1 %v7026_v35  ;;  %5044 = vmatprep.subr.bf16.mxu0 %v7033_v36  ;;  %v7080_v35 = vcombine.low %v3380_v12, %v3384_v13  ;;  %v7082_v36 = vcombine.low %v3381_v16, %v3385_v19  ;;  %v7091_v39 = vcombine.high %v3389_v33, %v3393_v34  ;;  %v3436_v13 = vld [vmem:[#allocation9 + $0x4d0] sm:$0xff]  ;;  %v3437_v19 = vld [vmem:[#allocation9 + $0x4d8] sm:$0xff] }
 0x54c   :  { %5130 = vmatprep.subr.bf16.mxu1 %v7035_v38  ;;  %v7089_v38 = vcombine.high %v3388_v31, %v3392_v32  ;;  %v3440_v16 = vld [vmem:[#allocation9 + $0x4f0] sm:$0xff] }
 0x54e   :  { %5045 = vmatpush1.bf16.msra.mxu0 %v7032_v43  ;;  %v3401_v43 = vld [vmem:[#allocation9 + $0x3b8] sm:$0xff] }
 0x54f   :  { %5131 = vmatpush1.bf16.msra.mxu1 %v7034_v44  ;;  %5046 = vmatprep.subr.bf16.mxu0 %v7041_v45  ;;  %v7088_v44 = vcombine.low %v3388_v31, %v3392_v32  ;;  %v7090_v45 = vcombine.low %v3389_v33, %v3393_v34  ;;  %v7099_v47 = vcombine.high %v3397_v42, %v3401_v43  ;;  %v3444_v31 = vld [vmem:[#allocation9 + $0x510] sm:$0xff]  ;;  %v3445_v33 = vld [vmem:[#allocation9 + $0x518] sm:$0xff] }
 0x550   :  { %5132 = vmatprep.subr.bf16.mxu1 %v7043_v46  ;;  %v7097_v46 = vcombine.high %v3396_v40, %v3400_v41  ;;  %v3448_v32 = vld [vmem:[#allocation9 + $0x530] sm:$0xff]  ;;  %v3449_v34 = vld [vmem:[#allocation9 + $0x538] sm:$0xff] }
 0x552   :  { %5047 = vmatpush1.bf16.msra.mxu0 %v7040_v51  ;;  %v3409_v51 = vld [vmem:[#allocation9 + $0x3f8] sm:$0xff] }
 0x553   :  { %5133 = vmatpush1.bf16.msra.mxu1 %v7042_v52  ;;  %5048 = vmatprep.subr.bf16.mxu0 %v7049_v53  ;;  %v7096_v52 = vcombine.low %v3396_v40, %v3400_v41  ;;  %v7098_v53 = vcombine.low %v3397_v42, %v3401_v43  ;;  %v7107_v55 = vcombine.high %v3405_v50, %v3409_v51  ;;  %v3456_v40 = vld [vmem:[#allocation9 + $0x570] sm:$0xff]  ;;  %v3453_v41 = vld [vmem:[#allocation9 + $0x558] sm:$0xff] }
 0x554   :  { %5134 = vmatprep.subr.bf16.mxu1 %v7051_v54  ;;  %v7105_v54 = vcombine.high %v3404_v48, %v3408_v49  ;;  %v3457_v42 = vld [vmem:[#allocation9 + $0x578] sm:$0xff]  ;;  %v7144_v43 = vcombine.low %v3444_v31, %v3448_v32 }
 0x556   :  { %5049 = vmatpush1.bf16.msra.mxu0 %v7048_v60  ;;  %v3417_v60 = vld [vmem:[#allocation9 + $0x438] sm:$0xff] }
 0x557   :  { %5135 = vmatpush1.bf16.msra.mxu1 %v7050_v37  ;;  %5050 = vmatprep.subr.bf16.mxu0 %v7057_v61  ;;  %v7104_v37 = vcombine.low %v3404_v48, %v3408_v49  ;;  %v7106_v61 = vcombine.low %v3405_v50, %v3409_v51  ;;  %v7115_v62 = vcombine.high %v3413_v58, %v3417_v60  ;;  %v3464_v48 = vld [vmem:[#allocation9 + $0x5b0] sm:$0xff]  ;;  %v3461_v49 = vld [vmem:[#allocation9 + $0x598] sm:$0xff] }
 0x558   :  { %5136 = vmatprep.subr.bf16.mxu1 %v7059_v24  ;;  %v7113_v24 = vcombine.high %v3412_v56, %v3416_v57  ;;  %v3465_v50 = vld [vmem:[#allocation9 + $0x5b8] sm:$0xff]  ;;  %v3472_v56 = vld [vmem:[#allocation9 + $0x5f0] sm:$0xff] }
 0x559   :  { %v3469_v57 = vld [vmem:[#allocation9 + $0x5d8] sm:$0xff] }
 0x55a   :  { %5051 = vmatpush1.bf16.msra.mxu0 %v7056_v2  ;;  %v3421_v2 = vld [vmem:[#allocation9 + $0x458] sm:$0xff] }
 0x55b   :  { %5137 = vmatpush1.bf16.msra.mxu1 %v7058_v3  ;;  %5052 = vmatprep.subr.bf16.mxu0 %v7065_v4  ;;  %v3425_v3 = vld [vmem:[#allocation9 + $0x478] sm:$0xff]  ;;  %v7114_v4 = vcombine.low %v3413_v58, %v3417_v60 }
 0x55c   :  { %5138 = vmatprep.subr.bf16.mxu1 %v7067_v5  ;;  %v7121_v5 = vcombine.high %v3420_v63, %v3424_v0  ;;  %v7123_v7 = vcombine.high %v3421_v2, %v3425_v3  ;;  %v3473_v58 = vld [vmem:[#allocation9 + $0x5f8] sm:$0xff] }
 0x55e   :  { %5053 = vmatpush1.bf16.msra.mxu0 %v7064_v59  ;;  %v3433_v59 = vld [vmem:[#allocation9 + $0x4b8] sm:$0xff] }
 0x55f   :  { %5139 = vmatpush1.bf16.msra.mxu1 %v7066_v9  ;;  %5054 = vmatprep.subr.bf16.mxu0 %v7073_v10  ;;  %v7120_v9 = vcombine.low %v3420_v63, %v3424_v0  ;;  %v7122_v10 = vcombine.low %v3421_v2, %v3425_v3  ;;  %v7131_v12 = vcombine.high %v3429_v8, %v3433_v59  ;;  %v3480_v63 = vld [vmem:[#allocation9 + $0x630] sm:$0xff]  ;;  %v3477_v0 = vld [vmem:[#allocation9 + $0x618] sm:$0xff] }
 0x560   :  { %5140 = vmatprep.subr.bf16.mxu1 %v7075_v11  ;;  %v7129_v11 = vcombine.high %v3428_v6, %v3432_v29  ;;  %v7170_v3 = vcombine.low %v3469_v57, %v3473_v58 }
 0x562   :  { %5055 = vmatpush1.bf16.msra.mxu0 %v7072_v22  ;;  %v3441_v22 = vld [vmem:[#allocation9 + $0x4f8] sm:$0xff] }
 0x563   :  { %5141 = vmatpush1.bf16.msra.mxu1 %v7074_v26  ;;  %5056 = vmatprep.subr.bf16.mxu0 %v7081_v27  ;;  %v7128_v26 = vcombine.low %v3428_v6, %v3432_v29  ;;  %v7137_v27 = vcombine.high %v3436_v13, %v3440_v16  ;;  %v3484_v6 = vld [vmem:[#allocation9 + $0x650] sm:$0xff] }
 0x564   :  { %5142 = vmatprep.subr.bf16.mxu1 %v7083_v28  ;;  %v7139_v28 = vcombine.high %v3437_v19, %v3441_v22  ;;  %v3488_v29 = vld [vmem:[#allocation9 + $0x670] sm:$0xff] }
 0x566   :  { %5057 = vmatpush1.bf16.msra.mxu0 %v7080_v35  ;;  %v7138_v35 = vcombine.low %v3437_v19, %v3441_v22  ;;  %v3497_v19 = vld [vmem:[#allocation9 + $0x6b8] sm:$0xff]  ;;  %v7184_v22 = vcombine.low %v3484_v6, %v3488_v29 }
 0x567   :  { %5143 = vmatpush1.bf16.msra.mxu1 %v7082_v36  ;;  %5058 = vmatprep.subr.bf16.mxu0 %v7089_v38  ;;  %v7145_v36 = vcombine.high %v3444_v31, %v3448_v32  ;;  %v7147_v38 = vcombine.high %v3445_v33, %v3449_v34  ;;  %v3504_v31 = vld [vmem:[#allocation9 + $0x6f0] sm:$0xff]  ;;  %v3501_v32 = vld [vmem:[#allocation9 + $0x6d8] sm:$0xff] }
 0x568   :  { %5144 = vmatprep.subr.bf16.mxu1 %v7091_v39  ;;  %v3452_v39 = vld [vmem:[#allocation9 + $0x550] sm:$0xff] }
 0x569   :  { %v7152_v51 = vcombine.low %v3452_v39, %v3456_v40 }
 0x56a   :  { %5059 = vmatpush1.bf16.msra.mxu0 %v7088_v44  ;;  %v7146_v44 = vcombine.low %v3445_v33, %v3449_v34  ;;  %v3505_v33 = vld [vmem:[#allocation9 + $0x6f8] sm:$0xff] }
 0x56b   :  { %5145 = vmatpush1.bf16.msra.mxu1 %v7090_v45  ;;  %5060 = vmatprep.subr.bf16.mxu0 %v7097_v46  ;;  %v7153_v45 = vcombine.high %v3452_v39, %v3456_v40  ;;  %v7155_v46 = vcombine.high %v3453_v41, %v3457_v42  ;;  %v3512_v39 = vld [vmem:[#allocation9 + $0x730] sm:$0xff]  ;;  %v3509_v40 = vld [vmem:[#allocation9 + $0x718] sm:$0xff] }
 0x56c   :  { %5146 = vmatprep.subr.bf16.mxu1 %v7099_v47  ;;  %v3460_v47 = vld [vmem:[#allocation9 + $0x590] sm:$0xff] }
 0x56d   :  { %v7160_v60 = vcombine.low %v3460_v47, %v3464_v48 }
 0x56e   :  { %5061 = vmatpush1.bf16.msra.mxu0 %v7096_v52  ;;  %v7154_v52 = vcombine.low %v3453_v41, %v3457_v42  ;;  %v3513_v41 = vld [vmem:[#allocation9 + $0x738] sm:$0xff] }
 0x56f   :  { %5147 = vmatpush1.bf16.msra.mxu1 %v7098_v53  ;;  %5062 = vmatprep.subr.bf16.mxu0 %v7105_v54  ;;  %v7161_v53 = vcombine.high %v3460_v47, %v3464_v48  ;;  %v7163_v54 = vcombine.high %v3461_v49, %v3465_v50  ;;  %v3520_v47 = vld [vmem:[#allocation9 + $0x770] sm:$0xff]  ;;  %v3517_v48 = vld [vmem:[#allocation9 + $0x758] sm:$0xff] }
 0x570   :  { %5148 = vmatprep.subr.bf16.mxu1 %v7107_v55  ;;  %v3468_v55 = vld [vmem:[#allocation9 + $0x5d0] sm:$0xff] }
 0x571   :  { %v7168_v2 = vcombine.low %v3468_v55, %v3472_v56 }
 0x572   :  { %5063 = vmatpush1.bf16.msra.mxu0 %v7104_v37  ;;  %v7162_v37 = vcombine.low %v3461_v49, %v3465_v50  ;;  %v3521_v49 = vld [vmem:[#allocation9 + $0x778] sm:$0xff] }
 0x573   :  { %5149 = vmatpush1.bf16.msra.mxu1 %v7106_v61  ;;  %5075 = vmatprep.subr.bf16.mxu0 %v7113_v24  ;;  %v7169_v61 = vcombine.high %v3468_v55, %v3472_v56  ;;  %v7171_v24 = vcombine.high %v3469_v57, %v3473_v58  ;;  %v3528_v55 = vld [vmem:[#allocation9 + $0x7b0] sm:$0xff]  ;;  %v3525_v56 = vld [vmem:[#allocation9 + $0x798] sm:$0xff] }
 0x574   :  { %5161 = vmatprep.subr.bf16.mxu1 %v7115_v62  ;;  %v3476_v62 = vld [vmem:[#allocation9 + $0x610] sm:$0xff]  ;;  %v3529_v57 = vld [vmem:[#allocation9 + $0x7b8] sm:$0xff] }
 0x575   :  { %5065 = vmatmul.mubr.bf16.vlgmr.msra.gmra.mrb[20].mxu0 %v8894_v23 }
 0x576   :  { %5151 = vmatmul.mubr.bf16.vlgmr.msra.gmra.mrb[20].mxu1 %v8894_v23  ;;  %5076 = vmatpush1.bf16.msra.mxu0 %v7112_v1  ;;  %v7130_v23 = vcombine.low %v3429_v8, %v3433_v59  ;;  %v3481_v1 = vld [vmem:[#allocation9 + $0x638] sm:$0xff]  ;;  %v7176_v59 = vcombine.low %v3476_v62, %v3480_v63 }
 0x577   :  { %5107 = vmatprep.mubr.bf16.mxu0 %v8900_v30  ;;  %5162 = vmatpush1.bf16.msra.mxu1 %v7114_v4  ;;  %v7177_v4 = vcombine.high %v3476_v62, %v3480_v63  ;;  %v3489_v8 = vld [vmem:[#allocation9 + $0x678] sm:$0xff]  ;;  %v3536_v62 = vld [vmem:[#allocation9 + $0x7f0] sm:$0xff] }
 0x578   :  { %5193 = vmatprep.mubr.bf16.mxu1 %v8900_v30  ;;  %5077 = vmatprep.subr.bf16.mxu0 %v7121_v5  ;;  %v7136_v30 = vcombine.low %v3436_v13, %v3440_v16  ;;  %v7179_v5 = vcombine.high %v3477_v0, %v3481_v1  ;;  %v3496_v13 = vld [vmem:[#allocation9 + $0x6b0] sm:$0xff]  ;;  %v3493_v16 = vld [vmem:[#allocation9 + $0x698] sm:$0xff] }
 0x579   :  { %5163 = vmatprep.subr.bf16.mxu1 %v7123_v7  ;;  %v3485_v7 = vld [vmem:[#allocation9 + $0x658] sm:$0xff] }
 0x57a   :  { %5078 = vmatpush1.bf16.msra.mxu0 %v7120_v9  ;;  %v7178_v9 = vcombine.low %v3477_v0, %v3481_v1  ;;  %v3533_v63 = vld [vmem:[#allocation9 + $0x7d8] sm:$0xff] }
 0x57b   :  { %5164 = vmatpush1.bf16.msra.mxu1 %v7122_v10  ;;  %5079 = vmatprep.subr.bf16.mxu0 %v7129_v11  ;;  %v7185_v10 = vcombine.high %v3484_v6, %v3488_v29  ;;  %v7187_v11 = vcombine.high %v3485_v7, %v3489_v8  ;;  %v3537_v0 = vld [vmem:[#allocation9 + $0x7f8] sm:$0xff]  ;;  %v8148_v29 = vld [vmem:[#allocation10 + $0x4] ss:$8 sps:$4 sm:$0xff]  }
 0x57c   :  { %5165 = vmatprep.subr.bf16.mxu1 %v7131_v12  ;;  %v3492_v12 = vld [vmem:[#allocation9 + $0x690] sm:$0xff]  ;;  %v7234_v6 = vcombine.low %v3533_v63, %v3537_v0 }
 0x57d   :  { %v7192_v34 = vcombine.low %v3492_v12, %v3496_v13 }
 0x57e   :  { %5080 = vmatpush1.bf16.msra.mxu0 %v7128_v26  ;;  %v7186_v26 = vcombine.low %v3485_v7, %v3489_v8  ;;  %v8146_v7 = vld [vmem:[#allocation10] ss:$8 sps:$4 sm:$0xff]   ;;  %v8151_v8 = vld [vmem:[#allocation10 + $0x14] ss:$8 sps:$4 sm:$0xff]  }
 0x57f   :  { %5166 = vmatpush1.bf16.msra.mxu1 %v7130_v23  ;;  %5081 = vmatprep.subr.bf16.mxu0 %v7137_v27  ;;  %v7193_v23 = vcombine.high %v3492_v12, %v3496_v13  ;;  %v7195_v27 = vcombine.high %v3493_v16, %v3497_v19  ;;  %v8155_v12 = vld [vmem:[#allocation10 + $0x30] ss:$8 sps:$4 sm:$0xff]   ;;  %v8160_v13 = vld [vmem:[#allocation10 + $0x44] ss:$8 sps:$4 sm:$0xff]  }
 0x580   :  { %5167 = vmatprep.subr.bf16.mxu1 %v7139_v28  ;;  %v3500_v28 = vld [vmem:[#allocation9 + $0x6d0] sm:$0xff] }
 0x581   :  { %v7200_v42 = vcombine.low %v3500_v28, %v3504_v31 }
 0x582   :  { %5082 = vmatpush1.bf16.msra.mxu0 %v7136_v30  ;;  %v7194_v30 = vcombine.low %v3493_v16, %v3497_v19  ;;  %v8158_v16 = vld [vmem:[#allocation10 + $0x40] ss:$8 sps:$4 sm:$0xff]   ;;  %v8163_v19 = vld [vmem:[#allocation10 + $0x54] ss:$8 sps:$4 sm:$0xff]  }
 0x583   :  { %5168 = vmatpush1.bf16.msra.mxu1 %v7138_v35  ;;  %5083 = vmatprep.subr.bf16.mxu0 %v7145_v36  ;;  %v7201_v35 = vcombine.high %v3500_v28, %v3504_v31  ;;  %v7203_v36 = vcombine.high %v3501_v32, %v3505_v33  ;;  %v8172_v28 = vld [vmem:[#allocation10 + $0x84] ss:$8 sps:$4 sm:$0xff]   ;;  %v8170_v31 = vld [vmem:[#allocation10 + $0x80] ss:$8 sps:$4 sm:$0xff]  }
 0x584   :  { %5169 = vmatprep.subr.bf16.mxu1 %v7147_v38  ;;  %v3508_v38 = vld [vmem:[#allocation9 + $0x710] sm:$0xff] }
 0x585   :  { %v7208_v50 = vcombine.low %v3508_v38, %v3512_v39 }
 0x586   :  { %5084 = vmatpush1.bf16.msra.mxu0 %v7144_v43  ;;  %v7202_v43 = vcombine.low %v3501_v32, %v3505_v33  ;;  %v8175_v32 = vld [vmem:[#allocation10 + $0x94] ss:$8 sps:$4 sm:$0xff]   ;;  %v8173_v33 = vld [vmem:[#allocation10 + $0x90] ss:$8 sps:$4 sm:$0xff]  }
 0x587   :  { %5170 = vmatpush1.bf16.msra.mxu1 %v7146_v44  ;;  %5085 = vmatprep.subr.bf16.mxu0 %v7153_v45  ;;  %v7209_v44 = vcombine.high %v3508_v38, %v3512_v39  ;;  %v7211_v45 = vcombine.high %v3509_v40, %v3513_v41  ;;  %v8184_v38 = vld [vmem:[#allocation10 + $0xc4] ss:$8 sps:$4 sm:$0xff]   ;;  %v8182_v39 = vld [vmem:[#allocation10 + $0xc0] ss:$8 sps:$4 sm:$0xff]  }
 0x588   :  { %5171 = vmatprep.subr.bf16.mxu1 %v7155_v46  ;;  %v3516_v46 = vld [vmem:[#allocation9 + $0x750] sm:$0xff] }
 0x589   :  { %v7216_v58 = vcombine.low %v3516_v46, %v3520_v47 }
 0x58a   :  { %5086 = vmatpush1.bf16.msra.mxu0 %v7152_v51  ;;  %v7210_v51 = vcombine.low %v3509_v40, %v3513_v41  ;;  %v8187_v40 = vld [vmem:[#allocation10 + $0xd4] ss:$8 sps:$4 sm:$0xff]   ;;  %v8185_v41 = vld [vmem:[#allocation10 + $0xd0] ss:$8 sps:$4 sm:$0xff]  }
 0x58b   :  { %5172 = vmatpush1.bf16.msra.mxu1 %v7154_v52  ;;  %5087 = vmatprep.subr.bf16.mxu0 %v7161_v53  ;;  %v7217_v52 = vcombine.high %v3516_v46, %v3520_v47  ;;  %v7219_v53 = vcombine.high %v3517_v48, %v3521_v49  ;;  %v8196_v46 = vld [vmem:[#allocation10 + $0x104] ss:$8 sps:$4 sm:$0xff]  }
 0x58c   :  { %5173 = vmatprep.subr.bf16.mxu1 %v7163_v54  ;;  %v3524_v54 = vld [vmem:[#allocation9 + $0x790] sm:$0xff]  ;;  %v8921_v47 = vld [vmem:[%s8984_s10] sm:$0xff] }
 0x58d   :  { %v7224_v1 = vcombine.low %v3524_v54, %v3528_v55 }
 0x58e   :  { %5088 = vmatpush1.bf16.msra.mxu0 %v7160_v60  ;;  %v7218_v60 = vcombine.low %v3517_v48, %v3521_v49  ;;  %v3543_v48 = vrot.slane %v8921_v47, %v8846_v17  ;;  %v3551_v49 = vrot.slane %v8921_v47, %v8853_v20 }
 0x58f   :  { %5174 = vmatpush1.bf16.msra.mxu1 %v7162_v37  ;;  %5089 = vmatprep.subr.bf16.mxu0 %v7169_v61  ;;  %v7225_v37 = vcombine.high %v3524_v54, %v3528_v55  ;;  %v7227_v61 = vcombine.high %v3525_v56, %v3529_v57 }
 0x590   :  { %5175 = vmatprep.subr.bf16.mxu1 %v7171_v24  ;;  %v3532_v24 = vld [vmem:[#allocation9 + $0x7d0] sm:$0xff] }
 0x592   :  { %5090 = vmatpush1.bf16.msra.mxu0 %v7168_v2  ;;  %v7226_v2 = vcombine.low %v3525_v56, %v3529_v57 }
 0x593   :  { %5176 = vmatpush1.bf16.msra.mxu1 %v7170_v3  ;;  %5091 = vmatprep.subr.bf16.mxu0 %v7177_v4  ;;  %v7233_v3 = vcombine.high %v3532_v24, %v3536_v62  ;;  %v7235_v4 = vcombine.high %v3533_v63, %v3537_v0 }
 0x594   :  { %5177 = vmatprep.subr.bf16.mxu1 %v7179_v5  ;;  %v7232_v5 = vcombine.low %v3532_v24, %v3536_v62 }
 0x596   :  { %5092 = vmatpush1.bf16.msra.mxu0 %v7176_v59  ;;  %v8149_v59 = vld [vmem:[#allocation10 + $0x10] ss:$8 sps:$4 sm:$0xff]  }
 0x597   :  { %5178 = vmatpush1.bf16.msra.mxu1 %v7178_v9  ;;  %5093 = vmatprep.subr.bf16.mxu0 %v7185_v10  ;;  %v8154_v9 = vld [vmem:[#allocation10 + $0x24] ss:$8 sps:$4 sm:$0xff]   ;;  %v8152_v10 = vld [vmem:[#allocation10 + $0x20] ss:$8 sps:$4 sm:$0xff]  }
 0x598   :  { %5179 = vmatprep.subr.bf16.mxu1 %v7187_v11  ;;  %v8157_v11 = vld [vmem:[#allocation10 + $0x34] ss:$8 sps:$4 sm:$0xff]  }
 0x59a   :  { %5094 = vmatpush1.bf16.msra.mxu0 %v7184_v22  ;;  %v8161_v22 = vld [vmem:[#allocation10 + $0x50] ss:$8 sps:$4 sm:$0xff]  }
 0x59b   :  { %5180 = vmatpush1.bf16.msra.mxu1 %v7186_v26  ;;  %5095 = vmatprep.subr.bf16.mxu0 %v7193_v23  ;;  %v8164_v26 = vld [vmem:[#allocation10 + $0x60] ss:$8 sps:$4 sm:$0xff]   ;;  %v8169_v23 = vld [vmem:[#allocation10 + $0x74] ss:$8 sps:$4 sm:$0xff]  }
 0x59c   :  { %5181 = vmatprep.subr.bf16.mxu1 %v7195_v27  ;;  %v8167_v27 = vld [vmem:[#allocation10 + $0x70] ss:$8 sps:$4 sm:$0xff]  }
 0x59e   :  { %5096 = vmatpush1.bf16.msra.mxu0 %v7192_v34  ;;  %v8178_v34 = vld [vmem:[#allocation10 + $0xa4] ss:$8 sps:$4 sm:$0xff]  }
 0x59f   :  { %5182 = vmatpush1.bf16.msra.mxu1 %v7194_v30  ;;  %5097 = vmatprep.subr.bf16.mxu0 %v7201_v35  ;;  %v8176_v30 = vld [vmem:[#allocation10 + $0xa0] ss:$8 sps:$4 sm:$0xff]   ;;  %v8181_v35 = vld [vmem:[#allocation10 + $0xb4] ss:$8 sps:$4 sm:$0xff]  }
 0x5a0   :  { %5183 = vmatprep.subr.bf16.mxu1 %v7203_v36  ;;  %v8179_v36 = vld [vmem:[#allocation10 + $0xb0] ss:$8 sps:$4 sm:$0xff]  }
 0x5a2   :  { %5098 = vmatpush1.bf16.msra.mxu0 %v7200_v42  ;;  %v8190_v42 = vld [vmem:[#allocation10 + $0xe4] ss:$8 sps:$4 sm:$0xff]  }
 0x5a3   :  { %5184 = vmatpush1.bf16.msra.mxu1 %v7202_v43  ;;  %5099 = vmatprep.subr.bf16.mxu0 %v7209_v44  ;;  %v8188_v43 = vld [vmem:[#allocation10 + $0xe0] ss:$8 sps:$4 sm:$0xff]   ;;  %v8193_v44 = vld [vmem:[#allocation10 + $0xf4] ss:$8 sps:$4 sm:$0xff]  }
 0x5a4   :  { %5185 = vmatprep.subr.bf16.mxu1 %v7211_v45  ;;  %v8191_v45 = vld [vmem:[#allocation10 + $0xf0] ss:$8 sps:$4 sm:$0xff]  }
 0x5a6   :  { %5100 = vmatpush1.bf16.msra.mxu0 %v7208_v50  ;;  %v3547_v50 = vrot.slane %v8921_v47, %v8849_v18 }
 0x5a7   :  { %5186 = vmatpush1.bf16.msra.mxu1 %v7210_v51  ;;  %5101 = vmatprep.subr.bf16.mxu0 %v7217_v52  ;;  %v3555_v51 = vrot.slane %v8921_v47, %v8856_v21 }
 0x5a8   :  { %5187 = vmatprep.subr.bf16.mxu1 %v7219_v53 }
 0x5aa   :  { %5102 = vmatpush1.bf16.msra.mxu0 %v7216_v58 }
 0x5ab   :  { %5188 = vmatpush1.bf16.msra.mxu1 %v7218_v60  ;;  %5103 = vmatprep.subr.bf16.mxu0 %v7225_v37 }
 0x5ac   :  { %5189 = vmatprep.subr.bf16.mxu1 %v7227_v61 }
 0x5ae   :  { %5104 = vmatpush1.bf16.msra.mxu0 %v7224_v1 }
 0x5af   :  { %5190 = vmatpush1.bf16.msra.mxu1 %v7226_v2  ;;  %5105 = vmatprep.subr.bf16.mxu0 %v7233_v3 }
 0x5b0   :  { %5191 = vmatprep.subr.bf16.mxu1 %v7235_v4 }
 0x5b2   :  { %5106 = vmatpush1.bf16.msra.mxu0 %v7232_v5 }
 0x5b3   :  { %5192 = vmatpush1.bf16.msra.mxu1 %v7234_v6  ;;  %5624 = vmatprep.subr.bf16.mxu0 %v8148_v29 }
 0x5b5   :  { %5108 = vmatmul.mubr.bf16.vlgmr.msra.gmra.mrb[20].mxu0 %v8896_v25 }
 0x5b6   :  { %5194 = vmatmul.mubr.bf16.vlgmr.msra.gmra.mrb[20].mxu1 %v8896_v25  ;;  %5625 = vmatpush1.bf16.msra.mxu0 %v8146_v7  ;;  %v8166_v25 = vld [vmem:[#allocation10 + $0x64] ss:$8 sps:$4 sm:$0xff]  }
 0x5b7   :  { %5626 = vmatprep.subr.bf16.mxu0 %v8151_v8 }
 0x5ba   :  { %5627 = vmatpush1.bf16.msra.mxu0 %v8149_v59 }
 0x5bb   :  { %5628 = vmatprep.subr.bf16.mxu0 %v8154_v9 }
 0x5be   :  { %5629 = vmatpush1.bf16.msra.mxu0 %v8152_v10 }
 0x5bf   :  { %5630 = vmatprep.subr.bf16.mxu0 %v8157_v11  ;;  %v8194_v11 = vld [vmem:[#allocation10 + $0x100] ss:$8 sps:$4 sm:$0xff]  }
 0x5c2   :  { %5631 = vmatpush1.bf16.msra.mxu0 %v8155_v12  ;;  %v8199_v12 = vld [vmem:[#allocation10 + $0x114] ss:$8 sps:$4 sm:$0xff]  }
 0x5c3   :  { %5632 = vmatprep.subr.bf16.mxu0 %v8160_v13  ;;  %v8242_v13 = vld [vmem:[#allocation12 + $0x40] sm:$0xff]  }
 0x5c4   :  { %7400 = vmatprep.subr.bf16.mxu1 %v8242_v13 }
 0x5c6   :  { %5633 = vmatpush1.bf16.msra.mxu0 %v8158_v16  ;;  %v8243_v16 = vld [vmem:[#allocation12] sm:$0xff]  }
 0x5c7   :  { %5634 = vmatprep.subr.bf16.mxu0 %v8163_v19  ;;  %v8244_v19 = vld [vmem:[#allocation12 + $0x48] sm:$0xff]   ;;  %7401 = vmatpush3.bf16.msra.mxu1 %v8243_v16 }
 0x5c8   :  { %7402 = vmatprep.subr.bf16.mxu1 %v8244_v19 }
 0x5ca   :  { %5635 = vmatpush1.bf16.msra.mxu0 %v8161_v22  ;;  %v8197_v22 = vld [vmem:[#allocation10 + $0x110] ss:$8 sps:$4 sm:$0xff]  }
 0x5cb   :  { %5636 = vmatprep.subr.bf16.mxu0 %v8166_v25  ;;  %v8202_v25 = vld [vmem:[#allocation10 + $0x124] ss:$8 sps:$4 sm:$0xff]  }
 0x5ce   :  { %5637 = vmatpush1.bf16.msra.mxu0 %v8164_v26  ;;  %v8245_v26 = vld [vmem:[#allocation12 + $0x8] sm:$0xff]  }
 0x5cf   :  { %5638 = vmatprep.subr.bf16.mxu0 %v8169_v23  ;;  %v8246_v23 = vld [vmem:[#allocation12 + $0x50] sm:$0xff]   ;;  %7403 = vmatpush3.bf16.msra.mxu1 %v8245_v26 }
 0x5d0   :  { %7404 = vmatprep.subr.bf16.mxu1 %v8246_v23 }
 0x5d2   :  { %5639 = vmatpush1.bf16.msra.mxu0 %v8167_v27  ;;  %v8200_v27 = vld [vmem:[#allocation10 + $0x120] ss:$8 sps:$4 sm:$0xff]  }
 0x5d3   :  { %5640 = vmatprep.subr.bf16.mxu0 %v8172_v28  ;;  %v8205_v28 = vld [vmem:[#allocation10 + $0x134] ss:$8 sps:$4 sm:$0xff]  }
 0x5d6   :  { %5641 = vmatpush1.bf16.msra.mxu0 %v8170_v31  ;;  %v8247_v31 = vld [vmem:[#allocation12 + $0x10] sm:$0xff]  }
 0x5d7   :  { %5642 = vmatprep.subr.bf16.mxu0 %v8175_v32  ;;  %v8248_v32 = vld [vmem:[#allocation12 + $0x58] sm:$0xff]   ;;  %7405 = vmatpush3.bf16.msra.mxu1 %v8247_v31 }
 0x5d8   :  { %7406 = vmatprep.subr.bf16.mxu1 %v8248_v32 }
 0x5da   :  { %5643 = vmatpush1.bf16.msra.mxu0 %v8173_v33  ;;  %v8203_v33 = vld [vmem:[#allocation10 + $0x130] ss:$8 sps:$4 sm:$0xff]  }
 0x5db   :  { %5644 = vmatprep.subr.bf16.mxu0 %v8178_v34  ;;  %v8208_v34 = vld [vmem:[#allocation10 + $0x144] ss:$8 sps:$4 sm:$0xff]  }
 0x5de   :  { %5645 = vmatpush1.bf16.msra.mxu0 %v8176_v30  ;;  %v8249_v30 = vld [vmem:[#allocation12 + $0x18] sm:$0xff]  }
 0x5df   :  { %5646 = vmatprep.subr.bf16.mxu0 %v8181_v35  ;;  %v8250_v35 = vld [vmem:[#allocation12 + $0x60] sm:$0xff]   ;;  %7407 = vmatpush3.bf16.msra.mxu1 %v8249_v30 }
 0x5e0   :  { %7408 = vmatprep.subr.bf16.mxu1 %v8250_v35 }
 0x5e2   :  { %5647 = vmatpush1.bf16.msra.mxu0 %v8179_v36  ;;  %v8206_v36 = vld [vmem:[#allocation10 + $0x140] ss:$8 sps:$4 sm:$0xff]  }
 0x5e3   :  { %5648 = vmatprep.subr.bf16.mxu0 %v8184_v38  ;;  %v8211_v38 = vld [vmem:[#allocation10 + $0x154] ss:$8 sps:$4 sm:$0xff]  }
 0x5e6   :  { %5649 = vmatpush1.bf16.msra.mxu0 %v8182_v39  ;;  %v8251_v39 = vld [vmem:[#allocation12 + $0x20] sm:$0xff]  }
 0x5e7   :  { %5650 = vmatprep.subr.bf16.mxu0 %v8187_v40  ;;  %v8252_v40 = vld [vmem:[#allocation12 + $0x68] sm:$0xff]   ;;  %7409 = vmatpush3.bf16.msra.mxu1 %v8251_v39  ;;  %v8255_v39 = vld [vmem:[#allocation12 + $0x30] sm:$0xff]  }
 0x5e8   :  { %7410 = vmatprep.subr.bf16.mxu1 %v8252_v40  ;;  %v8256_v40 = vld [vmem:[#allocation12 + $0x78] sm:$0xff]  }
 0x5ea   :  { %5651 = vmatpush1.bf16.msra.mxu0 %v8185_v41  ;;  %v8209_v41 = vld [vmem:[#allocation10 + $0x150] ss:$8 sps:$4 sm:$0xff]  }
 0x5eb   :  { %5652 = vmatprep.subr.bf16.mxu0 %v8190_v42  ;;  %v8214_v42 = vld [vmem:[#allocation10 + $0x164] ss:$8 sps:$4 sm:$0xff]  }
 0x5ee   :  { %5653 = vmatpush1.bf16.msra.mxu0 %v8188_v43  ;;  %v8253_v43 = vld [vmem:[#allocation12 + $0x28] sm:$0xff]  }
 0x5ef   :  { %5654 = vmatprep.subr.bf16.mxu0 %v8193_v44  ;;  %v8212_v44 = vld [vmem:[#allocation10 + $0x160] ss:$8 sps:$4 sm:$0xff]   ;;  %7411 = vmatpush3.bf16.msra.mxu1 %v8253_v43 }
 0x5f0   :  { %v5292_v43 = vld [vmem:[%s8986_s12] sm:$0x3] }
 0x5f2   :  { %5655 = vmatpush1.bf16.msra.mxu0 %v8191_v45  ;;  %v8217_v45 = vld [vmem:[#allocation10 + $0x174] ss:$8 sps:$4 sm:$0xff]  }
 0x5f3   :  { %5667 = vmatprep.subr.bf16.mxu0 %v8196_v46  ;;  %v8215_v46 = vld [vmem:[#allocation10 + $0x170] ss:$8 sps:$4 sm:$0xff]  }
 0x608   :  { %v4937_v52 = vpop.f32.mrb[16].mxu0  ;;  %v5023_v53 = vpop.f32.mrb[16].mxu1 }
 0x609   :  { %v7468_v54 = vadd.f32 %v4937_v52, %v3543_v48  ;;  %v7472_v55 = vadd.f32 %v5023_v53, %v3551_v49  ;;  %v4939_v56 = vpop.f32.mrb[17].mxu0  ;;  %v5025_v57 = vpop.f32.mrb[17].mxu1  ;;  %v8226_v52 = vld [vmem:[#allocation10 + $0x1a4] ss:$8 sps:$4 sm:$0xff]   ;;  %v8224_v53 = vld [vmem:[#allocation10 + $0x1a0] ss:$8 sps:$4 sm:$0xff]  }
 0x60a   :  { %v7469_v58 = vadd.f32 %v4939_v56, %v3547_v50  ;;  %v7473_v60 = vadd.f32 %v5025_v57, %v3555_v51  ;;  %v4941_v37 = vpop.f32.mrb[18].mxu0  ;;  %v5027_v61 = vpop.f32.mrb[18].mxu1  ;;  %v8232_v56 = vld [vmem:[#allocation10 + $0x1c4] ss:$8 sps:$4 sm:$0xff]   ;;  %v8230_v57 = vld [vmem:[#allocation10 + $0x1c0] ss:$8 sps:$4 sm:$0xff]  }
 0x60b   :  { %v7470_v24 = vadd.f32 %v4941_v37, %v3543_v48  ;;  %v7474_v62 = vadd.f32 %v5027_v61, %v3551_v49  ;;  %v4943_v63 = vpop.f32.mrb[19].mxu0  ;;  %v5029_v20 = vpop.f32.mrb[19].mxu1  ;;  %v5204_v2 = vmax.f32 %v7468_v54, 0.0  ;;  %v5206_v3 = vmax.f32 %v7472_v55, 0.0  ;;  %v8220_v48 = vld [vmem:[#allocation10 + $0x184] ss:$8 sps:$4 sm:$0xff]  }
 0x60c   :  { %v7471_v0 = vadd.f32 %v4943_v63, %v3547_v50  ;;  %v7475_v1 = vadd.f32 %v5029_v20, %v3555_v51  ;;  %v5205_v5 = vmax.f32 %v7469_v58, 0.0  ;;  %v5207_v6 = vmax.f32 %v7473_v60, 0.0  ;;  %v8218_v49 = vld [vmem:[#allocation10 + $0x180] ss:$8 sps:$4 sm:$0xff]   ;;  %v8223_v50 = vld [vmem:[#allocation10 + $0x194] ss:$8 sps:$4 sm:$0xff]  }
 0x60d   :  { %v5212_v4 = vmax.f32 %v7470_v24, 0.0  ;;  %v5214_v21 = vmax.f32 %v7474_v62, 0.0  ;;  %v8221_v51 = vld [vmem:[#allocation10 + $0x190] ss:$8 sps:$4 sm:$0xff]   ;;  %v8229_v54 = vld [vmem:[#allocation10 + $0x1b4] ss:$8 sps:$4 sm:$0xff]  }
 0x60e   :  { %v5213_v29 = vmax.f32 %v7471_v0, 0.0  ;;  %v5215_v7 = vmax.f32 %v7475_v1, 0.0  ;;  %v8227_v55 = vld [vmem:[#allocation10 + $0x1b0] ss:$8 sps:$4 sm:$0xff]   ;;  %v8235_v58 = vld [vmem:[#allocation10 + $0x1d4] ss:$8 sps:$4 sm:$0xff]  }
 0x60f   :  { %v5220_v8 = vpack.c.bf16 %v5212_v4, %v5204_v2  ;;  %v8931_v59 = vpack.c.bf16 %v5214_v21, %v5206_v3  ;;  %v8233_v60 = vld [vmem:[#allocation10 + $0x1d0] ss:$8 sps:$4 sm:$0xff]   ;;  %v8238_v37 = vld [vmem:[#allocation10 + $0x1e4] ss:$8 sps:$4 sm:$0xff]   ;;  %v8236_v61 = vld [vmem:[#allocation10 + $0x1e0] ss:$8 sps:$4 sm:$0xff]  }
 0x610   :  { %v5221_v9 = vpack.c.bf16 %v5213_v29, %v5205_v5  ;;  %v5223_v10 = vpack.c.bf16 %v5215_v7, %v5207_v6  ;;  %v8241_v24 = vld [vmem:[#allocation10 + $0x1f4] ss:$8 sps:$4 sm:$0xff]   ;;  %v8239_v62 = vld [vmem:[#allocation10 + $0x1f0] ss:$8 sps:$4 sm:$0xff]   ;;  %v3558_v63 = vsub.s32 4, %v8840_v15  ;;  %v3566_v20 = vsub.s32 6, %v8840_v15 }
 0x611   :  { %v3562_v0 = vsub.s32 5, %v8840_v15  ;;  %v3570_v1 = vsub.s32 7, %v8840_v15 }
 0x612   :  { %5656 = vmatprep.mubr.bf16.mxu0 %v5221_v9  ;;  %v3559_v2 = vrot.slane %v8921_v47, %v3558_v63  ;;  %v3567_v3 = vrot.slane %v8921_v47, %v3566_v20  ;;  %v8266_v63 = vld [vmem:[#allocation13 + $0x24] ss:$8 sps:$4 sm:$0xff]   ;;  %v8264_v20 = vld [vmem:[#allocation13 + $0x20] ss:$8 sps:$4 sm:$0xff]  }
 0x613   :  { %5657 = vmatmul.mubr.bf16.vlgmr.msra.gmra.mrb[24].mxu0 %v5220_v8  ;;  %v3563_v4 = vrot.slane %v8921_v47, %v3562_v0  ;;  %v3571_v21 = vrot.slane %v8921_v47, %v3570_v1  ;;  %v8269_v0 = vld [vmem:[#allocation13 + $0x34] ss:$8 sps:$4 sm:$0xff]   ;;  %v8267_v1 = vld [vmem:[#allocation13 + $0x30] ss:$8 sps:$4 sm:$0xff]  }
 0x614   :  { %5668 = vmatpush1.bf16.msra.mxu0 %v8194_v11  ;;  %5699 = vmatprep.mubr.bf16.mxu0 %v5223_v10 }
 0x615   :  { %5669 = vmatprep.subr.bf16.mxu0 %v8199_v12 }
 0x618   :  { %5670 = vmatpush1.bf16.msra.mxu0 %v8197_v22 }
 0x619   :  { %5671 = vmatprep.subr.bf16.mxu0 %v8202_v25 }
 0x61c   :  { %5672 = vmatpush1.bf16.msra.mxu0 %v8200_v27 }
 0x61d   :  { %5673 = vmatprep.subr.bf16.mxu0 %v8205_v28 }
 0x620   :  { %5674 = vmatpush1.bf16.msra.mxu0 %v8203_v33 }
 0x621   :  { %5675 = vmatprep.subr.bf16.mxu0 %v8208_v34 }
 0x624   :  { %5676 = vmatpush1.bf16.msra.mxu0 %v8206_v36 }
 0x625   :  { %5677 = vmatprep.subr.bf16.mxu0 %v8211_v38  ;;  %v8254_v38 = vld [vmem:[#allocation12 + $0x70] sm:$0xff]  }
 0x626   :  { %7412 = vmatprep.subr.bf16.mxu1 %v8254_v38  ;;  %v8312_v38 = vld [vmem:[#allocation13 + $0x120] ss:$8 sps:$4 sm:$0xff]  }
 0x627   :  { %7413 = vmatpush3.bf16.msra.mxu1 %v8255_v39  ;;  %v8317_v39 = vld [vmem:[#allocation13 + $0x134] ss:$8 sps:$4 sm:$0xff]  }
 0x628   :  { %5678 = vmatpush1.bf16.msra.mxu0 %v8209_v41  ;;  %v8257_v41 = vld [vmem:[#allocation12 + $0x38] sm:$0xff]   ;;  %7414 = vmatprep.subr.bf16.mxu1 %v8256_v40 }
 0x629   :  { %5679 = vmatprep.subr.bf16.mxu0 %v8214_v42  ;;  %v8260_v42 = vld [vmem:[#allocation13 + $0x4] ss:$8 sps:$4 sm:$0xff]   ;;  %v8315_v40 = vld [vmem:[#allocation13 + $0x130] ss:$8 sps:$4 sm:$0xff]  }
 0x62b   :  { %7415 = vmatpush3.bf16.msra.mxu1 %v8257_v41  ;;  %v8320_v41 = vld [vmem:[#allocation13 + $0x144] ss:$8 sps:$4 sm:$0xff]  }
 0x62c   :  { %5680 = vmatpush1.bf16.msra.mxu0 %v8212_v44  ;;  %6288 = vmatprep.subr.bf16.mxu1 %v8260_v42  ;;  %v5297_v44 = vrot.slane %v5292_v43, %v8846_v17  ;;  %v8318_v42 = vld [vmem:[#allocation13 + $0x140] ss:$8 sps:$4 sm:$0xff]  }
 0x62d   :  { %5681 = vmatprep.subr.bf16.mxu0 %v8217_v45  ;;  %v5301_v45 = vrot.slane %v5292_v43, %v8849_v18  ;;  %v8323_v43 = vld [vmem:[#allocation13 + $0x154] ss:$8 sps:$4 sm:$0xff]  }
 0x630   :  { %5682 = vmatpush1.bf16.msra.mxu0 %v8215_v46 }
 0x631   :  { %5683 = vmatprep.subr.bf16.mxu0 %v8220_v48 }
 0x634   :  { %5684 = vmatpush1.bf16.msra.mxu0 %v8218_v49 }
 0x635   :  { %5685 = vmatprep.subr.bf16.mxu0 %v8223_v50 }
 0x638   :  { %5686 = vmatpush1.bf16.msra.mxu0 %v8221_v51 }
 0x639   :  { %5687 = vmatprep.subr.bf16.mxu0 %v8226_v52 }
 0x63c   :  { %5688 = vmatpush1.bf16.msra.mxu0 %v8224_v53 }
 0x63d   :  { %5689 = vmatprep.subr.bf16.mxu0 %v8229_v54 }
 0x640   :  { %5690 = vmatpush1.bf16.msra.mxu0 %v8227_v55 }
 0x641   :  { %5691 = vmatprep.subr.bf16.mxu0 %v8232_v56 }
 0x644   :  { %5692 = vmatpush1.bf16.msra.mxu0 %v8230_v57 }
 0x645   :  { %5693 = vmatprep.subr.bf16.mxu0 %v8235_v58 }
 0x648   :  { %5694 = vmatpush1.bf16.msra.mxu0 %v8233_v60 }
 0x649   :  { %5695 = vmatprep.subr.bf16.mxu0 %v8238_v37 }
 0x64c   :  { %5696 = vmatpush1.bf16.msra.mxu0 %v8236_v61  ;;  %v8258_v61 = vld [vmem:[#allocation13] ss:$8 sps:$4 sm:$0xff]  }
 0x64d   :  { %5697 = vmatprep.subr.bf16.mxu0 %v8241_v24  ;;  %v8263_v24 = vld [vmem:[#allocation13 + $0x14] ss:$8 sps:$4 sm:$0xff]  }
 0x650   :  { %5698 = vmatpush1.bf16.msra.mxu0 %v8239_v62  ;;  %v8261_v62 = vld [vmem:[#allocation13 + $0x10] ss:$8 sps:$4 sm:$0xff]  }
 0x653   :  { %5700 = vmatmul.mubr.bf16.vlgmr.msra.gmra.mrb[24].mxu0 %v8931_v59 }
 0x688   :  { %v5109_v5 = vpop.f32.mrb[20].mxu0 }
 0x689   :  { %v7476_v6 = vadd.f32 %v5109_v5, %v3559_v2  ;;  %v5195_v29 = vpop.f32.mrb[20].mxu1  ;;  %v5111_v7 = vpop.f32.mrb[21].mxu0  ;;  %v8278_v5 = vld [vmem:[#allocation13 + $0x64] ss:$8 sps:$4 sm:$0xff]  }
 0x68a   :  { %v7480_v8 = vadd.f32 %v5195_v29, %v3567_v3  ;;  %v7477_v59 = vadd.f32 %v5111_v7, %v3563_v4  ;;  %v5197_v9 = vpop.f32.mrb[21].mxu1  ;;  %v5113_v10 = vpop.f32.mrb[22].mxu0  ;;  %v8281_v29 = vld [vmem:[#allocation13 + $0x74] ss:$8 sps:$4 sm:$0xff]   ;;  %v8279_v7 = vld [vmem:[#allocation13 + $0x70] ss:$8 sps:$4 sm:$0xff]  }
 0x68b   :  { %v7481_v11 = vadd.f32 %v5197_v9, %v3571_v21  ;;  %v7478_v12 = vadd.f32 %v5113_v10, %v3559_v2  ;;  %v5199_v13 = vpop.f32.mrb[22].mxu1  ;;  %v5115_v15 = vpop.f32.mrb[23].mxu0  ;;  %v5208_v25 = vmax.f32 %v7476_v6, 0.0  ;;  %v8272_v2 = vld [vmem:[#allocation13 + $0x44] ss:$8 sps:$4 sm:$0xff]  }
 0x68c   :  { %v7482_v16 = vadd.f32 %v5199_v13, %v3567_v3  ;;  %v7479_v19 = vadd.f32 %v5115_v15, %v3563_v4  ;;  %v5201_v22 = vpop.f32.mrb[23].mxu1  ;;  %v5210_v27 = vmax.f32 %v7480_v8, 0.0  ;;  %v5209_v47 = vmax.f32 %v7477_v59, 0.0  ;;  %v8270_v3 = vld [vmem:[#allocation13 + $0x40] ss:$8 sps:$4 sm:$0xff]  }
 0x68d   :  { %v5216_v26 = vmax.f32 %v7478_v12, 0.0  ;;  %v7483_v23 = vadd.f32 %v5201_v22, %v3571_v21  ;;  %v5211_v32 = vmax.f32 %v7481_v11, 0.0  ;;  %v8275_v4 = vld [vmem:[#allocation13 + $0x54] ss:$8 sps:$4 sm:$0xff]   ;;  %v8273_v21 = vld [vmem:[#allocation13 + $0x50] ss:$8 sps:$4 sm:$0xff]  }
 0x68e   :  { %v5218_v28 = vmax.f32 %v7482_v16, 0.0  ;;  %v5217_v31 = vmax.f32 %v7479_v19, 0.0  ;;  %v8276_v6 = vld [vmem:[#allocation13 + $0x60] ss:$8 sps:$4 sm:$0xff]   ;;  %v8284_v8 = vld [vmem:[#allocation13 + $0x84] ss:$8 sps:$4 sm:$0xff]  }
 0x68f   :  { %v8942_v33 = vpack.c.bf16 %v5216_v26, %v5208_v25  ;;  %v5219_v34 = vmax.f32 %v7483_v23, 0.0  ;;  %v8282_v59 = vld [vmem:[#allocation13 + $0x80] ss:$8 sps:$4 sm:$0xff]   ;;  %v8287_v9 = vld [vmem:[#allocation13 + $0x94] ss:$8 sps:$4 sm:$0xff]  }
 0x690   :  { %v8944_v30 = vpack.c.bf16 %v5218_v28, %v5210_v27  ;;  %v5225_v35 = vpack.c.bf16 %v5217_v31, %v5209_v47  ;;  %v8285_v10 = vld [vmem:[#allocation13 + $0x90] ss:$8 sps:$4 sm:$0xff]   ;;  %v8290_v11 = vld [vmem:[#allocation13 + $0xa4] ss:$8 sps:$4 sm:$0xff]   ;;  %v8288_v12 = vld [vmem:[#allocation13 + $0xa0] ss:$8 sps:$4 sm:$0xff]  }
 0x691   :  { %v8946_v36 = vpack.c.bf16 %v5219_v34, %v5211_v32  ;;  %v8293_v13 = vld [vmem:[#allocation13 + $0xb4] ss:$8 sps:$4 sm:$0xff]   ;;  %v8291_v15 = vld [vmem:[#allocation13 + $0xb0] ss:$8 sps:$4 sm:$0xff]   ;;  %v8296_v16 = vld [vmem:[#allocation13 + $0xc4] ss:$8 sps:$4 sm:$0xff]  }
 0x692   :  { %v8294_v19 = vld [vmem:[#allocation13 + $0xc0] ss:$8 sps:$4 sm:$0xff]   ;;  %v8299_v22 = vld [vmem:[#allocation13 + $0xd4] ss:$8 sps:$4 sm:$0xff]   ;;  %v8297_v25 = vld [vmem:[#allocation13 + $0xd0] ss:$8 sps:$4 sm:$0xff]  }
 0x693   :  { %v8302_v26 = vld [vmem:[#allocation13 + $0xe4] ss:$8 sps:$4 sm:$0xff]   ;;  %v8300_v23 = vld [vmem:[#allocation13 + $0xe0] ss:$8 sps:$4 sm:$0xff]   ;;  %v8305_v27 = vld [vmem:[#allocation13 + $0xf4] ss:$8 sps:$4 sm:$0xff]  }
 0x694   :  { %v8303_v47 = vld [vmem:[#allocation13 + $0xf0] ss:$8 sps:$4 sm:$0xff]   ;;  %v8308_v28 = vld [vmem:[#allocation13 + $0x104] ss:$8 sps:$4 sm:$0xff]   ;;  %v8306_v31 = vld [vmem:[#allocation13 + $0x100] ss:$8 sps:$4 sm:$0xff]  }
 0x695   :  { %v8311_v32 = vld [vmem:[#allocation13 + $0x114] ss:$8 sps:$4 sm:$0xff]   ;;  %v8309_v34 = vld [vmem:[#allocation13 + $0x110] ss:$8 sps:$4 sm:$0xff]  }
 0x726   :  { %v5701_v46 = vpop.f32.mrb[24].mxu0 }
 0x727   :  { %v7484_v48 = vadd.f32 %v5701_v46, %v5297_v44  ;;  %v5703_v49 = vpop.f32.mrb[25].mxu0  ;;  %v8327_v46 = vld [vmem:[#allocation13 + $0x170] ss:$8 sps:$4 sm:$0xff]  }
 0x728   :  { %v7485_v50 = vadd.f32 %v5703_v49, %v5301_v45  ;;  %v5705_v51 = vpop.f32.mrb[26].mxu0  ;;  %v8355_v49 = vld [vmem:[#allocation15] sm:$0xff]  }
 0x729   :  { %v7486_v52 = vadd.f32 %v5705_v51, %v5297_v44  ;;  %v5707_v53 = vpop.f32.mrb[27].mxu0  ;;  %v5710_v55 = vmax.f32 %v7484_v48, 0.0  ;;  %v8326_v44 = vld [vmem:[#allocation13 + $0x164] ss:$8 sps:$4 sm:$0xff]  }
 0x72a   :  { %v7487_v54 = vadd.f32 %v5707_v53, %v5301_v45  ;;  %v5711_v57 = vmax.f32 %v7485_v50, 0.0  ;;  %v8329_v45 = vld [vmem:[#allocation13 + $0x174] ss:$8 sps:$4 sm:$0xff]   ;;  %v8354_v48 = vld [vmem:[#allocation15 + $0x40] sm:$0xff]   ;;  %v8356_v50 = vld [vmem:[#allocation15 + $0x48] sm:$0xff]  }
 0x72b   :  { %v5712_v56 = vmax.f32 %v7486_v52, 0.0  ;;  %v8332_v51 = vld [vmem:[#allocation13 + $0x184] ss:$8 sps:$4 sm:$0xff]   ;;  %7422 = vmatprep.subr.bf16.mxu0 %v8354_v48  ;;  %v8330_v53 = vld [vmem:[#allocation13 + $0x180] ss:$8 sps:$4 sm:$0xff]  }
 0x72c   :  { %v5713_v58 = vmax.f32 %v7487_v54, 0.0  ;;  %7423 = vmatpush3.bf16.msra.mxu0 %v8355_v49  ;;  %v8357_v52 = vld [vmem:[#allocation15 + $0x8] sm:$0xff]   ;;  %v8358_v54 = vld [vmem:[#allocation15 + $0x50] sm:$0xff]  }
 0x72d   :  { %v5714_v60 = vpack.c.bf16 %v5712_v56, %v5710_v55  ;;  %7424 = vmatprep.subr.bf16.mxu0 %v8356_v50  ;;  %v8335_v55 = vld [vmem:[#allocation13 + $0x194] ss:$8 sps:$4 sm:$0xff]  }
 0x72e   :  { %v5715_v37 = vpack.c.bf16 %v5713_v58, %v5711_v57  ;;  %v8359_v56 = vld [vmem:[#allocation15 + $0x10] sm:$0xff]   ;;  %v8360_v58 = vld [vmem:[#allocation15 + $0x58] sm:$0xff]  }
 0x72f   :  { %v8333_v57 = vld [vmem:[#allocation13 + $0x190] ss:$8 sps:$4 sm:$0xff]  }
 0x730   :  { %5883 = vmatprep.mubr.bf16.mxu1 %v5715_v37  ;;  %7425 = vmatpush3.bf16.msra.mxu0 %v8357_v52  ;;  %v8361_v37 = vld [vmem:[#allocation15 + $0x18] sm:$0xff]  }
 0x731   :  { %5884 = vmatmul.mubr.bf16.vlgmr.msra.gmra.mrb[24].mxu1 %v5714_v60  ;;  %7426 = vmatprep.subr.bf16.mxu0 %v8358_v54  ;;  %v8338_v60 = vld [vmem:[#allocation13 + $0x1a4] ss:$8 sps:$4 sm:$0xff]  }
 0x732   :  { %6289 = vmatpush1.bf16.msra.mxu1 %v8258_v61  ;;  %6320 = vmatprep.mubr.bf16.mxu1 %v5225_v35  ;;  %v8314_v35 = vld [vmem:[#allocation13 + $0x124] ss:$8 sps:$4 sm:$0xff]   ;;  %v8336_v61 = vld [vmem:[#allocation13 + $0x1a0] ss:$8 sps:$4 sm:$0xff]  }
 0x733   :  { %6290 = vmatprep.subr.bf16.mxu1 %v8263_v24  ;;  %v8362_v24 = vld [vmem:[#allocation15 + $0x60] sm:$0xff]  }
 0x734   :  { %7427 = vmatpush3.bf16.msra.mxu0 %v8359_v56 }
 0x735   :  { %7428 = vmatprep.subr.bf16.mxu0 %v8360_v58  ;;  %v7300_v58 = vld [vmem:[%s8988_s14] ss:$0 sm:$0xff] }
 0x736   :  { %6291 = vmatpush1.bf16.msra.mxu1 %v8261_v62  ;;  %v8341_v62 = vld [vmem:[#allocation13 + $0x1b4] ss:$8 sps:$4 sm:$0xff]  }
 0x737   :  { %6292 = vmatprep.subr.bf16.mxu1 %v8266_v63  ;;  %v8363_v63 = vld [vmem:[#allocation15 + $0x20] sm:$0xff]  }
 0x738   :  { %7429 = vmatpush3.bf16.msra.mxu0 %v8361_v37 }
 0x739   :  { %7430 = vmatprep.subr.bf16.mxu0 %v8362_v24 }
 0x73a   :  { %6293 = vmatpush1.bf16.msra.mxu1 %v8264_v20  ;;  %v8339_v20 = vld [vmem:[#allocation13 + $0x1b0] ss:$8 sps:$4 sm:$0xff]  }
 0x73b   :  { %6294 = vmatprep.subr.bf16.mxu1 %v8269_v0  ;;  %v8364_v0 = vld [vmem:[#allocation15 + $0x68] sm:$0xff]  }
 0x73c   :  { %7431 = vmatpush3.bf16.msra.mxu0 %v8363_v63 }
 0x73d   :  { %7432 = vmatprep.subr.bf16.mxu0 %v8364_v0 }
 0x73e   :  { %6295 = vmatpush1.bf16.msra.mxu1 %v8267_v1  ;;  %v8344_v1 = vld [vmem:[#allocation13 + $0x1c4] ss:$8 sps:$4 sm:$0xff]  }
 0x73f   :  { %6296 = vmatprep.subr.bf16.mxu1 %v8272_v2  ;;  %v8342_v2 = vld [vmem:[#allocation13 + $0x1c0] ss:$8 sps:$4 sm:$0xff]  }
 0x742   :  { %6297 = vmatpush1.bf16.msra.mxu1 %v8270_v3  ;;  %v8347_v3 = vld [vmem:[#allocation13 + $0x1d4] ss:$8 sps:$4 sm:$0xff]  }
 0x743   :  { %6298 = vmatprep.subr.bf16.mxu1 %v8275_v4  ;;  %v8345_v4 = vld [vmem:[#allocation13 + $0x1d0] ss:$8 sps:$4 sm:$0xff]  }
 0x746   :  { %6299 = vmatpush1.bf16.msra.mxu1 %v8273_v21  ;;  %v8350_v21 = vld [vmem:[#allocation13 + $0x1e4] ss:$8 sps:$4 sm:$0xff]  }
 0x747   :  { %6300 = vmatprep.subr.bf16.mxu1 %v8278_v5  ;;  %v8348_v5 = vld [vmem:[#allocation13 + $0x1e0] ss:$8 sps:$4 sm:$0xff]  }
 0x74a   :  { %6301 = vmatpush1.bf16.msra.mxu1 %v8276_v6  ;;  %v8353_v6 = vld [vmem:[#allocation13 + $0x1f4] ss:$8 sps:$4 sm:$0xff]  }
 0x74b   :  { %6302 = vmatprep.subr.bf16.mxu1 %v8281_v29  ;;  %v8351_v29 = vld [vmem:[#allocation13 + $0x1f0] ss:$8 sps:$4 sm:$0xff]  }
 0x74e   :  { %6303 = vmatpush1.bf16.msra.mxu1 %v8279_v7  ;;  %v8365_v7 = vld [vmem:[#allocation15 + $0x28] sm:$0xff]  }
 0x74f   :  { %6304 = vmatprep.subr.bf16.mxu1 %v8284_v8  ;;  %7433 = vmatpush3.bf16.msra.mxu0 %v8365_v7 }
 0x752   :  { %6305 = vmatpush1.bf16.msra.mxu1 %v8282_v59 }
 0x753   :  { %6306 = vmatprep.subr.bf16.mxu1 %v8287_v9  ;;  %v8366_v9 = vld [vmem:[#allocation15 + $0x70] sm:$0xff]  }
 0x754   :  { %7434 = vmatprep.subr.bf16.mxu0 %v8366_v9 }
 0x756   :  { %6307 = vmatpush1.bf16.msra.mxu1 %v8285_v10 }
 0x757   :  { %6308 = vmatprep.subr.bf16.mxu1 %v8290_v11 }
 0x75a   :  { %6309 = vmatpush1.bf16.msra.mxu1 %v8288_v12  ;;  %v8367_v12 = vld [vmem:[#allocation15 + $0x30] sm:$0xff]  }
 0x75b   :  { %6310 = vmatprep.subr.bf16.mxu1 %v8293_v13  ;;  %7435 = vmatpush3.bf16.msra.mxu0 %v8367_v12 }
 0x75e   :  { %6311 = vmatpush1.bf16.msra.mxu1 %v8291_v15 }
 0x75f   :  { %6312 = vmatprep.subr.bf16.mxu1 %v8296_v16  ;;  %v8368_v16 = vld [vmem:[#allocation15 + $0x78] sm:$0xff]  }
 0x760   :  { %7436 = vmatprep.subr.bf16.mxu0 %v8368_v16 }
 0x762   :  { %6313 = vmatpush1.bf16.msra.mxu1 %v8294_v19  ;;  %v8369_v19 = vld [vmem:[#allocation15 + $0x38] sm:$0xff]  }
 0x763   :  { %6314 = vmatprep.subr.bf16.mxu1 %v8299_v22  ;;  %7437 = vmatpush3.bf16.msra.mxu0 %v8369_v19 }
 0x766   :  { %6315 = vmatpush1.bf16.msra.mxu1 %v8297_v25 }
 0x767   :  { %6316 = vmatprep.subr.bf16.mxu1 %v8302_v26 }
 0x76a   :  { %6317 = vmatpush1.bf16.msra.mxu1 %v8300_v23 }
 0x76b   :  { %6318 = vmatprep.subr.bf16.mxu1 %v8305_v27 }
 0x76e   :  { %6319 = vmatpush1.bf16.msra.mxu1 %v8303_v47 }
 0x76f   :  { %6331 = vmatprep.subr.bf16.mxu1 %v8308_v28 }
 0x771   :  { %6321 = vmatmul.mubr.bf16.vlgmr.msra.gmra.mrb[28].mxu1 %v8942_v33  ;;  %v8321_v33 = vld [vmem:[#allocation13 + $0x150] ss:$8 sps:$4 sm:$0xff]  }
 0x772   :  { %6332 = vmatpush1.bf16.msra.mxu1 %v8306_v31  ;;  %6363 = vmatprep.mubr.bf16.mxu1 %v8946_v36  ;;  %v8324_v36 = vld [vmem:[#allocation13 + $0x160] ss:$8 sps:$4 sm:$0xff]  }
 0x773   :  { %6333 = vmatprep.subr.bf16.mxu1 %v8311_v32 }
 0x776   :  { %6334 = vmatpush1.bf16.msra.mxu1 %v8309_v34 }
 0x777   :  { %6335 = vmatprep.subr.bf16.mxu1 %v8314_v35 }
 0x77a   :  { %6336 = vmatpush1.bf16.msra.mxu1 %v8312_v38 }
 0x77b   :  { %6337 = vmatprep.subr.bf16.mxu1 %v8317_v39 }
 0x77e   :  { %6338 = vmatpush1.bf16.msra.mxu1 %v8315_v40 }
 0x77f   :  { %6339 = vmatprep.subr.bf16.mxu1 %v8320_v41 }
 0x782   :  { %6340 = vmatpush1.bf16.msra.mxu1 %v8318_v42 }
 0x783   :  { %6341 = vmatprep.subr.bf16.mxu1 %v8323_v43 }
 0x786   :  { %6342 = vmatpush1.bf16.msra.mxu1 %v8321_v33 }
 0x787   :  { %6343 = vmatprep.subr.bf16.mxu1 %v8326_v44 }
 0x78a   :  { %6344 = vmatpush1.bf16.msra.mxu1 %v8324_v36 }
 0x78b   :  { %6345 = vmatprep.subr.bf16.mxu1 %v8329_v45 }
 0x78e   :  { %6346 = vmatpush1.bf16.msra.mxu1 %v8327_v46 }
 0x78f   :  { %6347 = vmatprep.subr.bf16.mxu1 %v8332_v51 }
 0x792   :  { %6348 = vmatpush1.bf16.msra.mxu1 %v8330_v53 }
 0x793   :  { %6349 = vmatprep.subr.bf16.mxu1 %v8335_v55 }
 0x796   :  { %6350 = vmatpush1.bf16.msra.mxu1 %v8333_v57  ;;  %v6571_v57 = vand.u32 127, %v198_v14 }
 0x797   :  { %6351 = vmatprep.subr.bf16.mxu1 %v8338_v60 }
 0x798   :  { %vm6572_vm1 = vcmp.eq.s32.totalorder %v6571_v57, 0 }
 0x79a   :  { %6352 = vmatpush1.bf16.msra.mxu1 %v8336_v61 }
 0x79b   :  { %6353 = vmatprep.subr.bf16.mxu1 %v8341_v62 }
 0x79e   :  { %6354 = vmatpush1.bf16.msra.mxu1 %v8339_v20 }
 0x79f   :  { %6355 = vmatprep.subr.bf16.mxu1 %v8344_v1 }
 0x7a2   :  { %6356 = vmatpush1.bf16.msra.mxu1 %v8342_v2 }
 0x7a3   :  { %6357 = vmatprep.subr.bf16.mxu1 %v8347_v3 }
 0x7a6   :  { %6358 = vmatpush1.bf16.msra.mxu1 %v8345_v4 }
 0x7a7   :  { %6359 = vmatprep.subr.bf16.mxu1 %v8350_v21 }
 0x7aa   :  { %6360 = vmatpush1.bf16.msra.mxu1 %v8348_v5 }
 0x7ab   :  { %6361 = vmatprep.subr.bf16.mxu1 %v8353_v6 }
 0x7ae   :  { %6362 = vmatpush1.bf16.msra.mxu1 %v8351_v29 }
 0x7b1   :  { %6364 = vmatmul.mubr.bf16.vlgmr.msra.gmra.mrb[28].mxu1 %v8944_v30  ;;  %v5956_v30 = vld [vmem:[%s8990_s16] sm:$0x3] }
 0x7b2   :  { %v5961_v22 = vrot.slane %v5956_v30, %v8846_v17  ;;  %v5965_v25 = vrot.slane %v5956_v30, %v8849_v18  ;;  %v7381_v17 = vld [vmem:[%s8992_s18] ss:$0 sm:$0xff] }
 0x804   :  { %v7416_v8 = vpop.f32.mrb[24].mxu1 }
 0x805   :  { %v7417_v59 = vpop.f32.mrb[25].mxu1 }
 0x806   :  { %v7418_v10 = vadd.f32 %v7417_v59, %v7416_v8  ;;  %v7419_v11 = vpop.f32.mrb[26].mxu1 }
 0x807   :  { %v7420_v13 = vpop.f32.mrb[27].mxu1 }
 0x808   :  { %v7421_v15 = vadd.f32 %v7420_v13, %v7419_v11  ;;  %v5886_v60 = vadd.f32 %v7418_v10, %v7300_v58 }
 0x80a   :  { %v5889_v61 = vadd.f32 %v7421_v15, %v7300_v58 }
 0x884   :  { %v6365_v26 = vpop.f32.mrb[28].mxu1 }
 0x885   :  { %v7488_v23 = vadd.f32 %v6365_v26, %v5961_v22  ;;  %v6367_v27 = vpop.f32.mrb[29].mxu1 }
 0x886   :  { %v7489_v47 = vadd.f32 %v6367_v27, %v5965_v25  ;;  %v6369_v28 = vpop.f32.mrb[30].mxu1 }
 0x887   :  { %v7490_v31 = vadd.f32 %v6369_v28, %v5961_v22  ;;  %v6371_v32 = vpop.f32.mrb[31].mxu1  ;;  %v6374_v35 = vmax.f32 %v7488_v23, 0.0 }
 0x888   :  { %v7491_v34 = vadd.f32 %v6371_v32, %v5965_v25  ;;  %v6375_v39 = vmax.f32 %v7489_v47, 0.0 }
 0x889   :  { %v6376_v38 = vmax.f32 %v7490_v31, 0.0 }
 0x88a   :  { %v6377_v40 = vmax.f32 %v7491_v34, 0.0 }
 0x88b   :  { %v6378_v41 = vpack.c.bf16 %v6376_v38, %v6374_v35 }
 0x88c   :  { %v6379_v42 = vpack.c.bf16 %v6377_v40, %v6375_v39 }
 0x88e   :  { %6547 = vmatprep.mubr.bf16.mxu0 %v6379_v42 }
 0x88f   :  { %6548 = vmatmul.mubr.bf16.vlgmr.msra.gmra.mrb[28].mxu0 %v6378_v41 }
 0x962   :  { %v7438_v43 = vpop.f32.mrb[28].mxu0 }
 0x963   :  { %v7439_v18 = vpop.f32.mrb[29].mxu0 }
 0x964   :  { %v7440_v33 = vadd.f32 %v7439_v18, %v7438_v43  ;;  %v7441_v44 = vpop.f32.mrb[30].mxu0 }
 0x965   :  { %v7442_v36 = vpop.f32.mrb[31].mxu0 }
 0x966   :  { %v6550_v45 = vadd.f32 %v7440_v33, %v7381_v17  ;;  %v7443_v46 = vadd.f32 %v7442_v36, %v7441_v44 }
 0x968   :  { %v6556_v48 = vmax.f32 %v6550_v45, 0.0  ;;  %v6553_v49 = vadd.f32 %v7443_v46, %v7381_v17 }
 0x96a   :  { %v7398_v50 = vmul.f32 -1.442695, %v6556_v48  ;;  %v6557_v51 = vmax.f32 %v6553_v49, 0.0 }
 0x96c   :  { %8370 = vpow2.f32 %v7398_v50  ;;  %v7399_v52 = vmul.f32 -1.442695, %v6557_v51 }
 0x96e   :  { %8372 = vpow2.f32 %v7399_v52 }
 0x976   :  { %v8371_v53 = vpop.eup %8370 }
 0x977   :  { %v6564_v54 = vadd.f32 1.0, %v8371_v53 }
 0x978   :  { %v8373_v55 = vpop.eup %8372 }
 0x979   :  { %8374 = vrcp.f32 %v6564_v54  ;;  %v6565_v56 = vadd.f32 1.0, %v8373_v55 }
 0x97b   :  { %8376 = vrcp.f32 %v6565_v56 }
 0x983   :  { %v8375_v37 = vpop.eup %8374 }
 0x984   :  { %v6573_v24 = vsel %vm6572_vm1, %v5886_v60, %v8375_v37 }
 0x985   :  { %v8377_v62 = vpop.eup %8376  ;;  %6575 = vst [vmem:[%s8993_s19] sm:$0xff] %v6573_v24 }
 0x986   :  { %v6574_v63 = vsel %vm6572_vm1, %v5889_v61, %v8377_v62 }
 0x987   :  { %6576 = vst [vmem:[%s8993_s19 + $0x8] sm:$0xff] %v6574_v63 }
 0x988   :  { %6581 = vsyncpa [#allocation3], 1 }
 0x989   :  { %6582 = vsyncpa [#allocation5], 1 }
 0x98a   :  { %6583 = vsyncpa [#allocation8], 1 }
 0x98b   :  { %6584 = vsyncpa [#allocation11], 1 }
 0x98c   :  { %6585 = vsyncpa [#allocation14], 1 }

</bundles_post_ra>
